<compile_context>
chip_gen: v7x
topology: tpu7x:2x2x1
jax: 0.10.0
libtpu: 0.0.40
codegen_flags: <defaults>
</compile_context>

<pallas_src>
import jax
import jax.numpy as jnp
from jax.experimental import pallas as pl
from jax.experimental.pallas import tpu as pltpu

CPAD = 128  # lane-padded output-channel count for the conv GEMMs

_VMEM = pl.BlockSpec(memory_space=pltpu.MemorySpace.VMEM)


# ----------------------------------------------------------------------------
# Pallas kernels
# ----------------------------------------------------------------------------
def _mm_bias_relu_kernel(x_ref, w_ref, b_ref, o_ref):
    """(M, K) bf16 @ (K, 128) bf16 -> f32 accum, +bias, relu, bf16 store."""
    y = jnp.dot(x_ref[...], w_ref[...], preferred_element_type=jnp.float32)
    y = jnp.maximum(y + b_ref[...], 0.0)
    o_ref[...] = y.astype(o_ref.dtype)


def _fc_tail_kernel(x_ref, w1_ref, b1_ref, w2_ref, b2_ref, o_ref):
    """Fused fc1(relu) + fc2(tanh); elementwise math in f32."""
    h = jnp.dot(x_ref[...], w1_ref[...], preferred_element_type=jnp.float32)
    h = jnp.maximum(h + b1_ref[...], 0.0).astype(jnp.bfloat16)
    y = jnp.dot(h, w2_ref[...], preferred_element_type=jnp.float32)
    o_ref[...] = jnp.tanh(y + b2_ref[...])


def conv_gemm_relu(cols, w2d_pad, b_pad):
    """cols:(M,K) bf16 @ w:(K,128) bf16 + b:(1,128) f32, relu -> (M,128) bf16."""
    m = cols.shape[0]
    return pl.pallas_call(
        _mm_bias_relu_kernel,
        out_shape=jax.ShapeDtypeStruct((m, CPAD), jnp.bfloat16),
        in_specs=[_VMEM, _VMEM, _VMEM],
        out_specs=_VMEM,
    )(cols, w2d_pad, b_pad)


def fc_tail(x_flat, w1, b1, w2, b2):
    m = x_flat.shape[0]
    a = w2.shape[1]
    return pl.pallas_call(
        _fc_tail_kernel,
        out_shape=jax.ShapeDtypeStruct((m, a), jnp.float32),
        in_specs=[_VMEM] * 5,
        out_specs=_VMEM,
    )(x_flat, w1, b1, w2, b2)


# ----------------------------------------------------------------------------
# im2col (XLA glue, NHWC): cols ordered (kh, kw, c) along the K axis
# ----------------------------------------------------------------------------
def _im2col_nhwc(x, kh, kw, stride):
    n, h, w, c = x.shape
    ho = (h - kh) // stride + 1
    wo = (w - kw) // stride + 1
    patches = []
    for i in range(kh):
        for j in range(kw):
            patches.append(
                x[:, i : i + stride * ho : stride, j : j + stride * wo : stride, :]
            )
    cols = jnp.concatenate(patches, axis=-1)          # (N, Ho, Wo, kh*kw*C)
    return cols.reshape(n * ho * wo, kh * kw * c), ho, wo


# ----------------------------------------------------------------------------
# Parameter init (mirrors the PyTorch module) + one-time kernel-layout prep
# ----------------------------------------------------------------------------
def init_actor_params(key, action_size, c1_filters=16, c2_filters=32, fc1_units=128):
    def uniform(k, shape, lim):
        return jax.random.uniform(k, shape, jnp.float32, minval=-lim, maxval=lim)

    ks = jax.random.split(key, 10)
    # hidden_init uses weight.size()[0]: out_channels / out_features
    lim_c1 = 1.0 / jnp.sqrt(float(c1_filters))
    lim_c2 = 1.0 / jnp.sqrt(float(c2_filters))
    lim_c3 = 1.0 / jnp.sqrt(float(c2_filters))
    lim_fc1 = 1.0 / jnp.sqrt(float(fc1_units))
    return {
        "c1_w": uniform(ks[0], (c1_filters, 4, 8, 8), lim_c1),
        "c1_b": uniform(ks[1], (c1_filters,), lim_c1),
        "c2_w": uniform(ks[2], (c2_filters, c1_filters, 4, 4), lim_c2),
        "c2_b": uniform(ks[3], (c2_filters,), lim_c2),
        "c3_w": uniform(ks[4], (c2_filters, c2_filters, 3, 3), lim_c3),
        "c3_b": uniform(ks[5], (c2_filters,), lim_c3),
        "fc1_w": uniform(ks[6], (fc1_units, c2_filters * 7 * 7), lim_fc1),
        "fc1_b": uniform(ks[7], (fc1_units,), lim_fc1),
        "fc2_w": uniform(ks[8], (action_size, fc1_units), 0.003),
        "fc2_b": uniform(ks[9], (action_size,), 0.003),
    }


def _prep_conv(w, b):
    """torch (Cout,Cin,kh,kw) -> (kh*kw*Cin, 128) bf16 matmul weight + (1,128) f32 bias."""
    cout, cin, kh, kw = w.shape
    w2d = jnp.transpose(w, (2, 3, 1, 0)).reshape(kh * kw * cin, cout)  # rows (i,j,c)
    w2d = jnp.pad(w2d, ((0, 0), (0, CPAD - cout)))
    bp = jnp.pad(b.reshape(1, cout), ((0, 0), (0, CPAD - cout))).astype(jnp.float32)
    return w2d.astype(jnp.bfloat16), bp


def prepare_actor_params(params, c2_filters=32, fc1_units=128):
    """One-time weight layout prep (run once, outside the per-step forward)."""
    c1w, c1b = _prep_conv(params["c1_w"], params["c1_b"])
    c2w, c2b = _prep_conv(params["c2_w"], params["c2_b"])
    c3w, c3b = _prep_conv(params["c3_w"], params["c3_b"])
    # fc1: torch input index = c*49 + p  (p = h*7 + w).  Our flattened conv3
    # activation is x_flat[n, p*CPAD + c], so permute / zero-pad rows to match.
    w1 = params["fc1_w"].reshape(fc1_units, c2_filters, 49)        # [f, c, p]
    w1 = jnp.transpose(w1, (2, 1, 0))                              # [p, c, f]
    w1 = jnp.pad(w1, ((0, 0), (0, CPAD - c2_filters), (0, 0)))     # pad channel dim
    w1 = w1.reshape(49 * CPAD, fc1_units).astype(jnp.bfloat16)     # row = p*CPAD + c
    b1 = params["fc1_b"].reshape(1, fc1_units).astype(jnp.float32)
    w2 = params["fc2_w"].T.astype(jnp.bfloat16)                    # (fc1_units, A)
    b2 = params["fc2_b"].reshape(1, -1).astype(jnp.float32)
    return {
        "c1_w": c1w, "c1_b": c1b,
        "c2_w": c2w, "c2_b": c2b,
        "c3_w": c3w, "c3_b": c3b,
        "fc1_w": w1, "fc1_b": b1,
        "fc2_w": w2, "fc2_b": b2,
    }


# ----------------------------------------------------------------------------
# Forward: relu(c1) -> relu(c2) -> relu(c3) -> flatten -> relu(fc1) -> tanh(fc2)
# ----------------------------------------------------------------------------
def actor_forward(prep, state, c1_filters=16, c2_filters=32):
    """state: (N, 4, 84, 84) NCHW f32 (PyTorch layout) -> (N, action_size)."""
    n = state.shape[0]
    x = jnp.transpose(state, (0, 2, 3, 1)).astype(jnp.bfloat16)     # NHWC, bf16

    # conv1: 8x8 stride 4 -> (N, 20, 20, 16)
    cols, ho, wo = _im2col_nhwc(x, 8, 8, 4)                         # (N*400, 256)
    y = conv_gemm_relu(cols, prep["c1_w"], prep["c1_b"])            # (N*400, 128)
    x = y.reshape(n, ho, wo, CPAD)[..., :c1_filters]

    # conv2: 4x4 stride 2 -> (N, 9, 9, 32)
    cols, ho, wo = _im2col_nhwc(x, 4, 4, 2)                         # (N*81, 256)
    y = conv_gemm_relu(cols, prep["c2_w"], prep["c2_b"])            # (N*81, 128)
    x = y.reshape(n, ho, wo, CPAD)[..., :c2_filters]

    # conv3: 3x3 stride 1 -> (N, 7, 7, 32)
    cols, ho, wo = _im2col_nhwc(x, 3, 3, 1)                         # (N*49, 288)
    y = conv_gemm_relu(cols, prep["c3_w"], prep["c3_b"])            # (N*49, 128)

    # flatten (free row-major reshape; fc1 weight rows were pre-permuted to
    # (position, padded-channel) order) + fused fc1(relu)/fc2(tanh) kernel.
    x_flat = y.reshape(n, ho * wo * CPAD)                           # (N, 6272)
    return fc_tail(x_flat, prep["fc1_w"], prep["fc1_b"],
                   prep["fc2_w"], prep["fc2_b"])


if __name__ == "__main__":
    key = jax.random.PRNGKey(0)
    k_param, k_input = jax.random.split(key)

    action_size = 4
    batch = 2
    raw_params = init_actor_params(k_param, action_size)
    prep = prepare_actor_params(raw_params)     # one-time weight prep

    # Spatial size must be 84x84 so conv3 output is 7x7 (fc1 expects 32*7*7)
    state = jax.random.uniform(k_input, (batch, 4, 84, 84), jnp.float32)

    fwd = jax.jit(actor_forward)
    out = jax.block_until_ready(fwd(prep, state))

    assert out.shape == (batch, action_size), out.shape
    assert bool(jnp.all(jnp.abs(out) <= 1.0)), "tanh output out of range"
    assert bool(jnp.all(jnp.isfinite(out))), "non-finite output"

    print("KERNEL_OK")
</pallas_src>

<mosaic_0001>
module attributes {stable_mosaic.version = 11 : i64} {
  func.func @_mm_bias_relu_kernel(%arg0: memref<800x256xbf16, #tpu.memory_space<vmem>>, %arg1: memref<256x128xbf16, #tpu.memory_space<vmem>>, %arg2: memref<1x128xf32, #tpu.memory_space<vmem>>, %arg3: memref<800x128xbf16, #tpu.memory_space<vmem>>) attributes {dimension_semantics = [], scalar_prefetch = 0 : i64, scratch_operands = 0 : i64, tpu.core_type = #tpu.core_type<tc>} {
    %c0 = arith.constant 0 : index
    %c0_0 = arith.constant 0 : index
    %0 = vector.load %arg0[%c0, %c0_0] : memref<800x256xbf16, #tpu.memory_space<vmem>>, vector<800x256xbf16>
    %c0_1 = arith.constant 0 : index
    %c0_2 = arith.constant 0 : index
    %1 = vector.load %arg1[%c0_1, %c0_2] : memref<256x128xbf16, #tpu.memory_space<vmem>>, vector<256x128xbf16>
    %cst = arith.constant dense<0.000000e+00> : vector<800x128xf32>
    %2 = tpu.matmul %0, %1, %cst {dimension_numbers = #tpu.dot_dimension_numbers<[1], [0], [0], [1], [0, 0, 1, 1], [], []>} : vector<800x256xbf16>, vector<256x128xbf16>, vector<800x128xf32> -> vector<800x128xf32>
    %c0_3 = arith.constant 0 : index
    %c0_4 = arith.constant 0 : index
    %3 = vector.load %arg2[%c0_3, %c0_4] : memref<1x128xf32, #tpu.memory_space<vmem>>, vector<1x128xf32>
    %4 = vector.broadcast %3 : vector<1x128xf32> to vector<800x128xf32>
    %5 = arith.addf %2, %4 : vector<800x128xf32>
    %cst_5 = arith.constant 0.000000e+00 : f32
    %6 = vector.broadcast %cst_5 : f32 to vector<800x128xf32>
    %7 = arith.maximumf %5, %6 : vector<800x128xf32>
    %8 = arith.truncf %7 : vector<800x128xf32> to vector<800x128xbf16>
    %c0_6 = arith.constant 0 : index
    %c0_7 = arith.constant 0 : index
    %9 = vector.load %arg3[%c0_6, %c0_7] : memref<800x128xbf16, #tpu.memory_space<vmem>>, vector<800x128xbf16>
    tpu.vector_store %arg3[%c0_6, %c0_7], %8 {strides = array<i32>} : memref<800x128xbf16, #tpu.memory_space<vmem>>, vector<800x128xbf16>,
    return
  }
}

module attributes {stable_mosaic.version = 11 : i64} {
  func.func @_mm_bias_relu_kernel(%arg0: memref<162x256xbf16, #tpu.memory_space<vmem>>, %arg1: memref<256x128xbf16, #tpu.memory_space<vmem>>, %arg2: memref<1x128xf32, #tpu.memory_space<vmem>>, %arg3: memref<162x128xbf16, #tpu.memory_space<vmem>>) attributes {dimension_semantics = [], scalar_prefetch = 0 : i64, scratch_operands = 0 : i64, tpu.core_type = #tpu.core_type<tc>} {
    %c0 = arith.constant 0 : index
    %c0_0 = arith.constant 0 : index
    %0 = vector.load %arg0[%c0, %c0_0] : memref<162x256xbf16, #tpu.memory_space<vmem>>, vector<162x256xbf16>
    %c0_1 = arith.constant 0 : index
    %c0_2 = arith.constant 0 : index
    %1 = vector.load %arg1[%c0_1, %c0_2] : memref<256x128xbf16, #tpu.memory_space<vmem>>, vector<256x128xbf16>
    %cst = arith.constant dense<0.000000e+00> : vector<162x128xf32>
    %2 = tpu.matmul %0, %1, %cst {dimension_numbers = #tpu.dot_dimension_numbers<[1], [0], [0], [1], [0, 0, 1, 1], [], []>} : vector<162x256xbf16>, vector<256x128xbf16>, vector<162x128xf32> -> vector<162x128xf32>
    %c0_3 = arith.constant 0 : index
    %c0_4 = arith.constant 0 : index
    %3 = vector.load %arg2[%c0_3, %c0_4] : memref<1x128xf32, #tpu.memory_space<vmem>>, vector<1x128xf32>
    %4 = vector.broadcast %3 : vector<1x128xf32> to vector<162x128xf32>
    %5 = arith.addf %2, %4 : vector<162x128xf32>
    %cst_5 = arith.constant 0.000000e+00 : f32
    %6 = vector.broadcast %cst_5 : f32 to vector<162x128xf32>
    %7 = arith.maximumf %5, %6 : vector<162x128xf32>
    %8 = arith.truncf %7 : vector<162x128xf32> to vector<162x128xbf16>
    %c0_6 = arith.constant 0 : index
    %c0_7 = arith.constant 0 : index
    %9 = vector.load %arg3[%c0_6, %c0_7] : memref<162x128xbf16, #tpu.memory_space<vmem>>, vector<162x128xbf16>
    tpu.vector_store %arg3[%c0_6, %c0_7], %8 {strides = array<i32>} : memref<162x128xbf16, #tpu.memory_space<vmem>>, vector<162x128xbf16>,
    return
  }
}

module attributes {stable_mosaic.version = 11 : i64} {
  func.func @_mm_bias_relu_kernel(%arg0: memref<98x288xbf16, #tpu.memory_space<vmem>>, %arg1: memref<288x128xbf16, #tpu.memory_space<vmem>>, %arg2: memref<1x128xf32, #tpu.memory_space<vmem>>, %arg3: memref<98x128xbf16, #tpu.memory_space<vmem>>) attributes {dimension_semantics = [], scalar_prefetch = 0 : i64, scratch_operands = 0 : i64, tpu.core_type = #tpu.core_type<tc>} {
    %c0 = arith.constant 0 : index
    %c0_0 = arith.constant 0 : index
    %0 = vector.load %arg0[%c0, %c0_0] : memref<98x288xbf16, #tpu.memory_space<vmem>>, vector<98x288xbf16>
    %c0_1 = arith.constant 0 : index
    %c0_2 = arith.constant 0 : index
    %1 = vector.load %arg1[%c0_1, %c0_2] : memref<288x128xbf16, #tpu.memory_space<vmem>>, vector<288x128xbf16>
    %cst = arith.constant dense<0.000000e+00> : vector<98x128xf32>
    %2 = tpu.matmul %0, %1, %cst {dimension_numbers = #tpu.dot_dimension_numbers<[1], [0], [0], [1], [0, 0, 1, 1], [], []>} : vector<98x288xbf16>, vector<288x128xbf16>, vector<98x128xf32> -> vector<98x128xf32>
    %c0_3 = arith.constant 0 : index
    %c0_4 = arith.constant 0 : index
    %3 = vector.load %arg2[%c0_3, %c0_4] : memref<1x128xf32, #tpu.memory_space<vmem>>, vector<1x128xf32>
    %4 = vector.broadcast %3 : vector<1x128xf32> to vector<98x128xf32>
    %5 = arith.addf %2, %4 : vector<98x128xf32>
    %cst_5 = arith.constant 0.000000e+00 : f32
    %6 = vector.broadcast %cst_5 : f32 to vector<98x128xf32>
    %7 = arith.maximumf %5, %6 : vector<98x128xf32>
    %8 = arith.truncf %7 : vector<98x128xf32> to vector<98x128xbf16>
    %c0_6 = arith.constant 0 : index
    %c0_7 = arith.constant 0 : index
    %9 = vector.load %arg3[%c0_6, %c0_7] : memref<98x128xbf16, #tpu.memory_space<vmem>>, vector<98x128xbf16>
    tpu.vector_store %arg3[%c0_6, %c0_7], %8 {strides = array<i32>} : memref<98x128xbf16, #tpu.memory_space<vmem>>, vector<98x128xbf16>,
    return
  }
}

module attributes {stable_mosaic.version = 11 : i64} {
  func.func @_fc_tail_kernel(%arg0: memref<2x6272xbf16, #tpu.memory_space<vmem>>, %arg1: memref<6272x128xbf16, #tpu.memory_space<vmem>>, %arg2: memref<1x128xf32, #tpu.memory_space<vmem>>, %arg3: memref<128x4xbf16, #tpu.memory_space<vmem>>, %arg4: memref<1x4xf32, #tpu.memory_space<vmem>>, %arg5: memref<2x4xf32, #tpu.memory_space<vmem>>) attributes {dimension_semantics = [], scalar_prefetch = 0 : i64, scratch_operands = 0 : i64, tpu.core_type = #tpu.core_type<tc>} {
    %c0 = arith.constant 0 : index
    %c0_0 = arith.constant 0 : index
    %0 = vector.load %arg0[%c0, %c0_0] : memref<2x6272xbf16, #tpu.memory_space<vmem>>, vector<2x6272xbf16>
    %c0_1 = arith.constant 0 : index
    %c0_2 = arith.constant 0 : index
    %1 = vector.load %arg1[%c0_1, %c0_2] : memref<6272x128xbf16, #tpu.memory_space<vmem>>, vector<6272x128xbf16>
    %cst = arith.constant dense<0.000000e+00> : vector<2x128xf32>
    %2 = tpu.matmul %0, %1, %cst {dimension_numbers = #tpu.dot_dimension_numbers<[1], [0], [0], [1], [0, 0, 1, 1], [], []>} : vector<2x6272xbf16>, vector<6272x128xbf16>, vector<2x128xf32> -> vector<2x128xf32>
    %c0_3 = arith.constant 0 : index
    %c0_4 = arith.constant 0 : index
    %3 = vector.load %arg2[%c0_3, %c0_4] : memref<1x128xf32, #tpu.memory_space<vmem>>, vector<1x128xf32>
    %4 = vector.broadcast %3 : vector<1x128xf32> to vector<2x128xf32>
    %5 = arith.addf %2, %4 : vector<2x128xf32>
    %cst_5 = arith.constant 0.000000e+00 : f32
    %6 = vector.broadcast %cst_5 : f32 to vector<2x128xf32>
    %7 = arith.maximumf %5, %6 : vector<2x128xf32>
    %8 = arith.truncf %7 : vector<2x128xf32> to vector<2x128xbf16>
    %c0_6 = arith.constant 0 : index
    %c0_7 = arith.constant 0 : index
    %9 = vector.load %arg3[%c0_6, %c0_7] : memref<128x4xbf16, #tpu.memory_space<vmem>>, vector<128x4xbf16>
    %cst_8 = arith.constant dense<0.000000e+00> : vector<2x4xf32>
    %10 = tpu.matmul %8, %9, %cst_8 {dimension_numbers = #tpu.dot_dimension_numbers<[1], [0], [0], [1], [0, 0, 1, 1], [], []>} : vector<2x128xbf16>, vector<128x4xbf16>, vector<2x4xf32> -> vector<2x4xf32>
    %c0_9 = arith.constant 0 : index
    %c0_10 = arith.constant 0 : index
    %11 = vector.load %arg4[%c0_9, %c0_10] : memref<1x4xf32, #tpu.memory_space<vmem>>, vector<1x4xf32>
    %12 = vector.broadcast %11 : vector<1x4xf32> to vector<2x4xf32>
    %13 = arith.addf %10, %12 : vector<2x4xf32>
    %14 = math.tanh %13 : vector<2x4xf32>
    %c0_11 = arith.constant 0 : index
    %c0_12 = arith.constant 0 : index
    %15 = vector.load %arg5[%c0_11, %c0_12] : memref<2x4xf32, #tpu.memory_space<vmem>>, vector<2x4xf32>
    tpu.vector_store %arg5[%c0_11, %c0_12], %14 {strides = array<i32>} : memref<2x4xf32, #tpu.memory_space<vmem>>, vector<2x4xf32>,
    return
  }
}

</mosaic_0001>

<bundles_post_ra>
// kernel: actor_forward.4
= control target key start
LH: loop header
LB: loop body
LE: loop exit
PB: predicated region body
PF: predicated region fallthrough
CT: control target
= control target key end

     0   :  { %v2602_v0 = vmov 0   ;;  %s3258_s1 = inlined_call_operand.vmem [shape: bf16[256,128], index: 1, kind: input, shape index: {}]   ;;  %s3259_s0 = inlined_call_operand.vmem [shape: bf16[800,256], index: 0, kind: input, shape index: {}]   ;;  %s3260_s2 = inlined_call_operand.vmem [shape: f32[1,128], index: 2, kind: input, shape index: {}]   ;;  %s3261_s3 = inlined_call_operand.vmem [shape: bf16[800,128], index: 3, kind: output, shape index: {}]  }
   0x1   :  { %750 = vmatprep.subr.bf16.mxu0 %v2602_v0  ;;  %2403 = vmatprep.subr.bf16.mxu1 %v2602_v0  ;;  %v2436_v1 = vld [vmem:[%s3258_s1] sm:$0xff]   ;;  %v2437_v2 = vld [vmem:[%s3258_s1 + $0x8] sm:$0xff]   ;;  %v2438_v3 = vld [vmem:[%s3258_s1 + $0x10] sm:$0xff]  }
   0x2   :  { %751 = vmatpush1.bf16.msra.mxu0 %v2436_v1  ;;  %2419 = vmatpush1.bf16.msra.mxu1 %v2436_v1  ;;  %v2439_v4 = vld [vmem:[%s3258_s1 + $0x18] sm:$0xff]   ;;  %v2440_v5 = vld [vmem:[%s3258_s1 + $0x20] sm:$0xff]   ;;  %v2441_v7 = vld [vmem:[%s3258_s1 + $0x28] sm:$0xff]  }
   0x3   :  { %752 = vmatprep.subr.bf16.mxu0 %v2602_v0  ;;  %2404 = vmatprep.subr.bf16.mxu1 %v2602_v0  ;;  %v2454_v6 = vld [vmem:[%s3259_s0 + $0x4] ss:$8 sps:$4 sm:$0xff]   ;;  %v2457_v8 = vld [vmem:[%s3259_s0 + $0x194] ss:$8 sps:$4 sm:$0xff]   ;;  %v2452_v19 = vld [vmem:[%s3259_s0] ss:$8 sps:$4 sm:$0xff]  }
   0x4   :  { %782 = vmatprep.mubr.bf16.mxu0 %v2454_v6  ;;  %982 = vmatprep.mubr.bf16.mxu1 %v2457_v8  ;;  %v2442_v9 = vld [vmem:[%s3258_s1 + $0x30] sm:$0xff]   ;;  %v2443_v10 = vld [vmem:[%s3258_s1 + $0x38] sm:$0xff]   ;;  %v2444_v11 = vld [vmem:[%s3258_s1 + $0x40] sm:$0xff]  }
   0x5   :  { %v2445_v12 = vld [vmem:[%s3258_s1 + $0x48] sm:$0xff]   ;;  %v2446_v13 = vld [vmem:[%s3258_s1 + $0x50] sm:$0xff]   ;;  %v2447_v14 = vld [vmem:[%s3258_s1 + $0x58] sm:$0xff]  }
   0x6   :  { %753 = vmatpush1.bf16.msra.mxu0 %v2437_v2  ;;  %2420 = vmatpush1.bf16.msra.mxu1 %v2437_v2  ;;  %v2448_v15 = vld [vmem:[%s3258_s1 + $0x60] sm:$0xff]   ;;  %v2449_v16 = vld [vmem:[%s3258_s1 + $0x68] sm:$0xff]   ;;  %v2450_v17 = vld [vmem:[%s3258_s1 + $0x70] sm:$0xff]  }
   0x7   :  { %754 = vmatprep.subr.bf16.mxu0 %v2602_v0  ;;  %2405 = vmatprep.subr.bf16.mxu1 %v2602_v0  ;;  %v2451_v18 = vld [vmem:[%s3258_s1 + $0x78] sm:$0xff]   ;;  %v2460_v22 = vld [vmem:[%s3259_s0 + $0x1a4] ss:$8 sps:$4 sm:$0xff]   ;;  %v2463_v24 = vld [vmem:[%s3259_s0 + $0x1a0] ss:$8 sps:$4 sm:$0xff]  }
   0x8   :  { %v2455_v20 = vld [vmem:[%s3259_s0 + $0x190] ss:$8 sps:$4 sm:$0xff]   ;;  %v2458_v21 = vld [vmem:[%s3259_s0 + $0x14] ss:$8 sps:$4 sm:$0xff]   ;;  %v2464_v25 = vld [vmem:[%s3259_s0 + $0x24] ss:$8 sps:$4 sm:$0xff]  }
   0x9   :  { %v2462_v23 = vld [vmem:[%s3259_s0 + $0x10] ss:$8 sps:$4 sm:$0xff]   ;;  %v2466_v26 = vld [vmem:[%s3259_s0 + $0x1b4] ss:$8 sps:$4 sm:$0xff]   ;;  %v2468_v27 = vld [vmem:[%s3259_s0 + $0x20] ss:$8 sps:$4 sm:$0xff]  }
   0xa   :  { %755 = vmatpush1.bf16.msra.mxu0 %v2438_v3  ;;  %2421 = vmatpush1.bf16.msra.mxu1 %v2438_v3  ;;  %v2469_v28 = vld [vmem:[%s3259_s0 + $0x1b0] ss:$8 sps:$4 sm:$0xff]   ;;  %v2470_v29 = vld [vmem:[%s3259_s0 + $0x34] ss:$8 sps:$4 sm:$0xff]   ;;  %v2472_v30 = vld [vmem:[%s3259_s0 + $0x1c4] ss:$8 sps:$4 sm:$0xff]  }
   0xb   :  { %756 = vmatprep.subr.bf16.mxu0 %v2602_v0  ;;  %2406 = vmatprep.subr.bf16.mxu1 %v2602_v0  ;;  %v2474_v31 = vld [vmem:[%s3259_s0 + $0x30] ss:$8 sps:$4 sm:$0xff]   ;;  %v2475_v32 = vld [vmem:[%s3259_s0 + $0x1c0] ss:$8 sps:$4 sm:$0xff]   ;;  %v2476_v33 = vld [vmem:[%s3259_s0 + $0x44] ss:$8 sps:$4 sm:$0xff]  }
   0xc   :  { %v2478_v34 = vld [vmem:[%s3259_s0 + $0x1d4] ss:$8 sps:$4 sm:$0xff]   ;;  %v2480_v35 = vld [vmem:[%s3259_s0 + $0x40] ss:$8 sps:$4 sm:$0xff]   ;;  %v2481_v36 = vld [vmem:[%s3259_s0 + $0x1d0] ss:$8 sps:$4 sm:$0xff]  }
   0xd   :  { %v2482_v37 = vld [vmem:[%s3259_s0 + $0x54] ss:$8 sps:$4 sm:$0xff]   ;;  %v2484_v38 = vld [vmem:[%s3259_s0 + $0x1e4] ss:$8 sps:$4 sm:$0xff]   ;;  %v2486_v39 = vld [vmem:[%s3259_s0 + $0x50] ss:$8 sps:$4 sm:$0xff]  }
   0xe   :  { %757 = vmatpush1.bf16.msra.mxu0 %v2439_v4  ;;  %2422 = vmatpush1.bf16.msra.mxu1 %v2439_v4  ;;  %v2487_v40 = vld [vmem:[%s3259_s0 + $0x1e0] ss:$8 sps:$4 sm:$0xff]   ;;  %v2488_v41 = vld [vmem:[%s3259_s0 + $0x64] ss:$8 sps:$4 sm:$0xff]   ;;  %v2490_v42 = vld [vmem:[%s3259_s0 + $0x1f4] ss:$8 sps:$4 sm:$0xff]  }
   0xf   :  { %758 = vmatprep.subr.bf16.mxu0 %v2602_v0  ;;  %2407 = vmatprep.subr.bf16.mxu1 %v2602_v0  ;;  %v2492_v43 = vld [vmem:[%s3259_s0 + $0x60] ss:$8 sps:$4 sm:$0xff]   ;;  %v2493_v44 = vld [vmem:[%s3259_s0 + $0x1f0] ss:$8 sps:$4 sm:$0xff]   ;;  %v2494_v45 = vld [vmem:[%s3259_s0 + $0x74] ss:$8 sps:$4 sm:$0xff]  }
  0x10   :  { %v2496_v46 = vld [vmem:[%s3259_s0 + $0x204] ss:$8 sps:$4 sm:$0xff]   ;;  %v2498_v47 = vld [vmem:[%s3259_s0 + $0x70] ss:$8 sps:$4 sm:$0xff]   ;;  %v2499_v48 = vld [vmem:[%s3259_s0 + $0x200] ss:$8 sps:$4 sm:$0xff]  }
  0x11   :  { %v2500_v49 = vld [vmem:[%s3259_s0 + $0x84] ss:$8 sps:$4 sm:$0xff]   ;;  %v2502_v50 = vld [vmem:[%s3259_s0 + $0x214] ss:$8 sps:$4 sm:$0xff]   ;;  %v2504_v51 = vld [vmem:[%s3259_s0 + $0x80] ss:$8 sps:$4 sm:$0xff]  }
  0x12   :  { %759 = vmatpush1.bf16.msra.mxu0 %v2440_v5  ;;  %2423 = vmatpush1.bf16.msra.mxu1 %v2440_v5  ;;  %v2505_v52 = vld [vmem:[%s3259_s0 + $0x210] ss:$8 sps:$4 sm:$0xff]   ;;  %v2506_v53 = vld [vmem:[%s3259_s0 + $0x94] ss:$8 sps:$4 sm:$0xff]   ;;  %v2508_v54 = vld [vmem:[%s3259_s0 + $0x224] ss:$8 sps:$4 sm:$0xff]  }
  0x13   :  { %760 = vmatprep.subr.bf16.mxu0 %v2602_v0  ;;  %2408 = vmatprep.subr.bf16.mxu1 %v2602_v0  ;;  %v2510_v55 = vld [vmem:[%s3259_s0 + $0x90] ss:$8 sps:$4 sm:$0xff]   ;;  %v2511_v56 = vld [vmem:[%s3259_s0 + $0x220] ss:$8 sps:$4 sm:$0xff]   ;;  %v2512_v57 = vld [vmem:[%s3259_s0 + $0xa4] ss:$8 sps:$4 sm:$0xff]  }
  0x14   :  { %v2514_v58 = vld [vmem:[%s3259_s0 + $0x234] ss:$8 sps:$4 sm:$0xff]   ;;  %v2516_v59 = vld [vmem:[%s3259_s0 + $0xa0] ss:$8 sps:$4 sm:$0xff]   ;;  %v2517_v60 = vld [vmem:[%s3259_s0 + $0x230] ss:$8 sps:$4 sm:$0xff]  }
  0x15   :  { %v2518_v61 = vld [vmem:[%s3259_s0 + $0xb4] ss:$8 sps:$4 sm:$0xff]   ;;  %v2520_v62 = vld [vmem:[%s3259_s0 + $0x244] ss:$8 sps:$4 sm:$0xff]   ;;  %v2522_v63 = vld [vmem:[%s3259_s0 + $0xb0] ss:$8 sps:$4 sm:$0xff]  }
  0x16   :  { %761 = vmatpush1.bf16.msra.mxu0 %v2441_v7  ;;  %2424 = vmatpush1.bf16.msra.mxu1 %v2441_v7  ;;  %v2524_v1 = vld [vmem:[%s3259_s0 + $0xc4] ss:$8 sps:$4 sm:$0xff]   ;;  %v2526_v2 = vld [vmem:[%s3259_s0 + $0x254] ss:$8 sps:$4 sm:$0xff]   ;;  %v2528_v3 = vld [vmem:[%s3259_s0 + $0xc0] ss:$8 sps:$4 sm:$0xff]  }
  0x17   :  { %762 = vmatprep.subr.bf16.mxu0 %v2602_v0  ;;  %2409 = vmatprep.subr.bf16.mxu1 %v2602_v0  ;;  %v2529_v4 = vld [vmem:[%s3259_s0 + $0x250] ss:$8 sps:$4 sm:$0xff]   ;;  %v2530_v5 = vld [vmem:[%s3259_s0 + $0xd4] ss:$8 sps:$4 sm:$0xff]   ;;  %v2532_v6 = vld [vmem:[%s3259_s0 + $0x264] ss:$8 sps:$4 sm:$0xff]  }
  0x18   :  { %v2534_v7 = vld [vmem:[%s3259_s0 + $0xd0] ss:$8 sps:$4 sm:$0xff]   ;;  %v2535_v8 = vld [vmem:[%s3259_s0 + $0x260] ss:$8 sps:$4 sm:$0xff]  }
  0x1a   :  { %763 = vmatpush1.bf16.msra.mxu0 %v2442_v9  ;;  %2425 = vmatpush1.bf16.msra.mxu1 %v2442_v9  ;;  %v2536_v9 = vld [vmem:[%s3259_s0 + $0xe4] ss:$8 sps:$4 sm:$0xff]  }
  0x1b   :  { %764 = vmatprep.subr.bf16.mxu0 %v2602_v0  ;;  %2410 = vmatprep.subr.bf16.mxu1 %v2602_v0 }
  0x1e   :  { %765 = vmatpush1.bf16.msra.mxu0 %v2443_v10  ;;  %2426 = vmatpush1.bf16.msra.mxu1 %v2443_v10  ;;  %v2538_v10 = vld [vmem:[%s3259_s0 + $0x274] ss:$8 sps:$4 sm:$0xff]  }
  0x1f   :  { %766 = vmatprep.subr.bf16.mxu0 %v2602_v0  ;;  %2411 = vmatprep.subr.bf16.mxu1 %v2602_v0 }
  0x22   :  { %767 = vmatpush1.bf16.msra.mxu0 %v2444_v11  ;;  %2427 = vmatpush1.bf16.msra.mxu1 %v2444_v11  ;;  %v2540_v11 = vld [vmem:[%s3259_s0 + $0xe0] ss:$8 sps:$4 sm:$0xff]  }
  0x23   :  { %768 = vmatprep.subr.bf16.mxu0 %v2602_v0  ;;  %2412 = vmatprep.subr.bf16.mxu1 %v2602_v0 }
  0x26   :  { %769 = vmatpush1.bf16.msra.mxu0 %v2445_v12  ;;  %2428 = vmatpush1.bf16.msra.mxu1 %v2445_v12  ;;  %v2541_v12 = vld [vmem:[%s3259_s0 + $0x270] ss:$8 sps:$4 sm:$0xff]  }
  0x27   :  { %770 = vmatprep.subr.bf16.mxu0 %v2602_v0  ;;  %2413 = vmatprep.subr.bf16.mxu1 %v2602_v0 }
  0x2a   :  { %771 = vmatpush1.bf16.msra.mxu0 %v2446_v13  ;;  %2429 = vmatpush1.bf16.msra.mxu1 %v2446_v13  ;;  %v2542_v13 = vld [vmem:[%s3259_s0 + $0xf4] ss:$8 sps:$4 sm:$0xff]  }
  0x2b   :  { %772 = vmatprep.subr.bf16.mxu0 %v2602_v0  ;;  %2414 = vmatprep.subr.bf16.mxu1 %v2602_v0 }
  0x2e   :  { %773 = vmatpush1.bf16.msra.mxu0 %v2447_v14  ;;  %2430 = vmatpush1.bf16.msra.mxu1 %v2447_v14  ;;  %v2544_v14 = vld [vmem:[%s3259_s0 + $0x284] ss:$8 sps:$4 sm:$0xff]  }
  0x2f   :  { %774 = vmatprep.subr.bf16.mxu0 %v2602_v0  ;;  %2415 = vmatprep.subr.bf16.mxu1 %v2602_v0 }
  0x32   :  { %775 = vmatpush1.bf16.msra.mxu0 %v2448_v15  ;;  %2431 = vmatpush1.bf16.msra.mxu1 %v2448_v15  ;;  %v2546_v15 = vld [vmem:[%s3259_s0 + $0xf0] ss:$8 sps:$4 sm:$0xff]  }
  0x33   :  { %776 = vmatprep.subr.bf16.mxu0 %v2602_v0  ;;  %2416 = vmatprep.subr.bf16.mxu1 %v2602_v0 }
  0x36   :  { %777 = vmatpush1.bf16.msra.mxu0 %v2449_v16  ;;  %2432 = vmatpush1.bf16.msra.mxu1 %v2449_v16  ;;  %v2547_v16 = vld [vmem:[%s3259_s0 + $0x280] ss:$8 sps:$4 sm:$0xff]  }
  0x37   :  { %778 = vmatprep.subr.bf16.mxu0 %v2602_v0  ;;  %2417 = vmatprep.subr.bf16.mxu1 %v2602_v0 }
  0x3a   :  { %779 = vmatpush1.bf16.msra.mxu0 %v2450_v17  ;;  %2433 = vmatpush1.bf16.msra.mxu1 %v2450_v17  ;;  %v2548_v17 = vld [vmem:[%s3259_s0 + $0x104] ss:$8 sps:$4 sm:$0xff]  }
  0x3b   :  { %780 = vmatprep.subr.bf16.mxu0 %v2602_v0  ;;  %2418 = vmatprep.subr.bf16.mxu1 %v2602_v0  ;;  %v2523_v0 = vld [vmem:[%s3259_s0 + $0x240] ss:$8 sps:$4 sm:$0xff]  }
  0x3e   :  { %781 = vmatpush1.bf16.msra.mxu0 %v2451_v18  ;;  %2434 = vmatpush1.bf16.msra.mxu1 %v2451_v18  ;;  %v2550_v18 = vld [vmem:[%s3259_s0 + $0x294] ss:$8 sps:$4 sm:$0xff]  }
  0x41   :  { %783 = vmatmul.mubr.bf16.vlgmr.msra.gmra.mrb[0].mxu0 %v2452_v19  ;;  %983 = vmatmul.mubr.bf16.vlgmr.msra.gmra.mrb[0].mxu1 %v2455_v20  ;;  %v2552_v19 = vld [vmem:[%s3259_s0 + $0x100] ss:$8 sps:$4 sm:$0xff]   ;;  %v2553_v20 = vld [vmem:[%s3259_s0 + $0x290] ss:$8 sps:$4 sm:$0xff]  }
  0x42   :  { %790 = vmatprep.mubr.bf16.mxu0 %v2458_v21  ;;  %990 = vmatprep.mubr.bf16.mxu1 %v2460_v22  ;;  %v2554_v21 = vld [vmem:[%s3259_s0 + $0x114] ss:$8 sps:$4 sm:$0xff]   ;;  %v2556_v22 = vld [vmem:[%s3259_s0 + $0x2a4] ss:$8 sps:$4 sm:$0xff]  }
  0x49   :  { %791 = vmatmul.mubr.bf16.gmra.mrb[4].mxu0 %v2462_v23  ;;  %991 = vmatmul.mubr.bf16.gmra.mrb[4].mxu1 %v2463_v24  ;;  %v2558_v23 = vld [vmem:[%s3259_s0 + $0x110] ss:$8 sps:$4 sm:$0xff]   ;;  %v2559_v24 = vld [vmem:[%s3259_s0 + $0x2a0] ss:$8 sps:$4 sm:$0xff]  }
  0x4a   :  { %798 = vmatprep.mubr.bf16.mxu0 %v2464_v25  ;;  %998 = vmatprep.mubr.bf16.mxu1 %v2466_v26  ;;  %v2560_v25 = vld [vmem:[%s3259_s0 + $0x124] ss:$8 sps:$4 sm:$0xff]   ;;  %v2562_v26 = vld [vmem:[%s3259_s0 + $0x2b4] ss:$8 sps:$4 sm:$0xff]  }
  0x51   :  { %799 = vmatmul.mubr.bf16.gmra.mrb[8].mxu0 %v2468_v27  ;;  %999 = vmatmul.mubr.bf16.gmra.mrb[8].mxu1 %v2469_v28  ;;  %v2564_v27 = vld [vmem:[%s3259_s0 + $0x120] ss:$8 sps:$4 sm:$0xff]   ;;  %v2565_v28 = vld [vmem:[%s3259_s0 + $0x2b0] ss:$8 sps:$4 sm:$0xff]  }
  0x52   :  { %806 = vmatprep.mubr.bf16.mxu0 %v2470_v29  ;;  %1006 = vmatprep.mubr.bf16.mxu1 %v2472_v30  ;;  %v2566_v29 = vld [vmem:[%s3259_s0 + $0x134] ss:$8 sps:$4 sm:$0xff]   ;;  %v2568_v30 = vld [vmem:[%s3259_s0 + $0x2c4] ss:$8 sps:$4 sm:$0xff]  }
  0x59   :  { %807 = vmatmul.mubr.bf16.gmra.mrb[12].mxu0 %v2474_v31  ;;  %1007 = vmatmul.mubr.bf16.gmra.mrb[12].mxu1 %v2475_v32  ;;  %v2570_v31 = vld [vmem:[%s3259_s0 + $0x130] ss:$8 sps:$4 sm:$0xff]   ;;  %v2571_v32 = vld [vmem:[%s3259_s0 + $0x2c0] ss:$8 sps:$4 sm:$0xff]  }
  0x5a   :  { %814 = vmatprep.mubr.bf16.mxu0 %v2476_v33  ;;  %1014 = vmatprep.mubr.bf16.mxu1 %v2478_v34  ;;  %v2572_v33 = vld [vmem:[%s3259_s0 + $0x144] ss:$8 sps:$4 sm:$0xff]   ;;  %v2574_v34 = vld [vmem:[%s3259_s0 + $0x2d4] ss:$8 sps:$4 sm:$0xff]  }
  0x61   :  { %815 = vmatmul.mubr.bf16.gmra.mrb[16].mxu0 %v2480_v35  ;;  %1015 = vmatmul.mubr.bf16.gmra.mrb[16].mxu1 %v2481_v36  ;;  %v2576_v35 = vld [vmem:[%s3259_s0 + $0x140] ss:$8 sps:$4 sm:$0xff]   ;;  %v2577_v36 = vld [vmem:[%s3259_s0 + $0x2d0] ss:$8 sps:$4 sm:$0xff]  }
  0x62   :  { %822 = vmatprep.mubr.bf16.mxu0 %v2482_v37  ;;  %1022 = vmatprep.mubr.bf16.mxu1 %v2484_v38  ;;  %v2578_v37 = vld [vmem:[%s3259_s0 + $0x154] ss:$8 sps:$4 sm:$0xff]   ;;  %v2580_v38 = vld [vmem:[%s3259_s0 + $0x2e4] ss:$8 sps:$4 sm:$0xff]  }
  0x69   :  { %823 = vmatmul.mubr.bf16.gmra.mrb[20].mxu0 %v2486_v39  ;;  %1023 = vmatmul.mubr.bf16.gmra.mrb[20].mxu1 %v2487_v40  ;;  %v2582_v39 = vld [vmem:[%s3259_s0 + $0x150] ss:$8 sps:$4 sm:$0xff]   ;;  %v2583_v40 = vld [vmem:[%s3259_s0 + $0x2e0] ss:$8 sps:$4 sm:$0xff]  }
  0x6a   :  { %830 = vmatprep.mubr.bf16.mxu0 %v2488_v41  ;;  %1030 = vmatprep.mubr.bf16.mxu1 %v2490_v42  ;;  %v2584_v41 = vld [vmem:[%s3259_s0 + $0x164] ss:$8 sps:$4 sm:$0xff]   ;;  %v2586_v42 = vld [vmem:[%s3259_s0 + $0x2f4] ss:$8 sps:$4 sm:$0xff]  }
  0x71   :  { %831 = vmatmul.mubr.bf16.gmra.mrb[24].mxu0 %v2492_v43  ;;  %1031 = vmatmul.mubr.bf16.gmra.mrb[24].mxu1 %v2493_v44  ;;  %v2588_v43 = vld [vmem:[%s3259_s0 + $0x160] ss:$8 sps:$4 sm:$0xff]   ;;  %v2589_v44 = vld [vmem:[%s3259_s0 + $0x2f0] ss:$8 sps:$4 sm:$0xff]  }
  0x72   :  { %838 = vmatprep.mubr.bf16.mxu0 %v2494_v45  ;;  %1038 = vmatprep.mubr.bf16.mxu1 %v2496_v46  ;;  %v2590_v45 = vld [vmem:[%s3259_s0 + $0x174] ss:$8 sps:$4 sm:$0xff]   ;;  %v2592_v46 = vld [vmem:[%s3259_s0 + $0x304] ss:$8 sps:$4 sm:$0xff]  }
  0x79   :  { %839 = vmatmul.mubr.bf16.gmra.mrb[28].mxu0 %v2498_v47  ;;  %1039 = vmatmul.mubr.bf16.gmra.mrb[28].mxu1 %v2499_v48  ;;  %v2594_v47 = vld [vmem:[%s3259_s0 + $0x170] ss:$8 sps:$4 sm:$0xff]   ;;  %v2595_v48 = vld [vmem:[%s3259_s0 + $0x300] ss:$8 sps:$4 sm:$0xff]  }
  0x7a   :  { %846 = vmatprep.mubr.bf16.mxu0 %v2500_v49  ;;  %1046 = vmatprep.mubr.bf16.mxu1 %v2502_v50  ;;  %v2596_v49 = vld [vmem:[%s3259_s0 + $0x184] ss:$8 sps:$4 sm:$0xff]   ;;  %v2598_v50 = vld [vmem:[%s3259_s0 + $0x314] ss:$8 sps:$4 sm:$0xff]  }
  0x81   :  { %847 = vmatmul.mubr.bf16.gmra.mrb[32].mxu0 %v2504_v51  ;;  %1047 = vmatmul.mubr.bf16.gmra.mrb[32].mxu1 %v2505_v52  ;;  %v2600_v51 = vld [vmem:[%s3259_s0 + $0x180] ss:$8 sps:$4 sm:$0xff]   ;;  %v2601_v52 = vld [vmem:[%s3259_s0 + $0x310] ss:$8 sps:$4 sm:$0xff]  }
  0x82   :  { %854 = vmatprep.mubr.bf16.mxu0 %v2506_v53  ;;  %1054 = vmatprep.mubr.bf16.mxu1 %v2508_v54  ;;  %v3006_v53 = vld [vmem:[%s3260_s2] ss:$0 sm:$0xff] }
  0x89   :  { %855 = vmatmul.mubr.bf16.gmra.mrb[36].mxu0 %v2510_v55  ;;  %1055 = vmatmul.mubr.bf16.gmra.mrb[36].mxu1 %v2511_v56 }
  0x8a   :  { %862 = vmatprep.mubr.bf16.mxu0 %v2512_v57  ;;  %1062 = vmatprep.mubr.bf16.mxu1 %v2514_v58 }
  0x91   :  { %863 = vmatmul.mubr.bf16.gmra.mrb[40].mxu0 %v2516_v59  ;;  %1063 = vmatmul.mubr.bf16.gmra.mrb[40].mxu1 %v2517_v60 }
  0x92   :  { %870 = vmatprep.mubr.bf16.mxu0 %v2518_v61  ;;  %1070 = vmatprep.mubr.bf16.mxu1 %v2520_v62 }
  0x99   :  { %871 = vmatmul.mubr.bf16.gmra.mrb[44].mxu0 %v2522_v63  ;;  %1071 = vmatmul.mubr.bf16.gmra.mrb[44].mxu1 %v2523_v0 }
  0x9a   :  { %878 = vmatprep.mubr.bf16.mxu0 %v2524_v1  ;;  %1078 = vmatprep.mubr.bf16.mxu1 %v2526_v2 }
  0xa1   :  { %879 = vmatmul.mubr.bf16.gmra.mrb[48].mxu0 %v2528_v3  ;;  %1079 = vmatmul.mubr.bf16.gmra.mrb[48].mxu1 %v2529_v4 }
  0xa2   :  { %886 = vmatprep.mubr.bf16.mxu0 %v2530_v5  ;;  %1086 = vmatprep.mubr.bf16.mxu1 %v2532_v6 }
  0xa9   :  { %887 = vmatmul.mubr.bf16.gmra.mrb[52].mxu0 %v2534_v7  ;;  %1087 = vmatmul.mubr.bf16.gmra.mrb[52].mxu1 %v2535_v8 }
  0xaa   :  { %894 = vmatprep.mubr.bf16.mxu0 %v2536_v9  ;;  %1094 = vmatprep.mubr.bf16.mxu1 %v2538_v10 }
  0xb1   :  { %895 = vmatmul.mubr.bf16.gmra.mrb[56].mxu0 %v2540_v11  ;;  %1095 = vmatmul.mubr.bf16.gmra.mrb[56].mxu1 %v2541_v12 }
  0xb2   :  { %902 = vmatprep.mubr.bf16.mxu0 %v2542_v13  ;;  %1102 = vmatprep.mubr.bf16.mxu1 %v2544_v14 }
  0xb9   :  { %903 = vmatmul.mubr.bf16.gmra.mrb[60].mxu0 %v2546_v15  ;;  %1103 = vmatmul.mubr.bf16.gmra.mrb[60].mxu1 %v2547_v16 }
  0xba   :  { %910 = vmatprep.mubr.bf16.mxu0 %v2548_v17  ;;  %1110 = vmatprep.mubr.bf16.mxu1 %v2550_v18 }
  0xc1   :  { %911 = vmatmul.mubr.bf16.gmra.mrb[64].mxu0 %v2552_v19  ;;  %1111 = vmatmul.mubr.bf16.gmra.mrb[64].mxu1 %v2553_v20 }
  0xc2   :  { %918 = vmatprep.mubr.bf16.mxu0 %v2554_v21  ;;  %1118 = vmatprep.mubr.bf16.mxu1 %v2556_v22 }
  0xc9   :  { %919 = vmatmul.mubr.bf16.gmra.mrb[68].mxu0 %v2558_v23  ;;  %1119 = vmatmul.mubr.bf16.gmra.mrb[68].mxu1 %v2559_v24 }
  0xca   :  { %926 = vmatprep.mubr.bf16.mxu0 %v2560_v25  ;;  %1126 = vmatprep.mubr.bf16.mxu1 %v2562_v26 }
  0xd1   :  { %927 = vmatmul.mubr.bf16.gmra.mrb[72].mxu0 %v2564_v27  ;;  %1127 = vmatmul.mubr.bf16.gmra.mrb[72].mxu1 %v2565_v28 }
  0xd2   :  { %934 = vmatprep.mubr.bf16.mxu0 %v2566_v29  ;;  %1134 = vmatprep.mubr.bf16.mxu1 %v2568_v30 }
  0xd9   :  { %935 = vmatmul.mubr.bf16.gmra.mrb[76].mxu0 %v2570_v31  ;;  %1135 = vmatmul.mubr.bf16.gmra.mrb[76].mxu1 %v2571_v32 }
  0xda   :  { %942 = vmatprep.mubr.bf16.mxu0 %v2572_v33  ;;  %1142 = vmatprep.mubr.bf16.mxu1 %v2574_v34 }
  0xe1   :  { %943 = vmatmul.mubr.bf16.gmra.mrb[80].mxu0 %v2576_v35  ;;  %1143 = vmatmul.mubr.bf16.gmra.mrb[80].mxu1 %v2577_v36 }
  0xe2   :  { %950 = vmatprep.mubr.bf16.mxu0 %v2578_v37  ;;  %1150 = vmatprep.mubr.bf16.mxu1 %v2580_v38 }
  0xe9   :  { %951 = vmatmul.mubr.bf16.gmra.mrb[84].mxu0 %v2582_v39  ;;  %1151 = vmatmul.mubr.bf16.gmra.mrb[84].mxu1 %v2583_v40 }
  0xea   :  { %958 = vmatprep.mubr.bf16.mxu0 %v2584_v41  ;;  %1158 = vmatprep.mubr.bf16.mxu1 %v2586_v42 }
  0xf1   :  { %959 = vmatmul.mubr.bf16.gmra.mrb[88].mxu0 %v2588_v43  ;;  %1159 = vmatmul.mubr.bf16.gmra.mrb[88].mxu1 %v2589_v44 }
  0xf2   :  { %966 = vmatprep.mubr.bf16.mxu0 %v2590_v45  ;;  %1166 = vmatprep.mubr.bf16.mxu1 %v2592_v46 }
  0xf9   :  { %967 = vmatmul.mubr.bf16.gmra.mrb[92].mxu0 %v2594_v47  ;;  %1167 = vmatmul.mubr.bf16.gmra.mrb[92].mxu1 %v2595_v48 }
  0xfa   :  { %974 = vmatprep.mubr.bf16.mxu0 %v2596_v49  ;;  %1174 = vmatprep.mubr.bf16.mxu1 %v2598_v50 }
 0x101   :  { %975 = vmatmul.mubr.bf16.gmra.mrb[96].mxu0 %v2600_v51  ;;  %1175 = vmatmul.mubr.bf16.gmra.mrb[96].mxu1 %v2601_v52 }
 0x114   :  { %v784_v54 = vpop.f32.mrb[0].mxu0  ;;  %v984_v55 = vpop.f32.mrb[0].mxu1 }
 0x115   :  { %v785_v56 = vadd.f32 %v3006_v53, %v784_v54  ;;  %v985_v57 = vadd.f32 %v3006_v53, %v984_v55  ;;  %v786_v58 = vpop.f32.mrb[1].mxu0  ;;  %v986_v59 = vpop.f32.mrb[1].mxu1 }
 0x116   :  { %v787_v60 = vpop.f32.mrb[2].mxu0  ;;  %v987_v61 = vpop.f32.mrb[2].mxu1 }
 0x117   :  { %v788_v62 = vadd.f32 %v3006_v53, %v787_v60  ;;  %v988_v63 = vadd.f32 %v3006_v53, %v987_v61  ;;  %v789_v0 = vpop.f32.mrb[3].mxu0  ;;  %v989_v1 = vpop.f32.mrb[3].mxu1  ;;  %v1183_v2 = vmax.f32 %v785_v56, 0.0  ;;  %v1233_v3 = vmax.f32 %v985_v57, 0.0 }
 0x119   :  { %v1184_v4 = vmax.f32 %v788_v62, 0.0  ;;  %v1234_v5 = vmax.f32 %v988_v63, 0.0 }
 0x11b   :  { %v2107_v6 = vpack.c.bf16 %v1184_v4, %v1183_v2  ;;  %v2232_v7 = vpack.c.bf16 %v1234_v5, %v1233_v3 }
 0x11c   :  { %v792_v8 = vpop.f32.mrb[4].mxu0  ;;  %v992_v9 = vpop.f32.mrb[4].mxu1 }
 0x11d   :  { %2108 = vst [vmem:[%s3261_s3] sm:$0xff] %v2107_v6   ;;  %2378 = vst [vmem:[%s3261_s3 + $0xc8] sm:$0xff] %v2232_v7   ;;  %v793_v10 = vadd.f32 %v3006_v53, %v792_v8  ;;  %v993_v11 = vadd.f32 %v3006_v53, %v992_v9  ;;  %v794_v12 = vpop.f32.mrb[5].mxu0  ;;  %v994_v13 = vpop.f32.mrb[5].mxu1 }
 0x11e   :  { %v795_v14 = vpop.f32.mrb[6].mxu0  ;;  %v995_v15 = vpop.f32.mrb[6].mxu1 }
 0x11f   :  { %v796_v16 = vadd.f32 %v3006_v53, %v795_v14  ;;  %v996_v17 = vadd.f32 %v3006_v53, %v995_v15  ;;  %v797_v18 = vpop.f32.mrb[7].mxu0  ;;  %v997_v19 = vpop.f32.mrb[7].mxu1  ;;  %v1185_v20 = vmax.f32 %v793_v10, 0.0  ;;  %v1235_v21 = vmax.f32 %v993_v11, 0.0 }
 0x121   :  { %v1186_v22 = vmax.f32 %v796_v16, 0.0  ;;  %v1236_v23 = vmax.f32 %v996_v17, 0.0 }
 0x123   :  { %v2112_v24 = vpack.c.bf16 %v1186_v22, %v1185_v20  ;;  %v2237_v25 = vpack.c.bf16 %v1236_v23, %v1235_v21 }
 0x124   :  { %v800_v26 = vpop.f32.mrb[8].mxu0  ;;  %v1000_v27 = vpop.f32.mrb[8].mxu1 }
 0x125   :  { %2354 = vst [vmem:[%s3261_s3 + $0x8] sm:$0xff] %v2112_v24   ;;  %2379 = vst [vmem:[%s3261_s3 + $0xd0] sm:$0xff] %v2237_v25   ;;  %v801_v28 = vadd.f32 %v3006_v53, %v800_v26  ;;  %v1001_v29 = vadd.f32 %v3006_v53, %v1000_v27  ;;  %v802_v30 = vpop.f32.mrb[9].mxu0  ;;  %v1002_v31 = vpop.f32.mrb[9].mxu1 }
 0x126   :  { %v803_v32 = vpop.f32.mrb[10].mxu0  ;;  %v1003_v33 = vpop.f32.mrb[10].mxu1 }
 0x127   :  { %v804_v34 = vadd.f32 %v3006_v53, %v803_v32  ;;  %v1004_v35 = vadd.f32 %v3006_v53, %v1003_v33  ;;  %v805_v36 = vpop.f32.mrb[11].mxu0  ;;  %v1005_v37 = vpop.f32.mrb[11].mxu1  ;;  %v1187_v38 = vmax.f32 %v801_v28, 0.0  ;;  %v1237_v39 = vmax.f32 %v1001_v29, 0.0 }
 0x129   :  { %v1188_v40 = vmax.f32 %v804_v34, 0.0  ;;  %v1238_v41 = vmax.f32 %v1004_v35, 0.0 }
 0x12b   :  { %v2117_v42 = vpack.c.bf16 %v1188_v40, %v1187_v38  ;;  %v2242_v43 = vpack.c.bf16 %v1238_v41, %v1237_v39 }
 0x12c   :  { %v808_v44 = vpop.f32.mrb[12].mxu0  ;;  %v1008_v45 = vpop.f32.mrb[12].mxu1 }
 0x12d   :  { %2355 = vst [vmem:[%s3261_s3 + $0x10] sm:$0xff] %v2117_v42   ;;  %2380 = vst [vmem:[%s3261_s3 + $0xd8] sm:$0xff] %v2242_v43   ;;  %v809_v46 = vadd.f32 %v3006_v53, %v808_v44  ;;  %v1009_v47 = vadd.f32 %v3006_v53, %v1008_v45  ;;  %v810_v48 = vpop.f32.mrb[13].mxu0  ;;  %v1010_v49 = vpop.f32.mrb[13].mxu1 }
 0x12e   :  { %v811_v50 = vpop.f32.mrb[14].mxu0  ;;  %v1011_v51 = vpop.f32.mrb[14].mxu1 }
 0x12f   :  { %v812_v52 = vadd.f32 %v3006_v53, %v811_v50  ;;  %v1012_v54 = vadd.f32 %v3006_v53, %v1011_v51  ;;  %v813_v55 = vpop.f32.mrb[15].mxu0  ;;  %v1013_v56 = vpop.f32.mrb[15].mxu1  ;;  %v1189_v57 = vmax.f32 %v809_v46, 0.0  ;;  %v1239_v58 = vmax.f32 %v1009_v47, 0.0 }
 0x131   :  { %v1190_v59 = vmax.f32 %v812_v52, 0.0  ;;  %v1240_v60 = vmax.f32 %v1012_v54, 0.0 }
 0x133   :  { %v2122_v61 = vpack.c.bf16 %v1190_v59, %v1189_v57  ;;  %v2247_v62 = vpack.c.bf16 %v1240_v60, %v1239_v58 }
 0x134   :  { %v816_v63 = vpop.f32.mrb[16].mxu0  ;;  %v1016_v0 = vpop.f32.mrb[16].mxu1 }
 0x135   :  { %2356 = vst [vmem:[%s3261_s3 + $0x18] sm:$0xff] %v2122_v61   ;;  %2381 = vst [vmem:[%s3261_s3 + $0xe0] sm:$0xff] %v2247_v62   ;;  %v817_v1 = vadd.f32 %v3006_v53, %v816_v63  ;;  %v1017_v2 = vadd.f32 %v3006_v53, %v1016_v0  ;;  %v818_v3 = vpop.f32.mrb[17].mxu0  ;;  %v1018_v4 = vpop.f32.mrb[17].mxu1 }
 0x136   :  { %v819_v5 = vpop.f32.mrb[18].mxu0  ;;  %v1019_v6 = vpop.f32.mrb[18].mxu1 }
 0x137   :  { %v820_v7 = vadd.f32 %v3006_v53, %v819_v5  ;;  %v1020_v8 = vadd.f32 %v3006_v53, %v1019_v6  ;;  %v821_v9 = vpop.f32.mrb[19].mxu0  ;;  %v1021_v10 = vpop.f32.mrb[19].mxu1  ;;  %v1191_v11 = vmax.f32 %v817_v1, 0.0  ;;  %v1241_v12 = vmax.f32 %v1017_v2, 0.0 }
 0x139   :  { %v1192_v13 = vmax.f32 %v820_v7, 0.0  ;;  %v1242_v14 = vmax.f32 %v1020_v8, 0.0 }
 0x13b   :  { %v2127_v15 = vpack.c.bf16 %v1192_v13, %v1191_v11  ;;  %v2252_v16 = vpack.c.bf16 %v1242_v14, %v1241_v12 }
 0x13c   :  { %v824_v17 = vpop.f32.mrb[20].mxu0  ;;  %v1024_v18 = vpop.f32.mrb[20].mxu1 }
 0x13d   :  { %2357 = vst [vmem:[%s3261_s3 + $0x20] sm:$0xff] %v2127_v15   ;;  %2382 = vst [vmem:[%s3261_s3 + $0xe8] sm:$0xff] %v2252_v16   ;;  %v825_v19 = vadd.f32 %v3006_v53, %v824_v17  ;;  %v1025_v20 = vadd.f32 %v3006_v53, %v1024_v18  ;;  %v826_v21 = vpop.f32.mrb[21].mxu0  ;;  %v1026_v22 = vpop.f32.mrb[21].mxu1 }
 0x13e   :  { %v827_v23 = vpop.f32.mrb[22].mxu0  ;;  %v1027_v24 = vpop.f32.mrb[22].mxu1 }
 0x13f   :  { %v828_v25 = vadd.f32 %v3006_v53, %v827_v23  ;;  %v1028_v26 = vadd.f32 %v3006_v53, %v1027_v24  ;;  %v829_v27 = vpop.f32.mrb[23].mxu0  ;;  %v1029_v28 = vpop.f32.mrb[23].mxu1  ;;  %v1193_v29 = vmax.f32 %v825_v19, 0.0  ;;  %v1243_v30 = vmax.f32 %v1025_v20, 0.0 }
 0x141   :  { %v1194_v31 = vmax.f32 %v828_v25, 0.0  ;;  %v1244_v32 = vmax.f32 %v1028_v26, 0.0 }
 0x143   :  { %v2132_v33 = vpack.c.bf16 %v1194_v31, %v1193_v29  ;;  %v2257_v34 = vpack.c.bf16 %v1244_v32, %v1243_v30 }
 0x144   :  { %v832_v35 = vpop.f32.mrb[24].mxu0  ;;  %v1032_v36 = vpop.f32.mrb[24].mxu1 }
 0x145   :  { %2358 = vst [vmem:[%s3261_s3 + $0x28] sm:$0xff] %v2132_v33   ;;  %2383 = vst [vmem:[%s3261_s3 + $0xf0] sm:$0xff] %v2257_v34   ;;  %v833_v37 = vadd.f32 %v3006_v53, %v832_v35  ;;  %v1033_v38 = vadd.f32 %v3006_v53, %v1032_v36  ;;  %v834_v39 = vpop.f32.mrb[25].mxu0  ;;  %v1034_v40 = vpop.f32.mrb[25].mxu1 }
 0x146   :  { %v835_v41 = vpop.f32.mrb[26].mxu0  ;;  %v1035_v42 = vpop.f32.mrb[26].mxu1 }
 0x147   :  { %v836_v43 = vadd.f32 %v3006_v53, %v835_v41  ;;  %v1036_v44 = vadd.f32 %v3006_v53, %v1035_v42  ;;  %v837_v45 = vpop.f32.mrb[27].mxu0  ;;  %v1037_v46 = vpop.f32.mrb[27].mxu1  ;;  %v1195_v47 = vmax.f32 %v833_v37, 0.0  ;;  %v1245_v48 = vmax.f32 %v1033_v38, 0.0 }
 0x149   :  { %v1196_v49 = vmax.f32 %v836_v43, 0.0  ;;  %v1246_v50 = vmax.f32 %v1036_v44, 0.0 }
 0x14b   :  { %v2137_v51 = vpack.c.bf16 %v1196_v49, %v1195_v47  ;;  %v2262_v52 = vpack.c.bf16 %v1246_v50, %v1245_v48 }
 0x14c   :  { %v840_v54 = vpop.f32.mrb[28].mxu0  ;;  %v1040_v55 = vpop.f32.mrb[28].mxu1 }
 0x14d   :  { %2359 = vst [vmem:[%s3261_s3 + $0x30] sm:$0xff] %v2137_v51   ;;  %2384 = vst [vmem:[%s3261_s3 + $0xf8] sm:$0xff] %v2262_v52   ;;  %v841_v56 = vadd.f32 %v3006_v53, %v840_v54  ;;  %v1041_v57 = vadd.f32 %v3006_v53, %v1040_v55  ;;  %v842_v58 = vpop.f32.mrb[29].mxu0  ;;  %v1042_v59 = vpop.f32.mrb[29].mxu1 }
 0x14e   :  { %v843_v60 = vpop.f32.mrb[30].mxu0  ;;  %v1043_v61 = vpop.f32.mrb[30].mxu1 }
 0x14f   :  { %v844_v62 = vadd.f32 %v3006_v53, %v843_v60  ;;  %v1044_v63 = vadd.f32 %v3006_v53, %v1043_v61  ;;  %v845_v0 = vpop.f32.mrb[31].mxu0  ;;  %v1045_v1 = vpop.f32.mrb[31].mxu1  ;;  %v1197_v2 = vmax.f32 %v841_v56, 0.0  ;;  %v1247_v3 = vmax.f32 %v1041_v57, 0.0 }
 0x151   :  { %v1198_v4 = vmax.f32 %v844_v62, 0.0  ;;  %v1248_v5 = vmax.f32 %v1044_v63, 0.0 }
 0x153   :  { %v2142_v6 = vpack.c.bf16 %v1198_v4, %v1197_v2  ;;  %v2267_v7 = vpack.c.bf16 %v1248_v5, %v1247_v3 }
 0x154   :  { %v848_v8 = vpop.f32.mrb[32].mxu0  ;;  %v1048_v9 = vpop.f32.mrb[32].mxu1 }
 0x155   :  { %2360 = vst [vmem:[%s3261_s3 + $0x38] sm:$0xff] %v2142_v6   ;;  %2385 = vst [vmem:[%s3261_s3 + $0x100] sm:$0xff] %v2267_v7   ;;  %v849_v10 = vadd.f32 %v3006_v53, %v848_v8  ;;  %v1049_v11 = vadd.f32 %v3006_v53, %v1048_v9  ;;  %v850_v12 = vpop.f32.mrb[33].mxu0  ;;  %v1050_v13 = vpop.f32.mrb[33].mxu1 }
 0x156   :  { %v851_v14 = vpop.f32.mrb[34].mxu0  ;;  %v1051_v15 = vpop.f32.mrb[34].mxu1 }
 0x157   :  { %v852_v16 = vadd.f32 %v3006_v53, %v851_v14  ;;  %v1052_v17 = vadd.f32 %v3006_v53, %v1051_v15  ;;  %v853_v18 = vpop.f32.mrb[35].mxu0  ;;  %v1053_v19 = vpop.f32.mrb[35].mxu1  ;;  %v1199_v20 = vmax.f32 %v849_v10, 0.0  ;;  %v1249_v21 = vmax.f32 %v1049_v11, 0.0 }
 0x159   :  { %v1200_v22 = vmax.f32 %v852_v16, 0.0  ;;  %v1250_v23 = vmax.f32 %v1052_v17, 0.0 }
 0x15b   :  { %v2147_v24 = vpack.c.bf16 %v1200_v22, %v1199_v20  ;;  %v2272_v25 = vpack.c.bf16 %v1250_v23, %v1249_v21 }
 0x15c   :  { %v856_v26 = vpop.f32.mrb[36].mxu0  ;;  %v1056_v27 = vpop.f32.mrb[36].mxu1 }
 0x15d   :  { %2361 = vst [vmem:[%s3261_s3 + $0x40] sm:$0xff] %v2147_v24   ;;  %2386 = vst [vmem:[%s3261_s3 + $0x108] sm:$0xff] %v2272_v25   ;;  %v857_v28 = vadd.f32 %v3006_v53, %v856_v26  ;;  %v1057_v29 = vadd.f32 %v3006_v53, %v1056_v27  ;;  %v858_v30 = vpop.f32.mrb[37].mxu0  ;;  %v1058_v31 = vpop.f32.mrb[37].mxu1 }
 0x15e   :  { %v859_v32 = vpop.f32.mrb[38].mxu0  ;;  %v1059_v33 = vpop.f32.mrb[38].mxu1 }
 0x15f   :  { %v860_v34 = vadd.f32 %v3006_v53, %v859_v32  ;;  %v1060_v35 = vadd.f32 %v3006_v53, %v1059_v33  ;;  %v861_v36 = vpop.f32.mrb[39].mxu0  ;;  %v1061_v37 = vpop.f32.mrb[39].mxu1  ;;  %v1201_v38 = vmax.f32 %v857_v28, 0.0  ;;  %v1251_v39 = vmax.f32 %v1057_v29, 0.0 }
 0x161   :  { %v1202_v40 = vmax.f32 %v860_v34, 0.0  ;;  %v1252_v41 = vmax.f32 %v1060_v35, 0.0 }
 0x163   :  { %v2152_v42 = vpack.c.bf16 %v1202_v40, %v1201_v38  ;;  %v2277_v43 = vpack.c.bf16 %v1252_v41, %v1251_v39 }
 0x164   :  { %v864_v44 = vpop.f32.mrb[40].mxu0  ;;  %v1064_v45 = vpop.f32.mrb[40].mxu1 }
 0x165   :  { %2362 = vst [vmem:[%s3261_s3 + $0x48] sm:$0xff] %v2152_v42   ;;  %2387 = vst [vmem:[%s3261_s3 + $0x110] sm:$0xff] %v2277_v43   ;;  %v865_v46 = vadd.f32 %v3006_v53, %v864_v44  ;;  %v1065_v47 = vadd.f32 %v3006_v53, %v1064_v45  ;;  %v866_v48 = vpop.f32.mrb[41].mxu0  ;;  %v1066_v49 = vpop.f32.mrb[41].mxu1 }
 0x166   :  { %v867_v50 = vpop.f32.mrb[42].mxu0  ;;  %v1067_v51 = vpop.f32.mrb[42].mxu1 }
 0x167   :  { %v868_v52 = vadd.f32 %v3006_v53, %v867_v50  ;;  %v1068_v54 = vadd.f32 %v3006_v53, %v1067_v51  ;;  %v869_v55 = vpop.f32.mrb[43].mxu0  ;;  %v1069_v56 = vpop.f32.mrb[43].mxu1  ;;  %v1203_v57 = vmax.f32 %v865_v46, 0.0  ;;  %v1253_v58 = vmax.f32 %v1065_v47, 0.0 }
 0x169   :  { %v1204_v59 = vmax.f32 %v868_v52, 0.0  ;;  %v1254_v60 = vmax.f32 %v1068_v54, 0.0 }
 0x16b   :  { %v2157_v61 = vpack.c.bf16 %v1204_v59, %v1203_v57  ;;  %v2282_v62 = vpack.c.bf16 %v1254_v60, %v1253_v58 }
 0x16c   :  { %v872_v63 = vpop.f32.mrb[44].mxu0  ;;  %v1072_v0 = vpop.f32.mrb[44].mxu1 }
 0x16d   :  { %2363 = vst [vmem:[%s3261_s3 + $0x50] sm:$0xff] %v2157_v61   ;;  %2388 = vst [vmem:[%s3261_s3 + $0x118] sm:$0xff] %v2282_v62   ;;  %v873_v1 = vadd.f32 %v3006_v53, %v872_v63  ;;  %v1073_v2 = vadd.f32 %v3006_v53, %v1072_v0  ;;  %v874_v3 = vpop.f32.mrb[45].mxu0  ;;  %v1074_v4 = vpop.f32.mrb[45].mxu1 }
 0x16e   :  { %v875_v5 = vpop.f32.mrb[46].mxu0  ;;  %v1075_v6 = vpop.f32.mrb[46].mxu1 }
 0x16f   :  { %v876_v7 = vadd.f32 %v3006_v53, %v875_v5  ;;  %v1076_v8 = vadd.f32 %v3006_v53, %v1075_v6  ;;  %v877_v9 = vpop.f32.mrb[47].mxu0  ;;  %v1077_v10 = vpop.f32.mrb[47].mxu1  ;;  %v1205_v11 = vmax.f32 %v873_v1, 0.0  ;;  %v1255_v12 = vmax.f32 %v1073_v2, 0.0 }
 0x171   :  { %v1206_v13 = vmax.f32 %v876_v7, 0.0  ;;  %v1256_v14 = vmax.f32 %v1076_v8, 0.0 }
 0x173   :  { %v2162_v15 = vpack.c.bf16 %v1206_v13, %v1205_v11  ;;  %v2287_v16 = vpack.c.bf16 %v1256_v14, %v1255_v12 }
 0x174   :  { %v880_v17 = vpop.f32.mrb[48].mxu0  ;;  %v1080_v18 = vpop.f32.mrb[48].mxu1 }
 0x175   :  { %2364 = vst [vmem:[%s3261_s3 + $0x58] sm:$0xff] %v2162_v15   ;;  %2389 = vst [vmem:[%s3261_s3 + $0x120] sm:$0xff] %v2287_v16   ;;  %v881_v19 = vadd.f32 %v3006_v53, %v880_v17  ;;  %v1081_v20 = vadd.f32 %v3006_v53, %v1080_v18  ;;  %v882_v21 = vpop.f32.mrb[49].mxu0  ;;  %v1082_v22 = vpop.f32.mrb[49].mxu1 }
 0x176   :  { %v883_v23 = vpop.f32.mrb[50].mxu0  ;;  %v1083_v24 = vpop.f32.mrb[50].mxu1 }
 0x177   :  { %v884_v25 = vadd.f32 %v3006_v53, %v883_v23  ;;  %v1084_v26 = vadd.f32 %v3006_v53, %v1083_v24  ;;  %v885_v27 = vpop.f32.mrb[51].mxu0  ;;  %v1085_v28 = vpop.f32.mrb[51].mxu1  ;;  %v1207_v29 = vmax.f32 %v881_v19, 0.0  ;;  %v1257_v30 = vmax.f32 %v1081_v20, 0.0 }
 0x179   :  { %v1208_v31 = vmax.f32 %v884_v25, 0.0  ;;  %v1258_v32 = vmax.f32 %v1084_v26, 0.0 }
 0x17b   :  { %v2167_v33 = vpack.c.bf16 %v1208_v31, %v1207_v29  ;;  %v2292_v34 = vpack.c.bf16 %v1258_v32, %v1257_v30 }
 0x17c   :  { %v888_v35 = vpop.f32.mrb[52].mxu0  ;;  %v1088_v36 = vpop.f32.mrb[52].mxu1 }
 0x17d   :  { %2365 = vst [vmem:[%s3261_s3 + $0x60] sm:$0xff] %v2167_v33   ;;  %2390 = vst [vmem:[%s3261_s3 + $0x128] sm:$0xff] %v2292_v34   ;;  %v889_v37 = vadd.f32 %v3006_v53, %v888_v35  ;;  %v1089_v38 = vadd.f32 %v3006_v53, %v1088_v36  ;;  %v890_v39 = vpop.f32.mrb[53].mxu0  ;;  %v1090_v40 = vpop.f32.mrb[53].mxu1 }
 0x17e   :  { %v891_v41 = vpop.f32.mrb[54].mxu0  ;;  %v1091_v42 = vpop.f32.mrb[54].mxu1 }
 0x17f   :  { %v892_v43 = vadd.f32 %v3006_v53, %v891_v41  ;;  %v1092_v44 = vadd.f32 %v3006_v53, %v1091_v42  ;;  %v893_v45 = vpop.f32.mrb[55].mxu0  ;;  %v1093_v46 = vpop.f32.mrb[55].mxu1  ;;  %v1209_v47 = vmax.f32 %v889_v37, 0.0  ;;  %v1259_v48 = vmax.f32 %v1089_v38, 0.0 }
 0x181   :  { %v1210_v49 = vmax.f32 %v892_v43, 0.0  ;;  %v1260_v50 = vmax.f32 %v1092_v44, 0.0 }
 0x183   :  { %v2172_v51 = vpack.c.bf16 %v1210_v49, %v1209_v47  ;;  %v2297_v52 = vpack.c.bf16 %v1260_v50, %v1259_v48 }
 0x184   :  { %v896_v54 = vpop.f32.mrb[56].mxu0  ;;  %v1096_v55 = vpop.f32.mrb[56].mxu1 }
 0x185   :  { %2366 = vst [vmem:[%s3261_s3 + $0x68] sm:$0xff] %v2172_v51   ;;  %2391 = vst [vmem:[%s3261_s3 + $0x130] sm:$0xff] %v2297_v52   ;;  %v897_v56 = vadd.f32 %v3006_v53, %v896_v54  ;;  %v1097_v57 = vadd.f32 %v3006_v53, %v1096_v55  ;;  %v898_v58 = vpop.f32.mrb[57].mxu0  ;;  %v1098_v59 = vpop.f32.mrb[57].mxu1 }
 0x186   :  { %v899_v60 = vpop.f32.mrb[58].mxu0  ;;  %v1099_v61 = vpop.f32.mrb[58].mxu1 }
 0x187   :  { %v900_v62 = vadd.f32 %v3006_v53, %v899_v60  ;;  %v1100_v63 = vadd.f32 %v3006_v53, %v1099_v61  ;;  %v901_v0 = vpop.f32.mrb[59].mxu0  ;;  %v1101_v1 = vpop.f32.mrb[59].mxu1  ;;  %v1211_v2 = vmax.f32 %v897_v56, 0.0  ;;  %v1261_v3 = vmax.f32 %v1097_v57, 0.0 }
 0x189   :  { %v1212_v4 = vmax.f32 %v900_v62, 0.0  ;;  %v1262_v5 = vmax.f32 %v1100_v63, 0.0 }
 0x18b   :  { %v2177_v6 = vpack.c.bf16 %v1212_v4, %v1211_v2  ;;  %v2302_v7 = vpack.c.bf16 %v1262_v5, %v1261_v3 }
 0x18c   :  { %v904_v8 = vpop.f32.mrb[60].mxu0  ;;  %v1104_v9 = vpop.f32.mrb[60].mxu1 }
 0x18d   :  { %2367 = vst [vmem:[%s3261_s3 + $0x70] sm:$0xff] %v2177_v6   ;;  %2392 = vst [vmem:[%s3261_s3 + $0x138] sm:$0xff] %v2302_v7   ;;  %v905_v10 = vadd.f32 %v3006_v53, %v904_v8  ;;  %v1105_v11 = vadd.f32 %v3006_v53, %v1104_v9  ;;  %v906_v12 = vpop.f32.mrb[61].mxu0  ;;  %v1106_v13 = vpop.f32.mrb[61].mxu1 }
 0x18e   :  { %v907_v14 = vpop.f32.mrb[62].mxu0  ;;  %v1107_v15 = vpop.f32.mrb[62].mxu1 }
 0x18f   :  { %v908_v16 = vadd.f32 %v3006_v53, %v907_v14  ;;  %v1108_v17 = vadd.f32 %v3006_v53, %v1107_v15  ;;  %v909_v18 = vpop.f32.mrb[63].mxu0  ;;  %v1109_v19 = vpop.f32.mrb[63].mxu1  ;;  %v1213_v20 = vmax.f32 %v905_v10, 0.0  ;;  %v1263_v21 = vmax.f32 %v1105_v11, 0.0 }
 0x191   :  { %v1214_v22 = vmax.f32 %v908_v16, 0.0  ;;  %v1264_v23 = vmax.f32 %v1108_v17, 0.0 }
 0x193   :  { %v2182_v24 = vpack.c.bf16 %v1214_v22, %v1213_v20  ;;  %v2307_v25 = vpack.c.bf16 %v1264_v23, %v1263_v21 }
 0x194   :  { %v912_v26 = vpop.f32.mrb[64].mxu0  ;;  %v1112_v27 = vpop.f32.mrb[64].mxu1 }
 0x195   :  { %2368 = vst [vmem:[%s3261_s3 + $0x78] sm:$0xff] %v2182_v24   ;;  %2393 = vst [vmem:[%s3261_s3 + $0x140] sm:$0xff] %v2307_v25   ;;  %v913_v28 = vadd.f32 %v3006_v53, %v912_v26  ;;  %v1113_v29 = vadd.f32 %v3006_v53, %v1112_v27  ;;  %v914_v30 = vpop.f32.mrb[65].mxu0  ;;  %v1114_v31 = vpop.f32.mrb[65].mxu1 }
 0x196   :  { %v915_v32 = vpop.f32.mrb[66].mxu0  ;;  %v1115_v33 = vpop.f32.mrb[66].mxu1 }
 0x197   :  { %v916_v34 = vadd.f32 %v3006_v53, %v915_v32  ;;  %v1116_v35 = vadd.f32 %v3006_v53, %v1115_v33  ;;  %v917_v36 = vpop.f32.mrb[67].mxu0  ;;  %v1117_v37 = vpop.f32.mrb[67].mxu1  ;;  %v1215_v38 = vmax.f32 %v913_v28, 0.0  ;;  %v1265_v39 = vmax.f32 %v1113_v29, 0.0 }
 0x199   :  { %v1216_v40 = vmax.f32 %v916_v34, 0.0  ;;  %v1266_v41 = vmax.f32 %v1116_v35, 0.0 }
 0x19b   :  { %v2187_v42 = vpack.c.bf16 %v1216_v40, %v1215_v38  ;;  %v2312_v43 = vpack.c.bf16 %v1266_v41, %v1265_v39 }
 0x19c   :  { %v920_v44 = vpop.f32.mrb[68].mxu0  ;;  %v1120_v45 = vpop.f32.mrb[68].mxu1 }
 0x19d   :  { %2369 = vst [vmem:[%s3261_s3 + $0x80] sm:$0xff] %v2187_v42   ;;  %2394 = vst [vmem:[%s3261_s3 + $0x148] sm:$0xff] %v2312_v43   ;;  %v921_v46 = vadd.f32 %v3006_v53, %v920_v44  ;;  %v1121_v47 = vadd.f32 %v3006_v53, %v1120_v45  ;;  %v922_v48 = vpop.f32.mrb[69].mxu0  ;;  %v1122_v49 = vpop.f32.mrb[69].mxu1 }
 0x19e   :  { %v923_v50 = vpop.f32.mrb[70].mxu0  ;;  %v1123_v51 = vpop.f32.mrb[70].mxu1 }
 0x19f   :  { %v924_v52 = vadd.f32 %v3006_v53, %v923_v50  ;;  %v1124_v54 = vadd.f32 %v3006_v53, %v1123_v51  ;;  %v925_v55 = vpop.f32.mrb[71].mxu0  ;;  %v1125_v56 = vpop.f32.mrb[71].mxu1  ;;  %v1217_v57 = vmax.f32 %v921_v46, 0.0  ;;  %v1267_v58 = vmax.f32 %v1121_v47, 0.0 }
 0x1a1   :  { %v1218_v59 = vmax.f32 %v924_v52, 0.0  ;;  %v1268_v60 = vmax.f32 %v1124_v54, 0.0 }
 0x1a3   :  { %v2192_v61 = vpack.c.bf16 %v1218_v59, %v1217_v57  ;;  %v2317_v62 = vpack.c.bf16 %v1268_v60, %v1267_v58 }
 0x1a4   :  { %v928_v63 = vpop.f32.mrb[72].mxu0  ;;  %v1128_v0 = vpop.f32.mrb[72].mxu1 }
 0x1a5   :  { %2370 = vst [vmem:[%s3261_s3 + $0x88] sm:$0xff] %v2192_v61   ;;  %2395 = vst [vmem:[%s3261_s3 + $0x150] sm:$0xff] %v2317_v62   ;;  %v929_v1 = vadd.f32 %v3006_v53, %v928_v63  ;;  %v1129_v2 = vadd.f32 %v3006_v53, %v1128_v0  ;;  %v930_v3 = vpop.f32.mrb[73].mxu0  ;;  %v1130_v4 = vpop.f32.mrb[73].mxu1 }
 0x1a6   :  { %v931_v5 = vpop.f32.mrb[74].mxu0  ;;  %v1131_v6 = vpop.f32.mrb[74].mxu1 }
 0x1a7   :  { %v932_v7 = vadd.f32 %v3006_v53, %v931_v5  ;;  %v1132_v8 = vadd.f32 %v3006_v53, %v1131_v6  ;;  %v933_v9 = vpop.f32.mrb[75].mxu0  ;;  %v1133_v10 = vpop.f32.mrb[75].mxu1  ;;  %v1219_v11 = vmax.f32 %v929_v1, 0.0  ;;  %v1269_v12 = vmax.f32 %v1129_v2, 0.0 }
 0x1a9   :  { %v1220_v13 = vmax.f32 %v932_v7, 0.0  ;;  %v1270_v14 = vmax.f32 %v1132_v8, 0.0 }
 0x1ab   :  { %v2197_v15 = vpack.c.bf16 %v1220_v13, %v1219_v11  ;;  %v2322_v16 = vpack.c.bf16 %v1270_v14, %v1269_v12 }
 0x1ac   :  { %v936_v17 = vpop.f32.mrb[76].mxu0  ;;  %v1136_v18 = vpop.f32.mrb[76].mxu1 }
 0x1ad   :  { %2371 = vst [vmem:[%s3261_s3 + $0x90] sm:$0xff] %v2197_v15   ;;  %2396 = vst [vmem:[%s3261_s3 + $0x158] sm:$0xff] %v2322_v16   ;;  %v937_v19 = vadd.f32 %v3006_v53, %v936_v17  ;;  %v1137_v20 = vadd.f32 %v3006_v53, %v1136_v18  ;;  %v938_v21 = vpop.f32.mrb[77].mxu0  ;;  %v1138_v22 = vpop.f32.mrb[77].mxu1 }
 0x1ae   :  { %v939_v23 = vpop.f32.mrb[78].mxu0  ;;  %v1139_v24 = vpop.f32.mrb[78].mxu1 }
 0x1af   :  { %v940_v25 = vadd.f32 %v3006_v53, %v939_v23  ;;  %v1140_v26 = vadd.f32 %v3006_v53, %v1139_v24  ;;  %v941_v27 = vpop.f32.mrb[79].mxu0  ;;  %v1141_v28 = vpop.f32.mrb[79].mxu1  ;;  %v1221_v29 = vmax.f32 %v937_v19, 0.0  ;;  %v1271_v30 = vmax.f32 %v1137_v20, 0.0 }
 0x1b1   :  { %v1222_v31 = vmax.f32 %v940_v25, 0.0  ;;  %v1272_v32 = vmax.f32 %v1140_v26, 0.0 }
 0x1b3   :  { %v2202_v33 = vpack.c.bf16 %v1222_v31, %v1221_v29  ;;  %v2327_v34 = vpack.c.bf16 %v1272_v32, %v1271_v30 }
 0x1b4   :  { %v944_v35 = vpop.f32.mrb[80].mxu0  ;;  %v1144_v36 = vpop.f32.mrb[80].mxu1 }
 0x1b5   :  { %2372 = vst [vmem:[%s3261_s3 + $0x98] sm:$0xff] %v2202_v33   ;;  %2397 = vst [vmem:[%s3261_s3 + $0x160] sm:$0xff] %v2327_v34   ;;  %v945_v37 = vadd.f32 %v3006_v53, %v944_v35  ;;  %v1145_v38 = vadd.f32 %v3006_v53, %v1144_v36  ;;  %v946_v39 = vpop.f32.mrb[81].mxu0  ;;  %v1146_v40 = vpop.f32.mrb[81].mxu1 }
 0x1b6   :  { %v947_v41 = vpop.f32.mrb[82].mxu0  ;;  %v1147_v42 = vpop.f32.mrb[82].mxu1 }
 0x1b7   :  { %v948_v43 = vadd.f32 %v3006_v53, %v947_v41  ;;  %v1148_v44 = vadd.f32 %v3006_v53, %v1147_v42  ;;  %v949_v45 = vpop.f32.mrb[83].mxu0  ;;  %v1149_v46 = vpop.f32.mrb[83].mxu1  ;;  %v1223_v47 = vmax.f32 %v945_v37, 0.0  ;;  %v1273_v48 = vmax.f32 %v1145_v38, 0.0 }
 0x1b9   :  { %v1224_v49 = vmax.f32 %v948_v43, 0.0  ;;  %v1274_v50 = vmax.f32 %v1148_v44, 0.0 }
 0x1bb   :  { %v2207_v51 = vpack.c.bf16 %v1224_v49, %v1223_v47  ;;  %v2332_v52 = vpack.c.bf16 %v1274_v50, %v1273_v48 }
 0x1bc   :  { %v952_v54 = vpop.f32.mrb[84].mxu0  ;;  %v1152_v55 = vpop.f32.mrb[84].mxu1 }
 0x1bd   :  { %2373 = vst [vmem:[%s3261_s3 + $0xa0] sm:$0xff] %v2207_v51   ;;  %2398 = vst [vmem:[%s3261_s3 + $0x168] sm:$0xff] %v2332_v52   ;;  %v953_v56 = vadd.f32 %v3006_v53, %v952_v54  ;;  %v1153_v57 = vadd.f32 %v3006_v53, %v1152_v55  ;;  %v954_v58 = vpop.f32.mrb[85].mxu0  ;;  %v1154_v59 = vpop.f32.mrb[85].mxu1 }
 0x1be   :  { %v955_v60 = vpop.f32.mrb[86].mxu0  ;;  %v1155_v61 = vpop.f32.mrb[86].mxu1 }
 0x1bf   :  { %v956_v62 = vadd.f32 %v3006_v53, %v955_v60  ;;  %v1156_v63 = vadd.f32 %v3006_v53, %v1155_v61  ;;  %v957_v0 = vpop.f32.mrb[87].mxu0  ;;  %v1157_v1 = vpop.f32.mrb[87].mxu1  ;;  %v1225_v2 = vmax.f32 %v953_v56, 0.0  ;;  %v1275_v3 = vmax.f32 %v1153_v57, 0.0 }
 0x1c1   :  { %v1226_v4 = vmax.f32 %v956_v62, 0.0  ;;  %v1276_v5 = vmax.f32 %v1156_v63, 0.0 }
 0x1c3   :  { %v2212_v6 = vpack.c.bf16 %v1226_v4, %v1225_v2  ;;  %v2337_v7 = vpack.c.bf16 %v1276_v5, %v1275_v3 }
 0x1c4   :  { %v960_v8 = vpop.f32.mrb[88].mxu0  ;;  %v1160_v9 = vpop.f32.mrb[88].mxu1 }
 0x1c5   :  { %2374 = vst [vmem:[%s3261_s3 + $0xa8] sm:$0xff] %v2212_v6   ;;  %2399 = vst [vmem:[%s3261_s3 + $0x170] sm:$0xff] %v2337_v7   ;;  %v961_v10 = vadd.f32 %v3006_v53, %v960_v8  ;;  %v1161_v11 = vadd.f32 %v3006_v53, %v1160_v9  ;;  %v962_v12 = vpop.f32.mrb[89].mxu0  ;;  %v1162_v13 = vpop.f32.mrb[89].mxu1 }
 0x1c6   :  { %v963_v14 = vpop.f32.mrb[90].mxu0  ;;  %v1163_v15 = vpop.f32.mrb[90].mxu1 }
 0x1c7   :  { %v964_v16 = vadd.f32 %v3006_v53, %v963_v14  ;;  %v1164_v17 = vadd.f32 %v3006_v53, %v1163_v15  ;;  %v965_v18 = vpop.f32.mrb[91].mxu0  ;;  %v1165_v19 = vpop.f32.mrb[91].mxu1  ;;  %v1227_v20 = vmax.f32 %v961_v10, 0.0  ;;  %v1277_v21 = vmax.f32 %v1161_v11, 0.0 }
 0x1c9   :  { %v1228_v22 = vmax.f32 %v964_v16, 0.0  ;;  %v1278_v23 = vmax.f32 %v1164_v17, 0.0 }
 0x1cb   :  { %v2217_v24 = vpack.c.bf16 %v1228_v22, %v1227_v20  ;;  %v2342_v25 = vpack.c.bf16 %v1278_v23, %v1277_v21 }
 0x1cc   :  { %v968_v26 = vpop.f32.mrb[92].mxu0  ;;  %v1168_v27 = vpop.f32.mrb[92].mxu1 }
 0x1cd   :  { %2375 = vst [vmem:[%s3261_s3 + $0xb0] sm:$0xff] %v2217_v24   ;;  %2400 = vst [vmem:[%s3261_s3 + $0x178] sm:$0xff] %v2342_v25   ;;  %v969_v28 = vadd.f32 %v3006_v53, %v968_v26  ;;  %v1169_v29 = vadd.f32 %v3006_v53, %v1168_v27  ;;  %v970_v30 = vpop.f32.mrb[93].mxu0  ;;  %v1170_v31 = vpop.f32.mrb[93].mxu1 }
 0x1ce   :  { %v971_v32 = vpop.f32.mrb[94].mxu0  ;;  %v1171_v33 = vpop.f32.mrb[94].mxu1 }
 0x1cf   :  { %v972_v34 = vadd.f32 %v3006_v53, %v971_v32  ;;  %v1172_v35 = vadd.f32 %v3006_v53, %v1171_v33  ;;  %v973_v36 = vpop.f32.mrb[95].mxu0  ;;  %v1173_v37 = vpop.f32.mrb[95].mxu1  ;;  %v1229_v38 = vmax.f32 %v969_v28, 0.0  ;;  %v1279_v39 = vmax.f32 %v1169_v29, 0.0 }
 0x1d1   :  { %v1230_v40 = vmax.f32 %v972_v34, 0.0  ;;  %v1280_v41 = vmax.f32 %v1172_v35, 0.0 }
 0x1d3   :  { %v2222_v42 = vpack.c.bf16 %v1230_v40, %v1229_v38  ;;  %v2347_v43 = vpack.c.bf16 %v1280_v41, %v1279_v39 }
 0x1d4   :  { %v976_v44 = vpop.f32.mrb[96].mxu0  ;;  %v1176_v45 = vpop.f32.mrb[96].mxu1 }
 0x1d5   :  { %2376 = vst [vmem:[%s3261_s3 + $0xb8] sm:$0xff] %v2222_v42   ;;  %2401 = vst [vmem:[%s3261_s3 + $0x180] sm:$0xff] %v2347_v43   ;;  %v977_v46 = vadd.f32 %v3006_v53, %v976_v44  ;;  %v1177_v47 = vadd.f32 %v3006_v53, %v1176_v45  ;;  %v978_v48 = vpop.f32.mrb[97].mxu0  ;;  %v1178_v49 = vpop.f32.mrb[97].mxu1 }
 0x1d6   :  { %v979_v50 = vpop.f32.mrb[98].mxu0  ;;  %v1179_v51 = vpop.f32.mrb[98].mxu1 }
 0x1d7   :  { %v980_v52 = vadd.f32 %v3006_v53, %v979_v50  ;;  %v1180_v54 = vadd.f32 %v3006_v53, %v1179_v51  ;;  %v981_v55 = vpop.f32.mrb[99].mxu0  ;;  %v1181_v56 = vpop.f32.mrb[99].mxu1  ;;  %v1231_v57 = vmax.f32 %v977_v46, 0.0  ;;  %v1281_v58 = vmax.f32 %v1177_v47, 0.0 }
 0x1d9   :  { %v1232_v59 = vmax.f32 %v980_v52, 0.0  ;;  %v1282_v60 = vmax.f32 %v1180_v54, 0.0 }
 0x1db   :  { %v2227_v61 = vpack.c.bf16 %v1232_v59, %v1231_v57  ;;  %v2352_v62 = vpack.c.bf16 %v1282_v60, %v1281_v58 }
 0x1dd   :  { %2377 = vst [vmem:[%s3261_s3 + $0xc0] sm:$0xff] %v2227_v61   ;;  %2402 = vst [vmem:[%s3261_s3 + $0x188] sm:$0xff] %v2352_v62  }

// kernel: actor_forward.5
= control target key start
LH: loop header
LB: loop body
LE: loop exit
PB: predicated region body
PF: predicated region fallthrough
CT: control target
= control target key end

     0   :  { %s1005_s1 = inlined_call_operand.vmem [shape: bf16[256,128], index: 1, kind: input, shape index: {}]   ;;  %s1006_s0 = inlined_call_operand.vmem [shape: bf16[162,256], index: 0, kind: input, shape index: {}]   ;;  %s1007_s2 = inlined_call_operand.vmem [shape: f32[1,128], index: 2, kind: input, shape index: {}]   ;;  %s1008_s3 = inlined_call_operand.vmem [shape: bf16[162,128], index: 3, kind: output, shape index: {}]  }
   0x1   :  { %v767_v0 = vld [vmem:[%s1005_s1 + $0x40] sm:$0xff]   ;;  %v769_v2 = vld [vmem:[%s1005_s1 + $0x48] sm:$0xff]   ;;  %v771_v4 = vld [vmem:[%s1005_s1 + $0x50] sm:$0xff]  }
   0x2   :  { %v768_v1 = vld [vmem:[%s1005_s1] sm:$0xff]   ;;  %669 = vmatprep.subr.bf16.mxu0 %v767_v0  ;;  %751 = vmatprep.subr.bf16.mxu1 %v767_v0  ;;  %v770_v3 = vld [vmem:[%s1005_s1 + $0x8] sm:$0xff]   ;;  %v772_v5 = vld [vmem:[%s1005_s1 + $0x10] sm:$0xff]  }
   0x3   :  { %670 = vmatpush3.bf16.msra.mxu0 %v768_v1  ;;  %759 = vmatpush3.bf16.msra.mxu1 %v768_v1  ;;  %v773_v6 = vld [vmem:[%s1005_s1 + $0x58] sm:$0xff]   ;;  %v775_v8 = vld [vmem:[%s1005_s1 + $0x60] sm:$0xff]   ;;  %v777_v10 = vld [vmem:[%s1005_s1 + $0x68] sm:$0xff]  }
   0x4   :  { %671 = vmatprep.subr.bf16.mxu0 %v769_v2  ;;  %752 = vmatprep.subr.bf16.mxu1 %v769_v2  ;;  %v774_v7 = vld [vmem:[%s1005_s1 + $0x18] sm:$0xff]   ;;  %v776_v9 = vld [vmem:[%s1005_s1 + $0x20] sm:$0xff]   ;;  %v778_v13 = vld [vmem:[%s1005_s1 + $0x28] sm:$0xff]  }
   0x5   :  { %v785_v11 = vld [vmem:[%s1006_s0 + $0x4] ss:$8 sps:$4 sm:$0xff]   ;;  %v779_v14 = vld [vmem:[%s1005_s1 + $0x70] sm:$0xff]   ;;  %v781_v16 = vld [vmem:[%s1005_s1 + $0x78] sm:$0xff]  }
   0x6   :  { %v788_v12 = vld [vmem:[%s1006_s0 + $0x64] ss:$8 sps:$4 sm:$0xff]   ;;  %310 = vmatprep.mubr.bf16.mxu0 %v785_v11  ;;  %v780_v15 = vld [vmem:[%s1005_s1 + $0x30] sm:$0xff]   ;;  %v782_v17 = vld [vmem:[%s1005_s1 + $0x38] sm:$0xff]  }
   0x7   :  { %672 = vmatpush3.bf16.msra.mxu0 %v770_v3  ;;  %760 = vmatpush3.bf16.msra.mxu1 %v770_v3  ;;  %v783_v18 = vld [vmem:[%s1006_s0] ss:$8 sps:$4 sm:$0xff]   ;;  %v789_v20 = vld [vmem:[%s1006_s0 + $0x14] ss:$8 sps:$4 sm:$0xff]   ;;  %v791_v22 = vld [vmem:[%s1006_s0 + $0x10] ss:$8 sps:$4 sm:$0xff]  }
   0x8   :  { %673 = vmatprep.subr.bf16.mxu0 %v771_v4  ;;  %753 = vmatprep.subr.bf16.mxu1 %v771_v4  ;;  %v786_v19 = vld [vmem:[%s1006_s0 + $0x60] ss:$8 sps:$4 sm:$0xff]   ;;  %v792_v21 = vld [vmem:[%s1006_s0 + $0x74] ss:$8 sps:$4 sm:$0xff]   ;;  %v796_v23 = vld [vmem:[%s1006_s0 + $0x70] ss:$8 sps:$4 sm:$0xff]  }
   0x9   :  { %358 = vmatprep.mubr.bf16.mxu1 %v788_v12  ;;  %v794_v24 = vld [vmem:[%s1006_s0 + $0x24] ss:$8 sps:$4 sm:$0xff]   ;;  %v797_v26 = vld [vmem:[%s1006_s0 + $0x20] ss:$8 sps:$4 sm:$0xff]   ;;  %v800_v28 = vld [vmem:[%s1006_s0 + $0x34] ss:$8 sps:$4 sm:$0xff]  }
   0xa   :  { %v798_v25 = vld [vmem:[%s1006_s0 + $0x84] ss:$8 sps:$4 sm:$0xff]   ;;  %v802_v27 = vld [vmem:[%s1006_s0 + $0x80] ss:$8 sps:$4 sm:$0xff]   ;;  %v804_v29 = vld [vmem:[%s1006_s0 + $0x94] ss:$8 sps:$4 sm:$0xff]  }
   0xb   :  { %674 = vmatpush3.bf16.msra.mxu0 %v772_v5  ;;  %761 = vmatpush3.bf16.msra.mxu1 %v772_v5  ;;  %v35_v30 = vld [vmem:[%s1006_s0 + $0xa0] sm:$0x11]  ;;  %v803_v31 = vld [vmem:[%s1006_s0 + $0x30] ss:$8 sps:$4 sm:$0xff]   ;;  %v811_v37 = vld [vmem:[%s1006_s0 + $0x54] ss:$8 sps:$4 sm:$0xff]  }
   0xc   :  { %675 = vmatprep.subr.bf16.mxu0 %v773_v6  ;;  %754 = vmatprep.subr.bf16.mxu1 %v773_v6  ;;  %v808_v32 = vld [vmem:[%s1006_s0 + $0x90] ss:$8 sps:$4 sm:$0xff]   ;;  %v806_v33 = vld [vmem:[%s1006_s0 + $0x44] ss:$8 sps:$4 sm:$0xff]   ;;  %v551_v34 = vcombine.high %v35_v30, %v35_v30  ;;  %v809_v35 = vld [vmem:[%s1006_s0 + $0x40] ss:$8 sps:$4 sm:$0xff]   ;;  %v550_v36 = vcombine.low %v35_v30, %v35_v30 }
   0xd   :  { %v814_v38 = vld [vmem:[%s1006_s0 + $0x50] ss:$8 sps:$4 sm:$0xff]   ;;  %v949_v41 = vld [vmem:[%s1007_s2] ss:$0 sm:$0xff] }
   0xf   :  { %676 = vmatpush3.bf16.msra.mxu0 %v774_v7  ;;  %762 = vmatpush3.bf16.msra.mxu1 %v774_v7 }
  0x10   :  { %677 = vmatprep.subr.bf16.mxu0 %v775_v8  ;;  %755 = vmatprep.subr.bf16.mxu1 %v775_v8 }
  0x13   :  { %678 = vmatpush3.bf16.msra.mxu0 %v776_v9  ;;  %763 = vmatpush3.bf16.msra.mxu1 %v776_v9 }
  0x14   :  { %679 = vmatprep.subr.bf16.mxu0 %v777_v10  ;;  %756 = vmatprep.subr.bf16.mxu1 %v777_v10 }
  0x17   :  { %680 = vmatpush3.bf16.msra.mxu0 %v778_v13  ;;  %764 = vmatpush3.bf16.msra.mxu1 %v778_v13 }
  0x18   :  { %681 = vmatprep.subr.bf16.mxu0 %v779_v14  ;;  %757 = vmatprep.subr.bf16.mxu1 %v779_v14 }
  0x1b   :  { %682 = vmatpush3.bf16.msra.mxu0 %v780_v15  ;;  %765 = vmatpush3.bf16.msra.mxu1 %v780_v15 }
  0x1c   :  { %683 = vmatprep.subr.bf16.mxu0 %v781_v16  ;;  %758 = vmatprep.subr.bf16.mxu1 %v781_v16 }
  0x1f   :  { %684 = vmatpush3.bf16.msra.mxu0 %v782_v17  ;;  %766 = vmatpush3.bf16.msra.mxu1 %v782_v17 }
  0x22   :  { %311 = vmatmul.mubr.bf16.vlgmr.msra.gmra.mrb[0].mxu0 %v783_v18  ;;  %359 = vmatmul.mubr.bf16.vlgmr.msra.gmra.mrb[0].mxu1 %v786_v19 }
  0x23   :  { %318 = vmatprep.mubr.bf16.mxu0 %v789_v20  ;;  %366 = vmatprep.mubr.bf16.mxu1 %v792_v21 }
  0x2a   :  { %319 = vmatmul.mubr.bf16.gmra.mrb[4].mxu0 %v791_v22  ;;  %367 = vmatmul.mubr.bf16.gmra.mrb[4].mxu1 %v796_v23 }
  0x2b   :  { %326 = vmatprep.mubr.bf16.mxu0 %v794_v24  ;;  %374 = vmatprep.mubr.bf16.mxu1 %v798_v25 }
  0x32   :  { %327 = vmatmul.mubr.bf16.gmra.mrb[8].mxu0 %v797_v26  ;;  %375 = vmatmul.mubr.bf16.gmra.mrb[8].mxu1 %v802_v27 }
  0x33   :  { %334 = vmatprep.mubr.bf16.mxu0 %v800_v28  ;;  %382 = vmatprep.mubr.bf16.mxu1 %v804_v29 }
  0x3a   :  { %335 = vmatmul.mubr.bf16.gmra.mrb[12].mxu0 %v803_v31  ;;  %383 = vmatmul.mubr.bf16.gmra.mrb[12].mxu1 %v808_v32 }
  0x3b   :  { %342 = vmatprep.mubr.bf16.mxu0 %v806_v33  ;;  %390 = vmatprep.mubr.bf16.mxu1 %v551_v34 }
  0x42   :  { %343 = vmatmul.mubr.bf16.gmra.mrb[16].mxu0 %v809_v35  ;;  %391 = vmatmul.mubr.bf16.gmra.mrb[16].mxu1 %v550_v36 }
  0x43   :  { %350 = vmatprep.mubr.bf16.mxu0 %v811_v37 }
  0x4a   :  { %351 = vmatmul.mubr.bf16.gmra.mrb[20].mxu0 %v814_v38 }
  0xf5   :  { %v685_v39 = vpop.f32.mrb[0].mxu0  ;;  %v721_v40 = vpop.f32.mrb[0].mxu1 }
  0xf6   :  { %v686_v42 = vpop.f32.mrb[1].mxu0  ;;  %v722_v43 = vpop.f32.mrb[1].mxu1 }
  0xf7   :  { %v687_v44 = vadd.f32 %v686_v42, %v685_v39  ;;  %v688_v45 = vpop.f32.mrb[2].mxu0  ;;  %v723_v46 = vadd.f32 %v722_v43, %v721_v40  ;;  %v724_v47 = vpop.f32.mrb[2].mxu1 }
  0xf8   :  { %v689_v48 = vpop.f32.mrb[3].mxu0  ;;  %v725_v49 = vpop.f32.mrb[3].mxu1 }
  0xf9   :  { %v313_v50 = vadd.f32 %v687_v44, %v949_v41  ;;  %v690_v51 = vadd.f32 %v689_v48, %v688_v45  ;;  %v361_v52 = vadd.f32 %v723_v46, %v949_v41  ;;  %v726_v53 = vadd.f32 %v725_v49, %v724_v47 }
  0xfb   :  { %v316_v54 = vadd.f32 %v690_v51, %v949_v41  ;;  %v410_v55 = vmax.f32 %v361_v52, 0.0  ;;  %v364_v56 = vadd.f32 %v726_v53, %v949_v41  ;;  %v398_v57 = vmax.f32 %v313_v50, 0.0 }
  0xfd   :  { %v399_v58 = vmax.f32 %v316_v54, 0.0  ;;  %v691_v59 = vpop.f32.mrb[4].mxu0  ;;  %v411_v60 = vmax.f32 %v364_v56, 0.0  ;;  %v727_v61 = vpop.f32.mrb[4].mxu1 }
  0xfe   :  { %v692_v62 = vpop.f32.mrb[5].mxu0  ;;  %v728_v63 = vpop.f32.mrb[5].mxu1 }
  0xff   :  { %v613_v0 = vpack.c.bf16 %v399_v58, %v398_v57  ;;  %v693_v1 = vadd.f32 %v692_v62, %v691_v59  ;;  %v694_v2 = vpop.f32.mrb[6].mxu0  ;;  %v643_v3 = vpack.c.bf16 %v411_v60, %v410_v55  ;;  %v729_v4 = vadd.f32 %v728_v63, %v727_v61  ;;  %v730_v5 = vpop.f32.mrb[6].mxu1 }
 0x100   :  { %v695_v6 = vpop.f32.mrb[7].mxu0  ;;  %v731_v7 = vpop.f32.mrb[7].mxu1 }
 0x101   :  { %614 = vst [vmem:[%s1008_s3] sm:$0xff] %v613_v0   ;;  %v321_v8 = vadd.f32 %v693_v1, %v949_v41  ;;  %665 = vst [vmem:[%s1008_s3 + $0x30] sm:$0xff] %v643_v3   ;;  %v696_v9 = vadd.f32 %v695_v6, %v694_v2  ;;  %v369_v10 = vadd.f32 %v729_v4, %v949_v41 }
 0x102   :  { %v732_v11 = vadd.f32 %v731_v7, %v730_v5 }
 0x103   :  { %v324_v12 = vadd.f32 %v696_v9, %v949_v41  ;;  %v412_v13 = vmax.f32 %v369_v10, 0.0  ;;  %v400_v15 = vmax.f32 %v321_v8, 0.0 }
 0x104   :  { %v372_v14 = vadd.f32 %v732_v11, %v949_v41 }
 0x105   :  { %v401_v16 = vmax.f32 %v324_v12, 0.0  ;;  %v697_v17 = vpop.f32.mrb[8].mxu0  ;;  %v733_v19 = vpop.f32.mrb[8].mxu1 }
 0x106   :  { %v413_v18 = vmax.f32 %v372_v14, 0.0  ;;  %v698_v20 = vpop.f32.mrb[9].mxu0  ;;  %v734_v21 = vpop.f32.mrb[9].mxu1 }
 0x107   :  { %v618_v22 = vpack.c.bf16 %v401_v16, %v400_v15  ;;  %v699_v23 = vadd.f32 %v698_v20, %v697_v17  ;;  %v700_v24 = vpop.f32.mrb[10].mxu0  ;;  %v735_v26 = vadd.f32 %v734_v21, %v733_v19  ;;  %v736_v27 = vpop.f32.mrb[10].mxu1 }
 0x108   :  { %v648_v25 = vpack.c.bf16 %v413_v18, %v412_v13  ;;  %v701_v28 = vpop.f32.mrb[11].mxu0  ;;  %v737_v29 = vpop.f32.mrb[11].mxu1 }
 0x109   :  { %660 = vst [vmem:[%s1008_s3 + $0x8] sm:$0xff] %v618_v22   ;;  %v329_v30 = vadd.f32 %v699_v23, %v949_v41  ;;  %v702_v31 = vadd.f32 %v701_v28, %v700_v24  ;;  %v377_v32 = vadd.f32 %v735_v26, %v949_v41  ;;  %v738_v33 = vadd.f32 %v737_v29, %v736_v27 }
 0x10a   :  { %666 = vst [vmem:[%s1008_s3 + $0x38] sm:$0xff] %v648_v25  }
 0x10b   :  { %v332_v34 = vadd.f32 %v702_v31, %v949_v41  ;;  %v414_v35 = vmax.f32 %v377_v32, 0.0  ;;  %v380_v36 = vadd.f32 %v738_v33, %v949_v41  ;;  %v402_v37 = vmax.f32 %v329_v30, 0.0 }
 0x10d   :  { %v403_v38 = vmax.f32 %v332_v34, 0.0  ;;  %v703_v39 = vpop.f32.mrb[12].mxu0  ;;  %v415_v40 = vmax.f32 %v380_v36, 0.0  ;;  %v739_v42 = vpop.f32.mrb[12].mxu1 }
 0x10e   :  { %v704_v43 = vpop.f32.mrb[13].mxu0  ;;  %v740_v44 = vpop.f32.mrb[13].mxu1 }
 0x10f   :  { %v623_v45 = vpack.c.bf16 %v403_v38, %v402_v37  ;;  %v705_v46 = vadd.f32 %v704_v43, %v703_v39  ;;  %v706_v47 = vpop.f32.mrb[14].mxu0  ;;  %v653_v48 = vpack.c.bf16 %v415_v40, %v414_v35  ;;  %v741_v49 = vadd.f32 %v740_v44, %v739_v42  ;;  %v742_v50 = vpop.f32.mrb[14].mxu1 }
 0x110   :  { %v707_v51 = vpop.f32.mrb[15].mxu0  ;;  %v743_v52 = vpop.f32.mrb[15].mxu1 }
 0x111   :  { %661 = vst [vmem:[%s1008_s3 + $0x10] sm:$0xff] %v623_v45   ;;  %v337_v53 = vadd.f32 %v705_v46, %v949_v41  ;;  %667 = vst [vmem:[%s1008_s3 + $0x40] sm:$0xff] %v653_v48   ;;  %v708_v54 = vadd.f32 %v707_v51, %v706_v47  ;;  %v385_v55 = vadd.f32 %v741_v49, %v949_v41 }
 0x112   :  { %v744_v56 = vadd.f32 %v743_v52, %v742_v50 }
 0x113   :  { %v340_v57 = vadd.f32 %v708_v54, %v949_v41  ;;  %v416_v58 = vmax.f32 %v385_v55, 0.0  ;;  %v404_v60 = vmax.f32 %v337_v53, 0.0 }
 0x114   :  { %v388_v59 = vadd.f32 %v744_v56, %v949_v41 }
 0x115   :  { %v405_v61 = vmax.f32 %v340_v57, 0.0  ;;  %v709_v62 = vpop.f32.mrb[16].mxu0  ;;  %v745_v0 = vpop.f32.mrb[16].mxu1 }
 0x116   :  { %v417_v63 = vmax.f32 %v388_v59, 0.0  ;;  %v710_v1 = vpop.f32.mrb[17].mxu0  ;;  %v746_v2 = vpop.f32.mrb[17].mxu1 }
 0x117   :  { %v628_v3 = vpack.c.bf16 %v405_v61, %v404_v60  ;;  %v711_v4 = vadd.f32 %v710_v1, %v709_v62  ;;  %v712_v5 = vpop.f32.mrb[18].mxu0  ;;  %v747_v7 = vadd.f32 %v746_v2, %v745_v0  ;;  %v748_v8 = vpop.f32.mrb[18].mxu1 }
 0x118   :  { %v658_v6 = vpack.c.bf16 %v417_v63, %v416_v58  ;;  %v713_v9 = vpop.f32.mrb[19].mxu0  ;;  %v749_v10 = vpop.f32.mrb[19].mxu1 }
 0x119   :  { %662 = vst [vmem:[%s1008_s3 + $0x18] sm:$0xff] %v628_v3   ;;  %v345_v11 = vadd.f32 %v711_v4, %v949_v41  ;;  %v714_v12 = vadd.f32 %v713_v9, %v712_v5  ;;  %v393_v13 = vadd.f32 %v747_v7, %v949_v41 }
 0x11a   :  { %668 = vst [vmem:[%s1008_s3 + $0x48] sm:$0xff] %v658_v6  }
 0x11b   :  { %v348_v14 = vadd.f32 %v714_v12, %v949_v41  ;;  %v418_v15 = vmax.f32 %v393_v13, 0.0  ;;  %v406_v16 = vmax.f32 %v345_v11, 0.0 }
 0x11d   :  { %v407_v17 = vmax.f32 %v348_v14, 0.0  ;;  %v715_v18 = vpop.f32.mrb[20].mxu0  ;;  %v609_v19 = vpack.c.bf16 %v418_v15, %v418_v15 }
 0x11e   :  { %v716_v20 = vpop.f32.mrb[21].mxu0 }
 0x11f   :  { %v633_v21 = vpack.c.bf16 %v407_v17, %v406_v16  ;;  %524 = vst [vmem:[%s1008_s3 + $0x50] sm:$0x1] %v609_v19  ;;  %v717_v22 = vadd.f32 %v716_v20, %v715_v18  ;;  %v718_v23 = vpop.f32.mrb[22].mxu0 }
 0x120   :  { %v719_v24 = vpop.f32.mrb[23].mxu0 }
 0x121   :  { %663 = vst [vmem:[%s1008_s3 + $0x20] sm:$0xff] %v633_v21   ;;  %v353_v25 = vadd.f32 %v717_v22, %v949_v41  ;;  %v720_v26 = vadd.f32 %v719_v24, %v718_v23 }
 0x123   :  { %v356_v27 = vadd.f32 %v720_v26, %v949_v41  ;;  %v408_v28 = vmax.f32 %v353_v25, 0.0 }
 0x125   :  { %v409_v29 = vmax.f32 %v356_v27, 0.0 }
 0x127   :  { %v638_v30 = vpack.c.bf16 %v409_v29, %v408_v28 }
 0x129   :  { %664 = vst [vmem:[%s1008_s3 + $0x28] sm:$0xff] %v638_v30  }

// kernel: actor_forward.6
= control target key start
LH: loop header
LB: loop body
LE: loop exit
PB: predicated region body
PF: predicated region fallthrough
CT: control target
= control target key end

     0   :  { %v827_v1 = vmov 0.0   ;;  %vm828_vm0 = vmmov 0   ;;  %vm292_vm1 = vcmask 261120   ;;  %s1025_s1 = inlined_call_operand.vmem [shape: bf16[288,128], index: 1, kind: input, shape index: {}]   ;;  %s1026_s0 = inlined_call_operand.vmem [shape: bf16[98,288], index: 0, kind: input, shape index: {}]   ;;  %s1027_s2 = inlined_call_operand.vmem [shape: f32[1,128], index: 2, kind: input, shape index: {}]   ;;  %s1028_s3 = inlined_call_operand.vmem [shape: bf16[98,128], index: 3, kind: output, shape index: {}]  }
   0x1   :  { %v782_v0 = vld [vmem:[%s1025_s1 + $0x40] sm:$0xff]   ;;  %748 = vmatprep.subr.bf16.mxu1 %v827_v1  ;;  %752 = vmatprep.mubr.msk.bf16.mxu1 %vm828_vm0, %v827_v1  ;;  %v784_v3 = vld [vmem:[%s1025_s1 + $0x48] sm:$0xff]   ;;  %v786_v5 = vld [vmem:[%s1025_s1 + $0x50] sm:$0xff]  }
   0x2   :  { %v783_v2 = vld [vmem:[%s1025_s1] sm:$0xff]   ;;  %681 = vmatprep.subr.bf16.mxu0 %v782_v0  ;;  %v785_v4 = vld [vmem:[%s1025_s1 + $0x8] sm:$0xff]   ;;  %v787_v6 = vld [vmem:[%s1025_s1 + $0x10] sm:$0xff]  }
   0x3   :  { %682 = vmatpush3.bf16.msra.mxu0 %v783_v2  ;;  %v788_v7 = vld [vmem:[%s1025_s1 + $0x58] sm:$0xff]   ;;  %v790_v9 = vld [vmem:[%s1025_s1 + $0x60] sm:$0xff]   ;;  %v792_v12 = vld [vmem:[%s1025_s1 + $0x68] sm:$0xff]  }
   0x4   :  { %683 = vmatprep.subr.bf16.mxu0 %v784_v3  ;;  %v789_v8 = vld [vmem:[%s1025_s1 + $0x18] sm:$0xff]   ;;  %v796_v10 = vld [vmem:[%s1025_s1 + $0x80] sm:$0xff]   ;;  %v793_v13 = vld [vmem:[%s1025_s1 + $0x28] sm:$0xff]  }
   0x5   :  { %v791_v11 = vld [vmem:[%s1025_s1 + $0x20] sm:$0xff]   ;;  %749 = vmatpush3.bf16.msra.mxu1 %v796_v10  ;;  %v794_v14 = vld [vmem:[%s1025_s1 + $0x70] sm:$0xff]   ;;  %v802_v16 = vld [vmem:[%s1025_s1 + $0x88] sm:$0xff]  }
   0x6   :  { %750 = vmatprep.subr.bf16.mxu1 %v827_v1  ;;  %v801_v15 = vld [vmem:[%s1026_s0 + $0x4] ss:$12 sps:$4 sm:$0xff]   ;;  %v803_v17 = vld [vmem:[%s1026_s0 + $0x8] ss:$12 sps:$4 sm:$0xff]   ;;  %v797_v19 = vld [vmem:[%s1025_s1 + $0x78] sm:$0xff]  }
   0x7   :  { %684 = vmatpush3.bf16.msra.mxu0 %v785_v4  ;;  %346 = vmatprep.mubr.bf16.mxu0 %v801_v15  ;;  %v795_v18 = vld [vmem:[%s1025_s1 + $0x30] sm:$0xff]   ;;  %v798_v20 = vld [vmem:[%s1025_s1 + $0x38] sm:$0xff]   ;;  %v807_v21 = vld [vmem:[%s1026_s0 + $0x20] ss:$12 sps:$4 sm:$0xff]  }
   0x8   :  { %685 = vmatprep.subr.bf16.mxu0 %v786_v5  ;;  %v799_v22 = vld [vmem:[%s1026_s0] ss:$12 sps:$4 sm:$0xff]   ;;  %v804_v23 = vld [vmem:[%s1026_s0 + $0x1c] ss:$12 sps:$4 sm:$0xff]   ;;  %v811_v24 = vld [vmem:[%s1026_s0 + $0x38] ss:$12 sps:$4 sm:$0xff]  }
   0x9   :  { %751 = vmatpush3.bf16.msra.mxu1 %v802_v16  ;;  %v806_v25 = vld [vmem:[%s1026_s0 + $0x18] ss:$12 sps:$4 sm:$0xff]   ;;  %v808_v26 = vld [vmem:[%s1026_s0 + $0x34] ss:$12 sps:$4 sm:$0xff]   ;;  %v815_v27 = vld [vmem:[%s1026_s0 + $0x50] ss:$12 sps:$4 sm:$0xff]  }
   0xa   :  { %v810_v28 = vld [vmem:[%s1026_s0 + $0x30] ss:$12 sps:$4 sm:$0xff]   ;;  %v812_v29 = vld [vmem:[%s1026_s0 + $0x4c] ss:$12 sps:$4 sm:$0xff]   ;;  %v819_v30 = vld [vmem:[%s1026_s0 + $0x68] ss:$12 sps:$4 sm:$0xff]  }
   0xb   :  { %686 = vmatpush3.bf16.msra.mxu0 %v787_v6  ;;  %v814_v31 = vld [vmem:[%s1026_s0 + $0x48] ss:$12 sps:$4 sm:$0xff]   ;;  %v816_v32 = vld [vmem:[%s1026_s0 + $0x64] ss:$12 sps:$4 sm:$0xff]   ;;  %v823_v33 = vld [vmem:[%s1026_s0 + $0x80] ss:$12 sps:$4 sm:$0xff]  }
   0xc   :  { %687 = vmatprep.subr.bf16.mxu0 %v788_v7  ;;  %753 = vmatmul.mubr.msk.bf16.vlgmr.msra.gmra.mrb[0].mxu1 %vm292_vm1, %v803_v17  ;;  %v818_v34 = vld [vmem:[%s1026_s0 + $0x60] ss:$12 sps:$4 sm:$0xff]   ;;  %v820_v35 = vld [vmem:[%s1026_s0 + $0x7c] ss:$12 sps:$4 sm:$0xff]   ;;  %v39_v36 = vld [vmem:[%s1026_s0 + $0x90] sm:$0x11] }
   0xd   :  { %756 = vmatprep.mubr.msk.bf16.mxu1 %vm828_vm0, %v827_v1  ;;  %v826_v37 = vld [vmem:[%s1026_s0 + $0x98] ss:$0 sps:$4 sm:$0x11]   ;;  %v593_v39 = vcombine.high %v39_v36, %v39_v36  ;;  %v592_v40 = vcombine.low %v39_v36, %v39_v36  ;;  %v989_v50 = vld [vmem:[%s1027_s2] ss:$0 sm:$0xff] }
   0xe   :  { %v822_v38 = vld [vmem:[%s1026_s0 + $0x78] ss:$12 sps:$4 sm:$0xff]  }
   0xf   :  { %688 = vmatpush3.bf16.msra.mxu0 %v789_v8 }
  0x10   :  { %689 = vmatprep.subr.bf16.mxu0 %v790_v9 }
  0x13   :  { %690 = vmatpush3.bf16.msra.mxu0 %v791_v11 }
  0x14   :  { %691 = vmatprep.subr.bf16.mxu0 %v792_v12  ;;  %757 = vmatmul.mubr.msk.bf16.gmra.mrb[4].mxu1 %vm292_vm1, %v807_v21 }
  0x15   :  { %760 = vmatprep.mubr.msk.bf16.mxu1 %vm828_vm0, %v827_v1 }
  0x17   :  { %692 = vmatpush3.bf16.msra.mxu0 %v793_v13 }
  0x18   :  { %693 = vmatprep.subr.bf16.mxu0 %v794_v14 }
  0x1b   :  { %694 = vmatpush3.bf16.msra.mxu0 %v795_v18 }
  0x1c   :  { %695 = vmatprep.subr.bf16.mxu0 %v797_v19  ;;  %761 = vmatmul.mubr.msk.bf16.gmra.mrb[8].mxu1 %vm292_vm1, %v811_v24 }
  0x1d   :  { %764 = vmatprep.mubr.msk.bf16.mxu1 %vm828_vm0, %v827_v1 }
  0x1f   :  { %696 = vmatpush3.bf16.msra.mxu0 %v798_v20 }
  0x22   :  { %347 = vmatmul.mubr.bf16.vlgmr.msra.gmra.mrb[0].mxu0 %v799_v22 }
  0x23   :  { %354 = vmatprep.mubr.bf16.mxu0 %v804_v23 }
  0x24   :  { %765 = vmatmul.mubr.msk.bf16.gmra.mrb[12].mxu1 %vm292_vm1, %v815_v27 }
  0x25   :  { %768 = vmatprep.mubr.msk.bf16.mxu1 %vm828_vm0, %v827_v1 }
  0x2a   :  { %355 = vmatmul.mubr.bf16.gmra.mrb[4].mxu0 %v806_v25 }
  0x2b   :  { %362 = vmatprep.mubr.bf16.mxu0 %v808_v26 }
  0x2c   :  { %769 = vmatmul.mubr.msk.bf16.gmra.mrb[16].mxu1 %vm292_vm1, %v819_v30 }
  0x2d   :  { %772 = vmatprep.mubr.msk.bf16.mxu1 %vm828_vm0, %v827_v1 }
  0x32   :  { %363 = vmatmul.mubr.bf16.gmra.mrb[8].mxu0 %v810_v28 }
  0x33   :  { %370 = vmatprep.mubr.bf16.mxu0 %v812_v29 }
  0x34   :  { %773 = vmatmul.mubr.msk.bf16.gmra.mrb[20].mxu1 %vm292_vm1, %v823_v33 }
  0x35   :  { %776 = vmatprep.mubr.msk.bf16.mxu1 %vm828_vm0, %v827_v1 }
  0x3a   :  { %371 = vmatmul.mubr.bf16.gmra.mrb[12].mxu0 %v814_v31 }
  0x3b   :  { %378 = vmatprep.mubr.bf16.mxu0 %v816_v32 }
  0x3c   :  { %777 = vmatmul.mubr.msk.bf16.gmra.mrb[24].mxu1 %vm292_vm1, %v826_v37 }
  0x42   :  { %379 = vmatmul.mubr.bf16.gmra.mrb[16].mxu0 %v818_v34 }
  0x43   :  { %386 = vmatprep.mubr.bf16.mxu0 %v820_v35 }
  0x4a   :  { %387 = vmatmul.mubr.bf16.gmra.mrb[20].mxu0 %v822_v38 }
  0x4b   :  { %394 = vmatprep.mubr.bf16.mxu0 %v593_v39 }
  0x52   :  { %395 = vmatmul.mubr.bf16.gmra.mrb[24].mxu0 %v592_v40 }
  0xdf   :  { %v436_v41 = vpop.f32.mrb[0].mxu1 }
  0xe0   :  { %v754_v42 = vpop.f32.mrb[1].mxu1 }
  0xe1   :  { %v439_v43 = vpop.f32.mrb[2].mxu1 }
  0xe2   :  { %v755_v44 = vpop.f32.mrb[3].mxu1 }
  0xe7   :  { %v444_v45 = vpop.f32.mrb[4].mxu1 }
  0xe8   :  { %v758_v46 = vpop.f32.mrb[5].mxu1 }
  0xe9   :  { %v447_v48 = vpop.f32.mrb[6].mxu1 }
  0xea   :  { %v759_v51 = vpop.f32.mrb[7].mxu1 }
  0xef   :  { %v452_v59 = vpop.f32.mrb[8].mxu1 }
  0xf0   :  { %v762_v60 = vpop.f32.mrb[9].mxu1 }
  0xf1   :  { %v455_v63 = vpop.f32.mrb[10].mxu1 }
  0xf2   :  { %v763_v1 = vpop.f32.mrb[11].mxu1 }
  0xf5   :  { %v697_v47 = vpop.f32.mrb[0].mxu0 }
  0xf6   :  { %v698_v49 = vpop.f32.mrb[1].mxu0 }
  0xf7   :  { %v699_v52 = vadd.f32 %v698_v49, %v697_v47  ;;  %v700_v53 = vpop.f32.mrb[2].mxu0  ;;  %v460_v12 = vpop.f32.mrb[12].mxu1 }
  0xf8   :  { %v701_v54 = vpop.f32.mrb[3].mxu0  ;;  %v766_v13 = vpop.f32.mrb[13].mxu1 }
  0xf9   :  { %v349_v55 = vadd.f32 %v699_v52, %v989_v50  ;;  %v702_v56 = vadd.f32 %v701_v54, %v700_v53  ;;  %v463_v16 = vpop.f32.mrb[14].mxu1 }
  0xfa   :  { %v767_v18 = vpop.f32.mrb[15].mxu1 }
  0xfb   :  { %v437_v57 = vadd.f32 %v436_v41, %v349_v55  ;;  %v352_v58 = vadd.f32 %v702_v56, %v989_v50 }
  0xfd   :  { %v440_v61 = vadd.f32 %v439_v43, %v352_v58  ;;  %v703_v62 = vpop.f32.mrb[4].mxu0  ;;  %v490_v2 = vmax.f32 %v437_v57, 0.0 }
  0xfe   :  { %v704_v0 = vpop.f32.mrb[5].mxu0 }
  0xff   :  { %v491_v3 = vmax.f32 %v440_v61, 0.0  ;;  %v705_v4 = vadd.f32 %v704_v0, %v703_v62  ;;  %v706_v5 = vpop.f32.mrb[6].mxu0  ;;  %v468_v29 = vpop.f32.mrb[16].mxu1 }
 0x100   :  { %v707_v6 = vpop.f32.mrb[7].mxu0  ;;  %v770_v30 = vpop.f32.mrb[17].mxu1 }
 0x101   :  { %v649_v7 = vpack.c.bf16 %v491_v3, %v490_v2  ;;  %v357_v8 = vadd.f32 %v705_v4, %v989_v50  ;;  %v708_v9 = vadd.f32 %v707_v6, %v706_v5  ;;  %v471_v33 = vpop.f32.mrb[18].mxu1 }
 0x102   :  { %v771_v35 = vpop.f32.mrb[19].mxu1 }
 0x103   :  { %650 = vst [vmem:[%s1028_s3] sm:$0xff] %v649_v7   ;;  %v445_v10 = vadd.f32 %v444_v45, %v357_v8  ;;  %v360_v11 = vadd.f32 %v708_v9, %v989_v50 }
 0x105   :  { %v448_v14 = vadd.f32 %v447_v48, %v360_v11  ;;  %v709_v15 = vpop.f32.mrb[8].mxu0  ;;  %v492_v19 = vmax.f32 %v445_v10, 0.0 }
 0x106   :  { %v710_v17 = vpop.f32.mrb[9].mxu0 }
 0x107   :  { %v493_v20 = vmax.f32 %v448_v14, 0.0  ;;  %v711_v21 = vadd.f32 %v710_v17, %v709_v15  ;;  %v712_v22 = vpop.f32.mrb[10].mxu0  ;;  %v476_v46 = vpop.f32.mrb[20].mxu1 }
 0x108   :  { %v713_v23 = vpop.f32.mrb[11].mxu0  ;;  %v774_v47 = vpop.f32.mrb[21].mxu1 }
 0x109   :  { %v654_v24 = vpack.c.bf16 %v493_v20, %v492_v19  ;;  %v365_v25 = vadd.f32 %v711_v21, %v989_v50  ;;  %v714_v26 = vadd.f32 %v713_v23, %v712_v22  ;;  %v479_v51 = vpop.f32.mrb[22].mxu1 }
 0x10a   :  { %v775_v53 = vpop.f32.mrb[23].mxu1 }
 0x10b   :  { %676 = vst [vmem:[%s1028_s3 + $0x8] sm:$0xff] %v654_v24   ;;  %v453_v27 = vadd.f32 %v452_v59, %v365_v25  ;;  %v368_v28 = vadd.f32 %v714_v26, %v989_v50 }
 0x10d   :  { %v456_v31 = vadd.f32 %v455_v63, %v368_v28  ;;  %v715_v32 = vpop.f32.mrb[12].mxu0  ;;  %v494_v36 = vmax.f32 %v453_v27, 0.0 }
 0x10e   :  { %v716_v34 = vpop.f32.mrb[13].mxu0 }
 0x10f   :  { %v495_v37 = vmax.f32 %v456_v31, 0.0  ;;  %v717_v38 = vadd.f32 %v716_v34, %v715_v32  ;;  %v718_v39 = vpop.f32.mrb[14].mxu0  ;;  %v484_v0 = vpop.f32.mrb[24].mxu1 }
 0x110   :  { %v719_v40 = vpop.f32.mrb[15].mxu0  ;;  %v778_v1 = vpop.f32.mrb[25].mxu1 }
 0x111   :  { %v659_v41 = vpack.c.bf16 %v495_v37, %v494_v36  ;;  %v373_v42 = vadd.f32 %v717_v38, %v989_v50  ;;  %v720_v43 = vadd.f32 %v719_v40, %v718_v39  ;;  %v487_v4 = vpop.f32.mrb[26].mxu1 }
 0x112   :  { %v779_v6 = vpop.f32.mrb[27].mxu1 }
 0x113   :  { %677 = vst [vmem:[%s1028_s3 + $0x10] sm:$0xff] %v659_v41   ;;  %v461_v44 = vadd.f32 %v460_v12, %v373_v42  ;;  %v376_v45 = vadd.f32 %v720_v43, %v989_v50 }
 0x115   :  { %v464_v48 = vadd.f32 %v463_v16, %v376_v45  ;;  %v721_v49 = vpop.f32.mrb[16].mxu0  ;;  %v496_v54 = vmax.f32 %v461_v44, 0.0 }
 0x116   :  { %v722_v52 = vpop.f32.mrb[17].mxu0 }
 0x117   :  { %v497_v55 = vmax.f32 %v464_v48, 0.0  ;;  %v723_v56 = vadd.f32 %v722_v52, %v721_v49  ;;  %v724_v57 = vpop.f32.mrb[18].mxu0 }
 0x118   :  { %v725_v58 = vpop.f32.mrb[19].mxu0 }
 0x119   :  { %v664_v59 = vpack.c.bf16 %v497_v55, %v496_v54  ;;  %v381_v60 = vadd.f32 %v723_v56, %v989_v50  ;;  %v726_v61 = vadd.f32 %v725_v58, %v724_v57 }
 0x11b   :  { %678 = vst [vmem:[%s1028_s3 + $0x18] sm:$0xff] %v664_v59   ;;  %v469_v62 = vadd.f32 %v468_v29, %v381_v60  ;;  %v384_v63 = vadd.f32 %v726_v61, %v989_v50 }
 0x11d   :  { %v472_v2 = vadd.f32 %v471_v33, %v384_v63  ;;  %v727_v3 = vpop.f32.mrb[20].mxu0  ;;  %v498_v7 = vmax.f32 %v469_v62, 0.0 }
 0x11e   :  { %v728_v5 = vpop.f32.mrb[21].mxu0 }
 0x11f   :  { %v499_v8 = vmax.f32 %v472_v2, 0.0  ;;  %v729_v9 = vadd.f32 %v728_v5, %v727_v3  ;;  %v730_v10 = vpop.f32.mrb[22].mxu0 }
 0x120   :  { %v731_v11 = vpop.f32.mrb[23].mxu0 }
 0x121   :  { %v669_v12 = vpack.c.bf16 %v499_v8, %v498_v7  ;;  %v389_v13 = vadd.f32 %v729_v9, %v989_v50  ;;  %v732_v14 = vadd.f32 %v731_v11, %v730_v10 }
 0x123   :  { %679 = vst [vmem:[%s1028_s3 + $0x20] sm:$0xff] %v669_v12   ;;  %v477_v15 = vadd.f32 %v476_v46, %v389_v13  ;;  %v392_v16 = vadd.f32 %v732_v14, %v989_v50 }
 0x125   :  { %v480_v17 = vadd.f32 %v479_v51, %v392_v16  ;;  %v733_v18 = vpop.f32.mrb[24].mxu0  ;;  %v500_v20 = vmax.f32 %v477_v15, 0.0 }
 0x126   :  { %v734_v19 = vpop.f32.mrb[25].mxu0 }
 0x127   :  { %v501_v21 = vmax.f32 %v480_v17, 0.0  ;;  %v735_v22 = vadd.f32 %v734_v19, %v733_v18  ;;  %v736_v23 = vpop.f32.mrb[26].mxu0 }
 0x128   :  { %v737_v24 = vpop.f32.mrb[27].mxu0 }
 0x129   :  { %v674_v25 = vpack.c.bf16 %v501_v21, %v500_v20  ;;  %v397_v26 = vadd.f32 %v735_v22, %v989_v50 }
 0x12b   :  { %680 = vst [vmem:[%s1028_s3 + $0x28] sm:$0xff] %v674_v25   ;;  %v485_v27 = vadd.f32 %v484_v0, %v397_v26 }
 0x12d   :  { %v502_v28 = vmax.f32 %v485_v27, 0.0 }
 0x12f   :  { %v645_v29 = vpack.c.bf16 %v502_v28, %v502_v28 }
 0x131   :  { %568 = vst [vmem:[%s1028_s3 + $0x30] sm:$0x1] %v645_v29 }

// kernel: actor_forward.7
= control target key start
LH: loop header
LB: loop body
LE: loop exit
PB: predicated region body
PF: predicated region fallthrough
CT: control target
= control target key end

     0   :  { %v831_v27 = vlaneseq  ;;  %v6091_v35 = vmov 1966171168   ;;  %vm6093_vm0 = vmmov 0   ;;  %s7463_s0 = inlined_call_operand.vmem [shape: bf16[2,6272], index: 0, kind: input, shape index: {}]   ;;  %s7464_s1 = inlined_call_operand.vmem [shape: bf16[6272,128], index: 1, kind: input, shape index: {}]   ;;  %s7465_s2 = inlined_call_operand.vmem [shape: f32[1,128], index: 2, kind: input, shape index: {}]   ;;  %s7466_s3 = inlined_call_operand.vmem [shape: bf16[128,4], index: 3, kind: input, shape index: {}]   ;;  %s7467_s4 = inlined_call_operand.vmem [shape: f32[1,4], index: 4, kind: input, shape index: {}]   ;;  %s7468_s5 = inlined_call_operand.hbm [shape: f32[2,4], index: 5, kind: output, shape index: {}]  }
   0x1   :  { %v5659_v0 = vld [vmem:[%s7464_s1 + $0x40] sm:$0xff]   ;;  %v5663_v4 = vld [vmem:[%s7464_s1 + $0x48] sm:$0xff]   ;;  %v5667_v8 = vld [vmem:[%s7464_s1 + $0x50] sm:$0xff]   ;;  %v829_v36 = vunpack.c.l.s4 %v6091_v35 }
   0x2   :  { %v5660_v1 = vld [vmem:[%s7464_s1] sm:$0xff]   ;;  %5069 = vmatprep.subr.bf16.mxu0 %v5659_v0  ;;  %v5664_v5 = vld [vmem:[%s7464_s1 + $0x8] sm:$0xff]   ;;  %v5668_v9 = vld [vmem:[%s7464_s1 + $0x10] sm:$0xff]   ;;  %v832_v32 = vshrl.u32 %v831_v27, 7 }
   0x3   :  { %v5661_v2 = vld [vmem:[%s7464_s1 + $0xc0] sm:$0xff]   ;;  %5070 = vmatpush3.bf16.msra.mxu0 %v5660_v1  ;;  %v5665_v6 = vld [vmem:[%s7464_s1 + $0xc8] sm:$0xff]   ;;  %v5669_v10 = vld [vmem:[%s7464_s1 + $0xd0] sm:$0xff]   ;;  %v830_v39 = vunpack.c.0.s8 %v829_v36 }
   0x4   :  { %v5662_v3 = vld [vmem:[%s7464_s1 + $0x80] sm:$0xff]   ;;  %5091 = vmatprep.subr.bf16.mxu1 %v5661_v2  ;;  %5071 = vmatprep.subr.bf16.mxu0 %v5663_v4  ;;  %v5666_v7 = vld [vmem:[%s7464_s1 + $0x88] sm:$0xff]   ;;  %v5670_v11 = vld [vmem:[%s7464_s1 + $0x90] sm:$0xff]  }
   0x5   :  { %5092 = vmatpush3.bf16.msra.mxu1 %v5662_v3  ;;  %v5671_v12 = vld [vmem:[%s7464_s1 + $0x58] sm:$0xff]   ;;  %v5675_v16 = vld [vmem:[%s7464_s1 + $0x60] sm:$0xff]   ;;  %v5679_v20 = vld [vmem:[%s7464_s1 + $0x68] sm:$0xff]   ;;  %v6230_v41 = vsub.s32 %v830_v39, %v832_v32 }
   0x6   :  { %5093 = vmatprep.subr.bf16.mxu1 %v5665_v6  ;;  %v5672_v13 = vld [vmem:[%s7464_s1 + $0x18] sm:$0xff]   ;;  %v5676_v17 = vld [vmem:[%s7464_s1 + $0x20] sm:$0xff]   ;;  %v5680_v21 = vld [vmem:[%s7464_s1 + $0x28] sm:$0xff]  }
   0x7   :  { %5072 = vmatpush3.bf16.msra.mxu0 %v5664_v5  ;;  %v5673_v14 = vld [vmem:[%s7464_s1 + $0xd8] sm:$0xff]   ;;  %v5677_v18 = vld [vmem:[%s7464_s1 + $0xe0] sm:$0xff]   ;;  %v5681_v22 = vld [vmem:[%s7464_s1 + $0xe8] sm:$0xff]  }
   0x8   :  { %5073 = vmatprep.subr.bf16.mxu0 %v5667_v8  ;;  %v5674_v15 = vld [vmem:[%s7464_s1 + $0x98] sm:$0xff]   ;;  %v5678_v19 = vld [vmem:[%s7464_s1 + $0xa0] sm:$0xff]   ;;  %v5682_v23 = vld [vmem:[%s7464_s1 + $0xa8] sm:$0xff]  }
   0x9   :  { %5094 = vmatpush3.bf16.msra.mxu1 %v5666_v7  ;;  %v5683_v24 = vld [vmem:[%s7464_s1 + $0x70] sm:$0xff]   ;;  %v5687_v29 = vld [vmem:[%s7464_s1 + $0x78] sm:$0xff]   ;;  %v22_v33 = vld [vmem:[%s7463_s0] sm:$0xff] }
   0xa   :  { %5095 = vmatprep.subr.bf16.mxu1 %v5669_v10  ;;  %v5684_v25 = vld [vmem:[%s7464_s1 + $0x30] sm:$0xff]   ;;  %v5688_v30 = vld [vmem:[%s7464_s1 + $0x38] sm:$0xff]   ;;  %v5692_v37 = vld [vmem:[%s7464_s1 + $0x140] sm:$0xff]   ;;  %v827_v38 = vcombine.high %v22_v33, %v22_v33  ;;  %v834_v42 = vrot.slane %v22_v33, %v6230_v41 }
   0xb   :  { %5074 = vmatpush3.bf16.msra.mxu0 %v5668_v9  ;;  %v5685_v26 = vld [vmem:[%s7464_s1 + $0xf0] sm:$0xff]   ;;  %v5689_v31 = vld [vmem:[%s7464_s1 + $0xf8] sm:$0xff]   ;;  %v5694_v40 = vld [vmem:[%s7464_s1 + $0x1c0] sm:$0xff]  }
   0xc   :  { %5075 = vmatprep.subr.bf16.mxu0 %v5671_v12  ;;  %v5686_v28 = vld [vmem:[%s7464_s1 + $0xb0] sm:$0xff]   ;;  %v5691_v34 = vld [vmem:[%s7464_s1 + $0xb8] sm:$0xff]   ;;  %v6234_v43 = vrot.slane %v827_v38, %v6230_v41  ;;  %v842_v44 = vcombine.high %v834_v42, %v834_v42  ;;  %v850_v45 = vrot.slane %v834_v42, %v6230_v41  ;;  %v5693_v47 = vld [vmem:[%s7464_s1 + $0x100] sm:$0xff]  }
   0xd   :  { %5096 = vmatpush3.bf16.msra.mxu1 %v5670_v11  ;;  %v5695_v49 = vld [vmem:[%s7464_s1 + $0x180] sm:$0xff]   ;;  %v5696_v52 = vld [vmem:[%s7464_s1 + $0x148] sm:$0xff]   ;;  %v5700_v58 = vld [vmem:[%s7464_s1 + $0x150] sm:$0xff]  }
   0xe   :  { %5097 = vmatprep.subr.bf16.mxu1 %v5673_v14  ;;  %v843_v46 = vcombine.high %v6234_v43, %v6234_v43  ;;  %v864_v48 = vrot.slane %v842_v44, %v6230_v41  ;;  %v872_v51 = vcombine.high %v850_v45, %v850_v45  ;;  %v5697_v54 = vld [vmem:[%s7464_s1 + $0x108] sm:$0xff]   ;;  %v5701_v59 = vld [vmem:[%s7464_s1 + $0x110] sm:$0xff]   ;;  %v5704_v62 = vld [vmem:[%s7464_s1 + $0x158] sm:$0xff]  }
   0xf   :  { %5076 = vmatpush3.bf16.msra.mxu0 %v5672_v13  ;;  %v5698_v55 = vld [vmem:[%s7464_s1 + $0x1c8] sm:$0xff]   ;;  %v5702_v60 = vld [vmem:[%s7464_s1 + $0x1d0] sm:$0xff]   ;;  %v5705_v63 = vld [vmem:[%s7464_s1 + $0x118] sm:$0xff]  }
  0x10   :  { %5077 = vmatprep.subr.bf16.mxu0 %v5675_v16  ;;  %v871_v50 = vrot.slane %v843_v46, %v6230_v41  ;;  %3568 = vmatprep.mubr.bf16.mxu0 %v864_v48  ;;  %v874_v53 = vcombine.high %v864_v48, %v864_v48  ;;  %v5699_v57 = vld [vmem:[%s7464_s1 + $0x188] sm:$0xff]   ;;  %v5703_v61 = vld [vmem:[%s7464_s1 + $0x190] sm:$0xff]   ;;  %v5706_v0 = vld [vmem:[%s7464_s1 + $0x1d8] sm:$0xff]  }
  0x11   :  { %5098 = vmatpush3.bf16.msra.mxu1 %v5674_v15  ;;  %v5707_v1 = vld [vmem:[%s7464_s1 + $0x198] sm:$0xff]   ;;  %v5708_v2 = vld [vmem:[%s7464_s1 + $0x160] sm:$0xff]   ;;  %v5712_v6 = vld [vmem:[%s7464_s1 + $0x168] sm:$0xff]  }
  0x12   :  { %5099 = vmatprep.subr.bf16.mxu1 %v5677_v18  ;;  %v875_v56 = vcombine.high %v871_v50, %v871_v50  ;;  %3608 = vmatprep.mubr.bf16.mxu1 %v874_v53  ;;  %v5709_v3 = vld [vmem:[%s7464_s1 + $0x120] sm:$0xff]   ;;  %v5713_v7 = vld [vmem:[%s7464_s1 + $0x128] sm:$0xff]   ;;  %v5716_v10 = vld [vmem:[%s7464_s1 + $0x170] sm:$0xff]   ;;  %v857_v18 = vrot.slane %v6234_v43, %v6230_v41 }
  0x13   :  { %5078 = vmatpush3.bf16.msra.mxu0 %v5676_v17  ;;  %v5710_v4 = vld [vmem:[%s7464_s1 + $0x1e0] sm:$0xff]   ;;  %v5714_v8 = vld [vmem:[%s7464_s1 + $0x1e8] sm:$0xff]   ;;  %v5717_v11 = vld [vmem:[%s7464_s1 + $0x130] sm:$0xff]  }
  0x14   :  { %5079 = vmatprep.subr.bf16.mxu0 %v5679_v20  ;;  %v5711_v5 = vld [vmem:[%s7464_s1 + $0x1a0] sm:$0xff]   ;;  %v5715_v9 = vld [vmem:[%s7464_s1 + $0x1a8] sm:$0xff]   ;;  %v5718_v12 = vld [vmem:[%s7464_s1 + $0x1f0] sm:$0xff]  }
  0x15   :  { %5100 = vmatpush3.bf16.msra.mxu1 %v5678_v19  ;;  %v5719_v13 = vld [vmem:[%s7464_s1 + $0x1b0] sm:$0xff]   ;;  %v5720_v14 = vld [vmem:[%s7464_s1 + $0x178] sm:$0xff]   ;;  %v5724_v19 = vld [vmem:[%s7464_s1 + $0x240] sm:$0xff]  }
  0x16   :  { %5101 = vmatprep.subr.bf16.mxu1 %v5681_v22  ;;  %v5721_v15 = vld [vmem:[%s7464_s1 + $0x138] sm:$0xff]   ;;  %v5725_v20 = vld [vmem:[%s7464_s1 + $0x200] sm:$0xff]   ;;  %v5731_v27 = vld [vmem:[%s7464_s1 + $0x288] sm:$0xff]  }
  0x17   :  { %5080 = vmatpush3.bf16.msra.mxu0 %v5680_v21  ;;  %v5722_v16 = vld [vmem:[%s7464_s1 + $0x1f8] sm:$0xff]   ;;  %v5726_v21 = vld [vmem:[%s7464_s1 + $0x2c0] sm:$0xff]   ;;  %v5745_v42 = vld [vmem:[%s7464_s1 + $0x228] sm:$0xff]  }
  0x18   :  { %5081 = vmatprep.subr.bf16.mxu0 %v5683_v24  ;;  %v5723_v17 = vld [vmem:[%s7464_s1 + $0x1b8] sm:$0xff]   ;;  %v5727_v22 = vld [vmem:[%s7464_s1 + $0x280] sm:$0xff]   ;;  %v5728_v24 = vld [vmem:[%s7464_s1 + $0x248] sm:$0xff]  }
  0x19   :  { %5102 = vmatpush3.bf16.msra.mxu1 %v5682_v23  ;;  %v873_v23 = vcombine.high %v857_v18, %v857_v18  ;;  %v5736_v32 = vld [vmem:[%s7464_s1 + $0x258] sm:$0xff]   ;;  %v5740_v36 = vld [vmem:[%s7464_s1 + $0x260] sm:$0xff]   ;;  %v5746_v43 = vld [vmem:[%s7464_s1 + $0x2e8] sm:$0xff]  }
  0x1a   :  { %5103 = vmatprep.subr.bf16.mxu1 %v5685_v26  ;;  %v5730_v26 = vld [vmem:[%s7464_s1 + $0x2c8] sm:$0xff]   ;;  %v5737_v33 = vld [vmem:[%s7464_s1 + $0x218] sm:$0xff]   ;;  %v5742_v38 = vld [vmem:[%s7464_s1 + $0x2e0] sm:$0xff]  }
  0x1b   :  { %5082 = vmatpush3.bf16.msra.mxu0 %v5684_v25  ;;  %v5729_v25 = vld [vmem:[%s7464_s1 + $0x208] sm:$0xff]   ;;  %v5739_v35 = vld [vmem:[%s7464_s1 + $0x298] sm:$0xff]   ;;  %v5743_v39 = vld [vmem:[%s7464_s1 + $0x2a0] sm:$0xff]  }
  0x1c   :  { %5083 = vmatprep.subr.bf16.mxu0 %v5687_v29  ;;  %v5733_v29 = vld [vmem:[%s7464_s1 + $0x210] sm:$0xff]   ;;  %v5747_v44 = vld [vmem:[%s7464_s1 + $0x2a8] sm:$0xff]  }
  0x1d   :  { %5104 = vmatpush3.bf16.msra.mxu1 %v5686_v28  ;;  %v5732_v28 = vld [vmem:[%s7464_s1 + $0x250] sm:$0xff]   ;;  %v23_v46 = vld [vmem:[%s7463_s0 + $0x8] sm:$0xff] }
  0x1e   :  { %5105 = vmatprep.subr.bf16.mxu1 %v5689_v31  ;;  %v5735_v31 = vld [vmem:[%s7464_s1 + $0x290] sm:$0xff]   ;;  %v883_v48 = vrot.slane %v23_v46, %v6230_v41 }
  0x1f   :  { %5084 = vmatpush3.bf16.msra.mxu0 %v5688_v30  ;;  %v5734_v30 = vld [vmem:[%s7464_s1 + $0x2d0] sm:$0xff]  }
  0x20   :  { %5113 = vmatprep.subr.bf16.mxu0 %v5692_v37  ;;  %v5741_v37 = vld [vmem:[%s7464_s1 + $0x220] sm:$0xff]  }
  0x21   :  { %5106 = vmatpush3.bf16.msra.mxu1 %v5691_v34  ;;  %v5738_v34 = vld [vmem:[%s7464_s1 + $0x2d8] sm:$0xff]  }
  0x22   :  { %5135 = vmatprep.subr.bf16.mxu1 %v5694_v40  ;;  %3569 = vmatmul.mubr.bf16.vlgmr.msra.gmra.mrb[0].mxu0 %v850_v45  ;;  %v5744_v40 = vld [vmem:[%s7464_s1 + $0x268] sm:$0xff]   ;;  %v5748_v45 = vld [vmem:[%s7464_s1 + $0x270] sm:$0xff]  }
  0x23   :  { %5114 = vmatpush3.bf16.msra.mxu0 %v5693_v47  ;;  %3648 = vmatprep.mubr.bf16.mxu0 %v871_v50  ;;  %v5749_v47 = vld [vmem:[%s7464_s1 + $0x230] sm:$0xff]  }
  0x24   :  { %3609 = vmatmul.mubr.bf16.vlgmr.msra.gmra.mrb[0].mxu1 %v872_v51  ;;  %5115 = vmatprep.subr.bf16.mxu0 %v5696_v52  ;;  %v5750_v50 = vld [vmem:[%s7464_s1 + $0x2f0] sm:$0xff]   ;;  %v891_v52 = vcombine.high %v883_v48, %v883_v48 }
  0x25   :  { %5136 = vmatpush3.bf16.msra.mxu1 %v5695_v49  ;;  %3688 = vmatprep.mubr.bf16.mxu1 %v875_v56  ;;  %v876_v49 = vcombine.high %v23_v46, %v23_v46  ;;  %v5751_v51 = vld [vmem:[%s7464_s1 + $0x2b0] sm:$0xff]  }
  0x26   :  { %5137 = vmatprep.subr.bf16.mxu1 %v5698_v55  ;;  %v5753_v55 = vld [vmem:[%s7464_s1 + $0x238] sm:$0xff]   ;;  %v913_v56 = vrot.slane %v891_v52, %v6230_v41  ;;  %v5799_v46 = vld [vmem:[%s7464_s1 + $0x4d0] sm:$0xff]   ;;  %v5805_v52 = vld [vmem:[%s7464_s1 + $0x460] sm:$0xff]  }
  0x27   :  { %5116 = vmatpush3.bf16.msra.mxu0 %v5697_v54  ;;  %v6422_v53 = vrot.slane %v876_v49, %v6230_v41  ;;  %v5752_v54 = vld [vmem:[%s7464_s1 + $0x278] sm:$0xff]  }
  0x28   :  { %5117 = vmatprep.subr.bf16.mxu0 %v5700_v58  ;;  %v5754_v58 = vld [vmem:[%s7464_s1 + $0x2f8] sm:$0xff]  }
  0x29   :  { %5138 = vmatpush3.bf16.msra.mxu1 %v5699_v57  ;;  %v892_v57 = vcombine.high %v6422_v53, %v6422_v53  ;;  %v5802_v49 = vld [vmem:[%s7464_s1 + $0x418] sm:$0xff]  }
  0x2a   :  { %5139 = vmatprep.subr.bf16.mxu1 %v5702_v60  ;;  %v923_v60 = vcombine.high %v913_v56, %v913_v56 }
  0x2b   :  { %5118 = vmatpush3.bf16.msra.mxu0 %v5701_v59  ;;  %v5755_v59 = vld [vmem:[%s7464_s1 + $0x2b8] sm:$0xff]  }
  0x2c   :  { %5119 = vmatprep.subr.bf16.mxu0 %v5704_v62  ;;  %v5756_v62 = vld [vmem:[%s7464_s1 + $0x340] sm:$0xff]  }
  0x2d   :  { %5140 = vmatpush3.bf16.msra.mxu1 %v5703_v61  ;;  %v899_v61 = vrot.slane %v883_v48, %v6230_v41  ;;  %v5801_v48 = vld [vmem:[%s7464_s1 + $0x458] sm:$0xff]  }
  0x2e   :  { %5141 = vmatprep.subr.bf16.mxu1 %v5706_v0  ;;  %v920_v0 = vrot.slane %v892_v57, %v6230_v41  ;;  %v5810_v57 = vld [vmem:[%s7464_s1 + $0x428] sm:$0xff]  }
  0x2f   :  { %5120 = vmatpush3.bf16.msra.mxu0 %v5705_v63  ;;  %v5757_v63 = vld [vmem:[%s7464_s1 + $0x300] sm:$0xff]  }
  0x30   :  { %5121 = vmatprep.subr.bf16.mxu0 %v5708_v2  ;;  %v5759_v2 = vld [vmem:[%s7464_s1 + $0x380] sm:$0xff]  }
  0x31   :  { %5142 = vmatpush3.bf16.msra.mxu1 %v5707_v1  ;;  %v5758_v1 = vld [vmem:[%s7464_s1 + $0x3c0] sm:$0xff]  }
  0x32   :  { %5143 = vmatprep.subr.bf16.mxu1 %v5710_v4  ;;  %v5760_v4 = vld [vmem:[%s7464_s1 + $0x348] sm:$0xff]  }
  0x33   :  { %5122 = vmatpush3.bf16.msra.mxu0 %v5709_v3  ;;  %v921_v3 = vcombine.high %v899_v61, %v899_v61 }
  0x34   :  { %5123 = vmatprep.subr.bf16.mxu0 %v5712_v6  ;;  %v924_v6 = vcombine.high %v920_v0, %v920_v0 }
  0x35   :  { %5144 = vmatpush3.bf16.msra.mxu1 %v5711_v5  ;;  %v5761_v5 = vld [vmem:[%s7464_s1 + $0x308] sm:$0xff]  }
  0x36   :  { %5145 = vmatprep.subr.bf16.mxu1 %v5714_v8  ;;  %v5763_v8 = vld [vmem:[%s7464_s1 + $0x388] sm:$0xff]  }
  0x37   :  { %5124 = vmatpush3.bf16.msra.mxu0 %v5713_v7  ;;  %v5762_v7 = vld [vmem:[%s7464_s1 + $0x3c8] sm:$0xff]  }
  0x38   :  { %5125 = vmatprep.subr.bf16.mxu0 %v5716_v10  ;;  %v5765_v10 = vld [vmem:[%s7464_s1 + $0x310] sm:$0xff]  }
  0x39   :  { %5146 = vmatpush3.bf16.msra.mxu1 %v5715_v9  ;;  %v5764_v9 = vld [vmem:[%s7464_s1 + $0x350] sm:$0xff]  }
  0x3a   :  { %5147 = vmatprep.subr.bf16.mxu1 %v5718_v12  ;;  %v5767_v12 = vld [vmem:[%s7464_s1 + $0x390] sm:$0xff]  }
  0x3b   :  { %5126 = vmatpush3.bf16.msra.mxu0 %v5717_v11  ;;  %v5766_v11 = vld [vmem:[%s7464_s1 + $0x3d0] sm:$0xff]  }
  0x3c   :  { %5127 = vmatprep.subr.bf16.mxu0 %v5720_v14  ;;  %v5769_v14 = vld [vmem:[%s7464_s1 + $0x318] sm:$0xff]  }
  0x3d   :  { %5148 = vmatpush3.bf16.msra.mxu1 %v5719_v13  ;;  %v5768_v13 = vld [vmem:[%s7464_s1 + $0x358] sm:$0xff]  }
  0x3e   :  { %5149 = vmatprep.subr.bf16.mxu1 %v5722_v16  ;;  %v5771_v16 = vld [vmem:[%s7464_s1 + $0x398] sm:$0xff]  }
  0x3f   :  { %5128 = vmatpush3.bf16.msra.mxu0 %v5721_v15  ;;  %v5770_v15 = vld [vmem:[%s7464_s1 + $0x3d8] sm:$0xff]  }
  0x40   :  { %5157 = vmatprep.subr.bf16.mxu0 %v5724_v19  ;;  %v5774_v19 = vld [vmem:[%s7464_s1 + $0x3e0] sm:$0xff]  }
  0x41   :  { %5150 = vmatpush3.bf16.msra.mxu1 %v5723_v17  ;;  %v5772_v17 = vld [vmem:[%s7464_s1 + $0x360] sm:$0xff]  }
  0x42   :  { %3649 = vmatmul.mubr.bf16.vlgmr.msra.gmra.mrb[4].mxu0 %v857_v18  ;;  %5179 = vmatprep.subr.bf16.mxu1 %v5726_v21  ;;  %v5773_v18 = vld [vmem:[%s7464_s1 + $0x320] sm:$0xff]   ;;  %v5776_v21 = vld [vmem:[%s7464_s1 + $0x368] sm:$0xff]  }
  0x43   :  { %5158 = vmatpush3.bf16.msra.mxu0 %v5725_v20  ;;  %3728 = vmatprep.mubr.bf16.mxu0 %v913_v56  ;;  %v5775_v20 = vld [vmem:[%s7464_s1 + $0x3a0] sm:$0xff]   ;;  %v5809_v56 = vld [vmem:[%s7464_s1 + $0x468] sm:$0xff]  }
  0x44   :  { %3689 = vmatmul.mubr.bf16.vlgmr.msra.gmra.mrb[4].mxu1 %v873_v23  ;;  %5159 = vmatprep.subr.bf16.mxu0 %v5728_v24  ;;  %v5778_v23 = vld [vmem:[%s7464_s1 + $0x3e8] sm:$0xff]  }
  0x45   :  { %5180 = vmatpush3.bf16.msra.mxu1 %v5727_v22  ;;  %3768 = vmatprep.mubr.bf16.mxu1 %v923_v60  ;;  %v5777_v22 = vld [vmem:[%s7464_s1 + $0x328] sm:$0xff]   ;;  %v5813_v60 = vld [vmem:[%s7464_s1 + $0x470] sm:$0xff]  }
  0x46   :  { %5181 = vmatprep.subr.bf16.mxu1 %v5730_v26  ;;  %v5779_v24 = vld [vmem:[%s7464_s1 + $0x3a8] sm:$0xff]   ;;  %v5781_v26 = vld [vmem:[%s7464_s1 + $0x330] sm:$0xff]  }
  0x47   :  { %5160 = vmatpush3.bf16.msra.mxu0 %v5729_v25  ;;  %v5780_v25 = vld [vmem:[%s7464_s1 + $0x370] sm:$0xff]  }
  0x48   :  { %5161 = vmatprep.subr.bf16.mxu0 %v5732_v28  ;;  %v5783_v28 = vld [vmem:[%s7464_s1 + $0x3b0] sm:$0xff]  }
  0x49   :  { %5182 = vmatpush3.bf16.msra.mxu1 %v5731_v27  ;;  %v5782_v27 = vld [vmem:[%s7464_s1 + $0x3f0] sm:$0xff]  }
  0x4a   :  { %5183 = vmatprep.subr.bf16.mxu1 %v5734_v30  ;;  %v5785_v30 = vld [vmem:[%s7464_s1 + $0x338] sm:$0xff]  }
  0x4b   :  { %5162 = vmatpush3.bf16.msra.mxu0 %v5733_v29  ;;  %v5784_v29 = vld [vmem:[%s7464_s1 + $0x378] sm:$0xff]  }
  0x4c   :  { %5163 = vmatprep.subr.bf16.mxu0 %v5736_v32  ;;  %v5788_v32 = vld [vmem:[%s7464_s1 + $0x3b8] sm:$0xff]  }
  0x4d   :  { %5184 = vmatpush3.bf16.msra.mxu1 %v5735_v31  ;;  %v5786_v31 = vld [vmem:[%s7464_s1 + $0x3f8] sm:$0xff]  }
  0x4e   :  { %5185 = vmatprep.subr.bf16.mxu1 %v5738_v34  ;;  %v5789_v34 = vld [vmem:[%s7464_s1 + $0x440] sm:$0xff]  }
  0x4f   :  { %5164 = vmatpush3.bf16.msra.mxu0 %v5737_v33  ;;  %v906_v33 = vrot.slane %v6422_v53, %v6230_v41  ;;  %v5806_v53 = vld [vmem:[%s7464_s1 + $0x420] sm:$0xff]  }
  0x50   :  { %5165 = vmatprep.subr.bf16.mxu0 %v5740_v36  ;;  %v5791_v36 = vld [vmem:[%s7464_s1 + $0x4c0] sm:$0xff]  }
  0x51   :  { %5186 = vmatpush3.bf16.msra.mxu1 %v5739_v35  ;;  %v5790_v35 = vld [vmem:[%s7464_s1 + $0x400] sm:$0xff]  }
  0x52   :  { %5187 = vmatprep.subr.bf16.mxu1 %v5742_v38  ;;  %v922_v38 = vcombine.high %v906_v33, %v906_v33 }
  0x53   :  { %5166 = vmatpush3.bf16.msra.mxu0 %v5741_v37  ;;  %v5792_v37 = vld [vmem:[%s7464_s1 + $0x480] sm:$0xff]  }
  0x54   :  { %5167 = vmatprep.subr.bf16.mxu0 %v5744_v40  ;;  %v5794_v40 = vld [vmem:[%s7464_s1 + $0x408] sm:$0xff]  }
  0x55   :  { %5188 = vmatpush3.bf16.msra.mxu1 %v5743_v39  ;;  %v5793_v39 = vld [vmem:[%s7464_s1 + $0x448] sm:$0xff]  }
  0x56   :  { %5189 = vmatprep.subr.bf16.mxu1 %v5746_v43  ;;  %v5796_v43 = vld [vmem:[%s7464_s1 + $0x488] sm:$0xff]  }
  0x57   :  { %5168 = vmatpush3.bf16.msra.mxu0 %v5745_v42  ;;  %v5795_v42 = vld [vmem:[%s7464_s1 + $0x4c8] sm:$0xff]  }
  0x58   :  { %5169 = vmatprep.subr.bf16.mxu0 %v5748_v45  ;;  %v5798_v45 = vld [vmem:[%s7464_s1 + $0x410] sm:$0xff]  }
  0x59   :  { %5190 = vmatpush3.bf16.msra.mxu1 %v5747_v44  ;;  %v5797_v44 = vld [vmem:[%s7464_s1 + $0x450] sm:$0xff]  }
  0x5a   :  { %5191 = vmatprep.subr.bf16.mxu1 %v5750_v50  ;;  %v5803_v50 = vld [vmem:[%s7464_s1 + $0x4d8] sm:$0xff]  }
  0x5b   :  { %5170 = vmatpush3.bf16.msra.mxu0 %v5749_v47  ;;  %v5800_v47 = vld [vmem:[%s7464_s1 + $0x490] sm:$0xff]  }
  0x5c   :  { %5171 = vmatprep.subr.bf16.mxu0 %v5752_v54  ;;  %v5807_v54 = vld [vmem:[%s7464_s1 + $0x4e0] sm:$0xff]  }
  0x5d   :  { %5192 = vmatpush3.bf16.msra.mxu1 %v5751_v51  ;;  %v5804_v51 = vld [vmem:[%s7464_s1 + $0x498] sm:$0xff]  }
  0x5e   :  { %5193 = vmatprep.subr.bf16.mxu1 %v5754_v58  ;;  %v5811_v58 = vld [vmem:[%s7464_s1 + $0x4e8] sm:$0xff]  }
  0x5f   :  { %5172 = vmatpush3.bf16.msra.mxu0 %v5753_v55  ;;  %v5808_v55 = vld [vmem:[%s7464_s1 + $0x4a0] sm:$0xff]  }
  0x60   :  { %5201 = vmatprep.subr.bf16.mxu0 %v5756_v62  ;;  %v5814_v62 = vld [vmem:[%s7464_s1 + $0x430] sm:$0xff]  }
  0x61   :  { %5194 = vmatpush3.bf16.msra.mxu1 %v5755_v59  ;;  %v5812_v59 = vld [vmem:[%s7464_s1 + $0x4a8] sm:$0xff]  }
  0x62   :  { %3729 = vmatmul.mubr.bf16.vlgmr.msra.gmra.mrb[8].mxu0 %v899_v61  ;;  %5223 = vmatprep.subr.bf16.mxu1 %v5758_v1  ;;  %v24_v61 = vld [vmem:[%s7463_s0 + $0x10] sm:$0xff] }
  0x63   :  { %5202 = vmatpush3.bf16.msra.mxu0 %v5757_v63  ;;  %3808 = vmatprep.mubr.bf16.mxu0 %v920_v0  ;;  %v932_v63 = vrot.slane %v24_v61, %v6230_v41  ;;  %v925_v0 = vcombine.high %v24_v61, %v24_v61  ;;  %v5815_v1 = vld [vmem:[%s7464_s1 + $0x4f0] sm:$0xff]  }
  0x64   :  { %3769 = vmatmul.mubr.bf16.vlgmr.msra.gmra.mrb[8].mxu1 %v921_v3  ;;  %5203 = vmatprep.subr.bf16.mxu0 %v5760_v4  ;;  %v5864_v61 = vld [vmem:[%s7464_s1 + $0x6d0] sm:$0xff]  }
  0x65   :  { %5224 = vmatpush3.bf16.msra.mxu1 %v5759_v2  ;;  %3848 = vmatprep.mubr.bf16.mxu1 %v924_v6  ;;  %v5816_v2 = vld [vmem:[%s7464_s1 + $0x4b0] sm:$0xff]   ;;  %v940_v3 = vcombine.high %v932_v63, %v932_v63  ;;  %v6628_v4 = vrot.slane %v925_v0, %v6230_v41  ;;  %v5818_v6 = vld [vmem:[%s7464_s1 + $0x438] sm:$0xff]  }
  0x66   :  { %5225 = vmatprep.subr.bf16.mxu1 %v5762_v7  ;;  %v5867_v0 = vld [vmem:[%s7464_s1 + $0x618] sm:$0xff]  }
  0x67   :  { %5204 = vmatpush3.bf16.msra.mxu0 %v5761_v5  ;;  %v5817_v5 = vld [vmem:[%s7464_s1 + $0x478] sm:$0xff]   ;;  %v962_v7 = vrot.slane %v940_v3, %v6230_v41  ;;  %v5870_v3 = vld [vmem:[%s7464_s1 + $0x660] sm:$0xff]  }
  0x68   :  { %5205 = vmatprep.subr.bf16.mxu0 %v5764_v9  ;;  %v5819_v9 = vld [vmem:[%s7464_s1 + $0x4f8] sm:$0xff]  }
  0x69   :  { %5226 = vmatpush3.bf16.msra.mxu1 %v5763_v8  ;;  %v941_v8 = vcombine.high %v6628_v4, %v6628_v4 }
  0x6a   :  { %5227 = vmatprep.subr.bf16.mxu1 %v5766_v11  ;;  %v972_v11 = vcombine.high %v962_v7, %v962_v7 }
  0x6b   :  { %5206 = vmatpush3.bf16.msra.mxu0 %v5765_v10  ;;  %v5820_v10 = vld [vmem:[%s7464_s1 + $0x4b8] sm:$0xff]  }
  0x6c   :  { %5207 = vmatprep.subr.bf16.mxu0 %v5768_v13  ;;  %v5821_v13 = vld [vmem:[%s7464_s1 + $0x540] sm:$0xff]  }
  0x6d   :  { %5228 = vmatpush3.bf16.msra.mxu1 %v5767_v12  ;;  %v948_v12 = vrot.slane %v932_v63, %v6230_v41  ;;  %v5866_v63 = vld [vmem:[%s7464_s1 + $0x658] sm:$0xff]  }
  0x6e   :  { %5229 = vmatprep.subr.bf16.mxu1 %v5770_v15  ;;  %v969_v15 = vrot.slane %v941_v8, %v6230_v41  ;;  %v5875_v8 = vld [vmem:[%s7464_s1 + $0x628] sm:$0xff]  }
  0x6f   :  { %5208 = vmatpush3.bf16.msra.mxu0 %v5769_v14  ;;  %v5822_v14 = vld [vmem:[%s7464_s1 + $0x500] sm:$0xff]  }
  0x70   :  { %5209 = vmatprep.subr.bf16.mxu0 %v5772_v17  ;;  %v5824_v17 = vld [vmem:[%s7464_s1 + $0x580] sm:$0xff]  }
  0x71   :  { %5230 = vmatpush3.bf16.msra.mxu1 %v5771_v16  ;;  %v5823_v16 = vld [vmem:[%s7464_s1 + $0x5c0] sm:$0xff]  }
  0x72   :  { %5231 = vmatprep.subr.bf16.mxu1 %v5774_v19  ;;  %v5825_v19 = vld [vmem:[%s7464_s1 + $0x548] sm:$0xff]  }
  0x73   :  { %5210 = vmatpush3.bf16.msra.mxu0 %v5773_v18  ;;  %v970_v18 = vcombine.high %v948_v12, %v948_v12 }
  0x74   :  { %5211 = vmatprep.subr.bf16.mxu0 %v5776_v21  ;;  %v973_v21 = vcombine.high %v969_v15, %v969_v15 }
  0x75   :  { %5232 = vmatpush3.bf16.msra.mxu1 %v5775_v20  ;;  %v5826_v20 = vld [vmem:[%s7464_s1 + $0x508] sm:$0xff]  }
  0x76   :  { %5233 = vmatprep.subr.bf16.mxu1 %v5778_v23  ;;  %v5828_v23 = vld [vmem:[%s7464_s1 + $0x588] sm:$0xff]  }
  0x77   :  { %5212 = vmatpush3.bf16.msra.mxu0 %v5777_v22  ;;  %v5827_v22 = vld [vmem:[%s7464_s1 + $0x5c8] sm:$0xff]  }
  0x78   :  { %5213 = vmatprep.subr.bf16.mxu0 %v5780_v25  ;;  %v5830_v25 = vld [vmem:[%s7464_s1 + $0x510] sm:$0xff]  }
  0x79   :  { %5234 = vmatpush3.bf16.msra.mxu1 %v5779_v24  ;;  %v5829_v24 = vld [vmem:[%s7464_s1 + $0x550] sm:$0xff]  }
  0x7a   :  { %5235 = vmatprep.subr.bf16.mxu1 %v5782_v27  ;;  %v5832_v27 = vld [vmem:[%s7464_s1 + $0x590] sm:$0xff]  }
  0x7b   :  { %5214 = vmatpush3.bf16.msra.mxu0 %v5781_v26  ;;  %v5831_v26 = vld [vmem:[%s7464_s1 + $0x5d0] sm:$0xff]  }
  0x7c   :  { %5215 = vmatprep.subr.bf16.mxu0 %v5784_v29  ;;  %v5834_v29 = vld [vmem:[%s7464_s1 + $0x518] sm:$0xff]  }
  0x7d   :  { %5236 = vmatpush3.bf16.msra.mxu1 %v5783_v28  ;;  %v5833_v28 = vld [vmem:[%s7464_s1 + $0x558] sm:$0xff]  }
  0x7e   :  { %5237 = vmatprep.subr.bf16.mxu1 %v5786_v31  ;;  %v5836_v31 = vld [vmem:[%s7464_s1 + $0x598] sm:$0xff]  }
  0x7f   :  { %5216 = vmatpush3.bf16.msra.mxu0 %v5785_v30  ;;  %v5835_v30 = vld [vmem:[%s7464_s1 + $0x5d8] sm:$0xff]  }
  0x80   :  { %5245 = vmatprep.subr.bf16.mxu0 %v5789_v34  ;;  %v5839_v34 = vld [vmem:[%s7464_s1 + $0x5e0] sm:$0xff]  }
  0x81   :  { %5238 = vmatpush3.bf16.msra.mxu1 %v5788_v32  ;;  %v5837_v32 = vld [vmem:[%s7464_s1 + $0x560] sm:$0xff]  }
  0x82   :  { %3809 = vmatmul.mubr.bf16.vlgmr.msra.gmra.mrb[12].mxu0 %v906_v33  ;;  %5267 = vmatprep.subr.bf16.mxu1 %v5791_v36  ;;  %v5838_v33 = vld [vmem:[%s7464_s1 + $0x520] sm:$0xff]   ;;  %v5841_v36 = vld [vmem:[%s7464_s1 + $0x568] sm:$0xff]  }
  0x83   :  { %5246 = vmatpush3.bf16.msra.mxu0 %v5790_v35  ;;  %3888 = vmatprep.mubr.bf16.mxu0 %v962_v7  ;;  %v5840_v35 = vld [vmem:[%s7464_s1 + $0x5a0] sm:$0xff]   ;;  %v5874_v7 = vld [vmem:[%s7464_s1 + $0x668] sm:$0xff]  }
  0x84   :  { %3849 = vmatmul.mubr.bf16.vlgmr.msra.gmra.mrb[12].mxu1 %v922_v38  ;;  %5247 = vmatprep.subr.bf16.mxu0 %v5793_v39  ;;  %v5843_v38 = vld [vmem:[%s7464_s1 + $0x5e8] sm:$0xff]  }
  0x85   :  { %5268 = vmatpush3.bf16.msra.mxu1 %v5792_v37  ;;  %3928 = vmatprep.mubr.bf16.mxu1 %v972_v11  ;;  %v5842_v37 = vld [vmem:[%s7464_s1 + $0x528] sm:$0xff]   ;;  %v5878_v11 = vld [vmem:[%s7464_s1 + $0x670] sm:$0xff]  }
  0x86   :  { %5269 = vmatprep.subr.bf16.mxu1 %v5795_v42  ;;  %v5844_v39 = vld [vmem:[%s7464_s1 + $0x5a8] sm:$0xff]   ;;  %v5846_v42 = vld [vmem:[%s7464_s1 + $0x530] sm:$0xff]  }
  0x87   :  { %5248 = vmatpush3.bf16.msra.mxu0 %v5794_v40  ;;  %v5845_v40 = vld [vmem:[%s7464_s1 + $0x570] sm:$0xff]  }
  0x88   :  { %5249 = vmatprep.subr.bf16.mxu0 %v5797_v44  ;;  %v5848_v44 = vld [vmem:[%s7464_s1 + $0x5b0] sm:$0xff]  }
  0x89   :  { %5270 = vmatpush3.bf16.msra.mxu1 %v5796_v43  ;;  %v5847_v43 = vld [vmem:[%s7464_s1 + $0x5f0] sm:$0xff]  }
  0x8a   :  { %5271 = vmatprep.subr.bf16.mxu1 %v5799_v46  ;;  %v5850_v46 = vld [vmem:[%s7464_s1 + $0x538] sm:$0xff]  }
  0x8b   :  { %5250 = vmatpush3.bf16.msra.mxu0 %v5798_v45  ;;  %v5849_v45 = vld [vmem:[%s7464_s1 + $0x578] sm:$0xff]  }
  0x8c   :  { %5251 = vmatprep.subr.bf16.mxu0 %v5801_v48  ;;  %v5853_v48 = vld [vmem:[%s7464_s1 + $0x5b8] sm:$0xff]  }
  0x8d   :  { %5272 = vmatpush3.bf16.msra.mxu1 %v5800_v47  ;;  %v5851_v47 = vld [vmem:[%s7464_s1 + $0x5f8] sm:$0xff]  }
  0x8e   :  { %5273 = vmatprep.subr.bf16.mxu1 %v5803_v50  ;;  %v5854_v50 = vld [vmem:[%s7464_s1 + $0x640] sm:$0xff]  }
  0x8f   :  { %5252 = vmatpush3.bf16.msra.mxu0 %v5802_v49  ;;  %v955_v49 = vrot.slane %v6628_v4, %v6230_v41  ;;  %v5871_v4 = vld [vmem:[%s7464_s1 + $0x620] sm:$0xff]  }
  0x90   :  { %5253 = vmatprep.subr.bf16.mxu0 %v5805_v52  ;;  %v5856_v52 = vld [vmem:[%s7464_s1 + $0x6c0] sm:$0xff]  }
  0x91   :  { %5274 = vmatpush3.bf16.msra.mxu1 %v5804_v51  ;;  %v5855_v51 = vld [vmem:[%s7464_s1 + $0x600] sm:$0xff]  }
  0x92   :  { %5275 = vmatprep.subr.bf16.mxu1 %v5807_v54  ;;  %v971_v54 = vcombine.high %v955_v49, %v955_v49 }
  0x93   :  { %5254 = vmatpush3.bf16.msra.mxu0 %v5806_v53  ;;  %v5857_v53 = vld [vmem:[%s7464_s1 + $0x680] sm:$0xff]  }
  0x94   :  { %5255 = vmatprep.subr.bf16.mxu0 %v5809_v56  ;;  %v5859_v56 = vld [vmem:[%s7464_s1 + $0x608] sm:$0xff]  }
  0x95   :  { %5276 = vmatpush3.bf16.msra.mxu1 %v5808_v55  ;;  %v5858_v55 = vld [vmem:[%s7464_s1 + $0x648] sm:$0xff]  }
  0x96   :  { %5277 = vmatprep.subr.bf16.mxu1 %v5811_v58  ;;  %v5861_v58 = vld [vmem:[%s7464_s1 + $0x688] sm:$0xff]  }
  0x97   :  { %5256 = vmatpush3.bf16.msra.mxu0 %v5810_v57  ;;  %v5860_v57 = vld [vmem:[%s7464_s1 + $0x6c8] sm:$0xff]  }
  0x98   :  { %5257 = vmatprep.subr.bf16.mxu0 %v5813_v60  ;;  %v5863_v60 = vld [vmem:[%s7464_s1 + $0x610] sm:$0xff]  }
  0x99   :  { %5278 = vmatpush3.bf16.msra.mxu1 %v5812_v59  ;;  %v5862_v59 = vld [vmem:[%s7464_s1 + $0x650] sm:$0xff]  }
  0x9a   :  { %5279 = vmatprep.subr.bf16.mxu1 %v5815_v1  ;;  %v5868_v1 = vld [vmem:[%s7464_s1 + $0x6d8] sm:$0xff]  }
  0x9b   :  { %5258 = vmatpush3.bf16.msra.mxu0 %v5814_v62  ;;  %v5865_v62 = vld [vmem:[%s7464_s1 + $0x690] sm:$0xff]  }
  0x9c   :  { %5259 = vmatprep.subr.bf16.mxu0 %v5817_v5  ;;  %v5872_v5 = vld [vmem:[%s7464_s1 + $0x6e0] sm:$0xff]  }
  0x9d   :  { %5280 = vmatpush3.bf16.msra.mxu1 %v5816_v2  ;;  %v5869_v2 = vld [vmem:[%s7464_s1 + $0x698] sm:$0xff]  }
  0x9e   :  { %5281 = vmatprep.subr.bf16.mxu1 %v5819_v9  ;;  %v5876_v9 = vld [vmem:[%s7464_s1 + $0x6e8] sm:$0xff]  }
  0x9f   :  { %5260 = vmatpush3.bf16.msra.mxu0 %v5818_v6  ;;  %v5873_v6 = vld [vmem:[%s7464_s1 + $0x6a0] sm:$0xff]  }
  0xa0   :  { %5289 = vmatprep.subr.bf16.mxu0 %v5821_v13  ;;  %v5880_v13 = vld [vmem:[%s7464_s1 + $0x6f0] sm:$0xff]  }
  0xa1   :  { %5282 = vmatpush3.bf16.msra.mxu1 %v5820_v10  ;;  %v5877_v10 = vld [vmem:[%s7464_s1 + $0x6a8] sm:$0xff]  }
  0xa2   :  { %3889 = vmatmul.mubr.bf16.vlgmr.msra.gmra.mrb[16].mxu0 %v948_v12  ;;  %5311 = vmatprep.subr.bf16.mxu1 %v5823_v16  ;;  %v25_v12 = vld [vmem:[%s7463_s0 + $0x18] sm:$0xff]  ;;  %v5879_v16 = vld [vmem:[%s7464_s1 + $0x630] sm:$0xff]  }
  0xa3   :  { %5290 = vmatpush3.bf16.msra.mxu0 %v5822_v14  ;;  %3968 = vmatprep.mubr.bf16.mxu0 %v969_v15  ;;  %v981_v14 = vrot.slane %v25_v12, %v6230_v41  ;;  %v974_v15 = vcombine.high %v25_v12, %v25_v12  ;;  %v5918_v12 = vld [vmem:[%s7464_s1 + $0x7b8] sm:$0xff]  }
  0xa4   :  { %3929 = vmatmul.mubr.bf16.vlgmr.msra.gmra.mrb[16].mxu1 %v970_v18  ;;  %5291 = vmatprep.subr.bf16.mxu0 %v5825_v19 }
  0xa5   :  { %5312 = vmatpush3.bf16.msra.mxu1 %v5824_v17  ;;  %4008 = vmatprep.mubr.bf16.mxu1 %v973_v21  ;;  %v5882_v17 = vld [vmem:[%s7464_s1 + $0x678] sm:$0xff]   ;;  %v989_v18 = vcombine.high %v981_v14, %v981_v14  ;;  %v6834_v19 = vrot.slane %v974_v15, %v6230_v41  ;;  %v5920_v15 = vld [vmem:[%s7464_s1 + $0x800] sm:$0xff]  }
  0xa6   :  { %5313 = vmatprep.subr.bf16.mxu1 %v5827_v22  ;;  %v5884_v21 = vld [vmem:[%s7464_s1 + $0x6f8] sm:$0xff]  }
  0xa7   :  { %5292 = vmatpush3.bf16.msra.mxu0 %v5826_v20  ;;  %v5881_v20 = vld [vmem:[%s7464_s1 + $0x6b0] sm:$0xff]   ;;  %v1011_v22 = vrot.slane %v989_v18, %v6230_v41 }
  0xa8   :  { %5293 = vmatprep.subr.bf16.mxu0 %v5829_v24  ;;  %v5883_v24 = vld [vmem:[%s7464_s1 + $0x638] sm:$0xff]  }
  0xa9   :  { %5314 = vmatpush3.bf16.msra.mxu1 %v5828_v23  ;;  %v990_v23 = vcombine.high %v6834_v19, %v6834_v19 }
  0xaa   :  { %5315 = vmatprep.subr.bf16.mxu1 %v5831_v26  ;;  %v5886_v26 = vld [vmem:[%s7464_s1 + $0x740] sm:$0xff]  }
  0xab   :  { %5294 = vmatpush3.bf16.msra.mxu0 %v5830_v25  ;;  %v997_v25 = vrot.slane %v981_v14, %v6230_v41  ;;  %v5919_v14 = vld [vmem:[%s7464_s1 + $0x840] sm:$0xff]  }
  0xac   :  { %5295 = vmatprep.subr.bf16.mxu0 %v5833_v28  ;;  %v5885_v28 = vld [vmem:[%s7464_s1 + $0x6b8] sm:$0xff]  }
  0xad   :  { %5316 = vmatpush3.bf16.msra.mxu1 %v5832_v27  ;;  %v1021_v27 = vcombine.high %v1011_v22, %v1011_v22 }
  0xae   :  { %5317 = vmatprep.subr.bf16.mxu1 %v5835_v30  ;;  %v5888_v30 = vld [vmem:[%s7464_s1 + $0x7c0] sm:$0xff]  }
  0xaf   :  { %5296 = vmatpush3.bf16.msra.mxu0 %v5834_v29  ;;  %v1018_v29 = vrot.slane %v990_v23, %v6230_v41  ;;  %v5927_v23 = vld [vmem:[%s7464_s1 + $0x850] sm:$0xff]  }
  0xb0   :  { %5297 = vmatprep.subr.bf16.mxu0 %v5837_v32  ;;  %v1019_v32 = vcombine.high %v997_v25, %v997_v25 }
  0xb1   :  { %5318 = vmatpush3.bf16.msra.mxu1 %v5836_v31  ;;  %v5887_v31 = vld [vmem:[%s7464_s1 + $0x700] sm:$0xff]  }
  0xb2   :  { %5319 = vmatprep.subr.bf16.mxu1 %v5839_v34  ;;  %v5889_v34 = vld [vmem:[%s7464_s1 + $0x780] sm:$0xff]  }
  0xb3   :  { %5298 = vmatpush3.bf16.msra.mxu0 %v5838_v33  ;;  %v5890_v33 = vld [vmem:[%s7464_s1 + $0x748] sm:$0xff]  }
  0xb4   :  { %5299 = vmatprep.subr.bf16.mxu0 %v5841_v36  ;;  %v5892_v36 = vld [vmem:[%s7464_s1 + $0x7c8] sm:$0xff]  }
  0xb5   :  { %5320 = vmatpush3.bf16.msra.mxu1 %v5840_v35  ;;  %v1022_v35 = vcombine.high %v1018_v29, %v1018_v29 }
  0xb6   :  { %5321 = vmatprep.subr.bf16.mxu1 %v5843_v38  ;;  %v5894_v38 = vld [vmem:[%s7464_s1 + $0x750] sm:$0xff]  }
  0xb7   :  { %5300 = vmatpush3.bf16.msra.mxu0 %v5842_v37  ;;  %v5891_v37 = vld [vmem:[%s7464_s1 + $0x708] sm:$0xff]  }
  0xb8   :  { %5301 = vmatprep.subr.bf16.mxu0 %v5845_v40  ;;  %v5896_v40 = vld [vmem:[%s7464_s1 + $0x7d0] sm:$0xff]  }
  0xb9   :  { %5322 = vmatpush3.bf16.msra.mxu1 %v5844_v39  ;;  %v5893_v39 = vld [vmem:[%s7464_s1 + $0x788] sm:$0xff]  }
  0xba   :  { %5323 = vmatprep.subr.bf16.mxu1 %v5847_v43  ;;  %v5898_v43 = vld [vmem:[%s7464_s1 + $0x758] sm:$0xff]  }
  0xbb   :  { %5302 = vmatpush3.bf16.msra.mxu0 %v5846_v42  ;;  %v5895_v42 = vld [vmem:[%s7464_s1 + $0x710] sm:$0xff]  }
  0xbc   :  { %5303 = vmatprep.subr.bf16.mxu0 %v5849_v45  ;;  %v5899_v45 = vld [vmem:[%s7464_s1 + $0x718] sm:$0xff]  }
  0xbd   :  { %5324 = vmatpush3.bf16.msra.mxu1 %v5848_v44  ;;  %v5897_v44 = vld [vmem:[%s7464_s1 + $0x790] sm:$0xff]  }
  0xbe   :  { %5325 = vmatprep.subr.bf16.mxu1 %v5851_v47  ;;  %v5901_v47 = vld [vmem:[%s7464_s1 + $0x798] sm:$0xff]  }
  0xbf   :  { %5304 = vmatpush3.bf16.msra.mxu0 %v5850_v46  ;;  %v5900_v46 = vld [vmem:[%s7464_s1 + $0x7d8] sm:$0xff]  }
  0xc0   :  { %5333 = vmatprep.subr.bf16.mxu0 %v5854_v50  ;;  %v5904_v50 = vld [vmem:[%s7464_s1 + $0x7e0] sm:$0xff]  }
  0xc1   :  { %5326 = vmatpush3.bf16.msra.mxu1 %v5853_v48  ;;  %v5902_v48 = vld [vmem:[%s7464_s1 + $0x760] sm:$0xff]  }
  0xc2   :  { %3969 = vmatmul.mubr.bf16.vlgmr.msra.gmra.mrb[20].mxu0 %v955_v49  ;;  %5355 = vmatprep.subr.bf16.mxu1 %v5856_v52  ;;  %v5903_v49 = vld [vmem:[%s7464_s1 + $0x720] sm:$0xff]   ;;  %v5906_v52 = vld [vmem:[%s7464_s1 + $0x768] sm:$0xff]  }
  0xc3   :  { %5334 = vmatpush3.bf16.msra.mxu0 %v5855_v51  ;;  %4048 = vmatprep.mubr.bf16.mxu0 %v1011_v22  ;;  %v5905_v51 = vld [vmem:[%s7464_s1 + $0x7a0] sm:$0xff]   ;;  %v5926_v22 = vld [vmem:[%s7464_s1 + $0x888] sm:$0xff]  }
  0xc4   :  { %4009 = vmatmul.mubr.bf16.vlgmr.msra.gmra.mrb[20].mxu1 %v971_v54  ;;  %5335 = vmatprep.subr.bf16.mxu0 %v5858_v55  ;;  %v5908_v54 = vld [vmem:[%s7464_s1 + $0x7e8] sm:$0xff]  }
  0xc5   :  { %5356 = vmatpush3.bf16.msra.mxu1 %v5857_v53  ;;  %4088 = vmatprep.mubr.bf16.mxu1 %v1021_v27  ;;  %v5907_v53 = vld [vmem:[%s7464_s1 + $0x728] sm:$0xff]   ;;  %v5931_v27 = vld [vmem:[%s7464_s1 + $0x858] sm:$0xff]  }
  0xc6   :  { %5357 = vmatprep.subr.bf16.mxu1 %v5860_v57  ;;  %v5909_v55 = vld [vmem:[%s7464_s1 + $0x7a8] sm:$0xff]   ;;  %v5910_v57 = vld [vmem:[%s7464_s1 + $0x770] sm:$0xff]  }
  0xc7   :  { %5336 = vmatpush3.bf16.msra.mxu0 %v5859_v56  ;;  %v4666_v56 = vld [vmem:[%s7465_s2] ss:$0 sm:$0xff] }
  0xc8   :  { %5337 = vmatprep.subr.bf16.mxu0 %v5862_v59  ;;  %v5911_v59 = vld [vmem:[%s7464_s1 + $0x730] sm:$0xff]  }
  0xc9   :  { %5358 = vmatpush3.bf16.msra.mxu1 %v5861_v58 }
  0xca   :  { %5359 = vmatprep.subr.bf16.mxu1 %v5864_v61  ;;  %v5912_v61 = vld [vmem:[%s7464_s1 + $0x7f0] sm:$0xff]  }
  0xcb   :  { %5338 = vmatpush3.bf16.msra.mxu0 %v5863_v60 }
  0xcc   :  { %5339 = vmatprep.subr.bf16.mxu0 %v5866_v63 }
  0xcd   :  { %5360 = vmatpush3.bf16.msra.mxu1 %v5865_v62 }
  0xce   :  { %5361 = vmatprep.subr.bf16.mxu1 %v5868_v1  ;;  %v5913_v1 = vld [vmem:[%s7464_s1 + $0x7b0] sm:$0xff]  }
  0xcf   :  { %5340 = vmatpush3.bf16.msra.mxu0 %v5867_v0 }
  0xd0   :  { %5341 = vmatprep.subr.bf16.mxu0 %v5870_v3 }
  0xd1   :  { %5362 = vmatpush3.bf16.msra.mxu1 %v5869_v2  ;;  %v5914_v2 = vld [vmem:[%s7464_s1 + $0x778] sm:$0xff]  }
  0xd2   :  { %5363 = vmatprep.subr.bf16.mxu1 %v5872_v5 }
  0xd3   :  { %5342 = vmatpush3.bf16.msra.mxu0 %v5871_v4 }
  0xd4   :  { %5343 = vmatprep.subr.bf16.mxu0 %v5874_v7  ;;  %v5915_v7 = vld [vmem:[%s7464_s1 + $0x738] sm:$0xff]  }
  0xd5   :  { %5364 = vmatpush3.bf16.msra.mxu1 %v5873_v6 }
  0xd6   :  { %5365 = vmatprep.subr.bf16.mxu1 %v5876_v9  ;;  %v5916_v9 = vld [vmem:[%s7464_s1 + $0x7f8] sm:$0xff]  }
  0xd7   :  { %5344 = vmatpush3.bf16.msra.mxu0 %v5875_v8 }
  0xd8   :  { %5345 = vmatprep.subr.bf16.mxu0 %v5878_v11 }
  0xd9   :  { %5366 = vmatpush3.bf16.msra.mxu1 %v5877_v10 }
  0xda   :  { %5367 = vmatprep.subr.bf16.mxu1 %v5880_v13  ;;  %v1004_v13 = vrot.slane %v6834_v19, %v6230_v41  ;;  %v5923_v19 = vld [vmem:[%s7464_s1 + $0x848] sm:$0xff]  }
  0xdb   :  { %5346 = vmatpush3.bf16.msra.mxu0 %v5879_v16  ;;  %v5921_v16 = vld [vmem:[%s7464_s1 + $0x8c0] sm:$0xff]  }
  0xdc   :  { %5347 = vmatprep.subr.bf16.mxu0 %v5882_v17  ;;  %v5922_v17 = vld [vmem:[%s7464_s1 + $0x880] sm:$0xff]   ;;  %v1020_v18 = vcombine.high %v1004_v13, %v1004_v13 }
  0xdd   :  { %5368 = vmatpush3.bf16.msra.mxu1 %v5881_v20  ;;  %v5924_v20 = vld [vmem:[%s7464_s1 + $0x808] sm:$0xff]  }
  0xde   :  { %5369 = vmatprep.subr.bf16.mxu1 %v5884_v21  ;;  %v5925_v21 = vld [vmem:[%s7464_s1 + $0x8c8] sm:$0xff]  }
  0xdf   :  { %5348 = vmatpush3.bf16.msra.mxu0 %v5883_v24  ;;  %v5928_v24 = vld [vmem:[%s7464_s1 + $0x810] sm:$0xff]  }
  0xe0   :  { %5377 = vmatprep.subr.bf16.mxu0 %v5886_v26  ;;  %v5930_v26 = vld [vmem:[%s7464_s1 + $0x890] sm:$0xff]  }
  0xe1   :  { %5370 = vmatpush3.bf16.msra.mxu1 %v5885_v28  ;;  %v5932_v28 = vld [vmem:[%s7464_s1 + $0x818] sm:$0xff]  }
  0xe2   :  { %4049 = vmatmul.mubr.bf16.vlgmr.msra.gmra.mrb[24].mxu0 %v997_v25  ;;  %5399 = vmatprep.subr.bf16.mxu1 %v5888_v30  ;;  %v5929_v25 = vld [vmem:[%s7464_s1 + $0x8d0] sm:$0xff]   ;;  %v5934_v30 = vld [vmem:[%s7464_s1 + $0x898] sm:$0xff]  }
  0xe3   :  { %5378 = vmatpush3.bf16.msra.mxu0 %v5887_v31  ;;  %4128 = vmatprep.mubr.bf16.mxu0 %v1018_v29  ;;  %v5933_v29 = vld [vmem:[%s7464_s1 + $0x8d8] sm:$0xff]   ;;  %v5935_v31 = vld [vmem:[%s7464_s1 + $0x860] sm:$0xff]  }
  0xe4   :  { %4089 = vmatmul.mubr.bf16.vlgmr.msra.gmra.mrb[24].mxu1 %v1019_v32  ;;  %5379 = vmatprep.subr.bf16.mxu0 %v5890_v33  ;;  %v5936_v32 = vld [vmem:[%s7464_s1 + $0x820] sm:$0xff]  }
  0xe5   :  { %5400 = vmatpush3.bf16.msra.mxu1 %v5889_v34  ;;  %4168 = vmatprep.mubr.bf16.mxu1 %v1022_v35  ;;  %v5937_v33 = vld [vmem:[%s7464_s1 + $0x8e0] sm:$0xff]   ;;  %v5939_v35 = vld [vmem:[%s7464_s1 + $0x868] sm:$0xff]  }
  0xe6   :  { %5401 = vmatprep.subr.bf16.mxu1 %v5892_v36  ;;  %v5938_v34 = vld [vmem:[%s7464_s1 + $0x8a0] sm:$0xff]   ;;  %v5940_v36 = vld [vmem:[%s7464_s1 + $0x828] sm:$0xff]  }
  0xe7   :  { %5380 = vmatpush3.bf16.msra.mxu0 %v5891_v37  ;;  %v5941_v37 = vld [vmem:[%s7464_s1 + $0x8e8] sm:$0xff]  }
  0xe8   :  { %5381 = vmatprep.subr.bf16.mxu0 %v5894_v38  ;;  %v5942_v38 = vld [vmem:[%s7464_s1 + $0x8a8] sm:$0xff]  }
  0xe9   :  { %5402 = vmatpush3.bf16.msra.mxu1 %v5893_v39  ;;  %v5943_v39 = vld [vmem:[%s7464_s1 + $0x870] sm:$0xff]  }
  0xea   :  { %5403 = vmatprep.subr.bf16.mxu1 %v5896_v40 }
  0xeb   :  { %5382 = vmatpush3.bf16.msra.mxu0 %v5895_v42  ;;  %v5944_v42 = vld [vmem:[%s7464_s1 + $0x830] sm:$0xff]  }
  0xec   :  { %5383 = vmatprep.subr.bf16.mxu0 %v5898_v43  ;;  %v5945_v43 = vld [vmem:[%s7464_s1 + $0x8f0] sm:$0xff]  }
  0xed   :  { %5404 = vmatpush3.bf16.msra.mxu1 %v5897_v44 }
  0xee   :  { %5405 = vmatprep.subr.bf16.mxu1 %v5900_v46 }
  0xef   :  { %5384 = vmatpush3.bf16.msra.mxu0 %v5899_v45  ;;  %v26_v45 = vld [vmem:[%s7463_s0 + $0x20] sm:$0xff] }
  0xf0   :  { %5385 = vmatprep.subr.bf16.mxu0 %v5902_v48 }
  0xf1   :  { %5406 = vmatpush3.bf16.msra.mxu1 %v5901_v47 }
  0xf2   :  { %5407 = vmatprep.subr.bf16.mxu1 %v5904_v50  ;;  %v5947_v50 = vld [vmem:[%s7464_s1 + $0x878] sm:$0xff]  }
  0xf3   :  { %5386 = vmatpush3.bf16.msra.mxu0 %v5903_v49  ;;  %v5946_v49 = vld [vmem:[%s7464_s1 + $0x8b0] sm:$0xff]  }
  0xf4   :  { %5387 = vmatprep.subr.bf16.mxu0 %v5906_v52  ;;  %v1023_v52 = vcombine.high %v26_v45, %v26_v45 }
  0xf5   :  { %v5085_v58 = vpop.f32.mrb[0].mxu0  ;;  %5408 = vmatpush3.bf16.msra.mxu1 %v5905_v51  ;;  %v1030_v51 = vrot.slane %v26_v45, %v6230_v41 }
  0xf6   :  { %v5086_v60 = vpop.f32.mrb[1].mxu0  ;;  %5409 = vmatprep.subr.bf16.mxu1 %v5908_v54 }
  0xf7   :  { %v5087_v62 = vadd.f32 %v5086_v60, %v5085_v58  ;;  %v5088_v63 = vpop.f32.mrb[2].mxu0  ;;  %v5107_v0 = vpop.f32.mrb[0].mxu1  ;;  %5388 = vmatpush3.bf16.msra.mxu0 %v5907_v53  ;;  %v1038_v58 = vcombine.high %v1030_v51, %v1030_v51  ;;  %v5949_v60 = vld [vmem:[%s7464_s1 + $0x8f8] sm:$0xff]  }
  0xf8   :  { %v5089_v3 = vpop.f32.mrb[3].mxu0  ;;  %v5108_v4 = vpop.f32.mrb[1].mxu1  ;;  %5389 = vmatprep.subr.bf16.mxu0 %v5910_v57  ;;  %v5948_v57 = vld [vmem:[%s7464_s1 + $0x838] sm:$0xff]  }
  0xf9   :  { %v3571_v5 = vadd.f32 %v5087_v62, %v4666_v56  ;;  %v5109_v6 = vadd.f32 %v5108_v4, %v5107_v0  ;;  %5410 = vmatpush3.bf16.msra.mxu1 %v5909_v55  ;;  %v5110_v8 = vpop.f32.mrb[2].mxu1  ;;  %v7055_v62 = vrot.slane %v1023_v52, %v6230_v41  ;;  %v1060_v0 = vrot.slane %v1038_v58, %v6230_v41  ;;  %v5951_v3 = vld [vmem:[%s7464_s1 + $0x940] sm:$0xff]   ;;  %v5983_v52 = vld [vmem:[%s7464_s1 + $0x9b8] sm:$0xff]  }
  0xfa   :  { %5411 = vmatprep.subr.bf16.mxu1 %v5912_v61  ;;  %v5111_v10 = vpop.f32.mrb[3].mxu1 }
  0xfb   :  { %v6949_v11 = vadd.f32 %v5109_v6, %v3571_v5  ;;  %5390 = vmatpush3.bf16.msra.mxu0 %v5911_v59  ;;  %v1039_v4 = vcombine.high %v7055_v62, %v7055_v62  ;;  %v1070_v5 = vcombine.high %v1060_v0, %v1060_v0  ;;  %v5952_v6 = vld [vmem:[%s7464_s1 + $0x900] sm:$0xff]  }
  0xfc   :  { %5391 = vmatprep.subr.bf16.mxu0 %v5914_v2  ;;  %v1046_v2 = vrot.slane %v1030_v51, %v6230_v41 }
  0xfd   :  { %5412 = vmatpush3.bf16.msra.mxu1 %v5913_v1  ;;  %v5950_v1 = vld [vmem:[%s7464_s1 + $0x8b8] sm:$0xff]   ;;  %v1067_v8 = vrot.slane %v1039_v4, %v6230_v41 }
  0xfe   :  { %5413 = vmatprep.subr.bf16.mxu1 %v5916_v9  ;;  %v5954_v9 = vld [vmem:[%s7464_s1 + $0x980] sm:$0xff]   ;;  %v1068_v10 = vcombine.high %v1046_v2, %v1046_v2  ;;  %v5997_v4 = vld [vmem:[%s7464_s1 + $0xa18] sm:$0xff]  }
  0xff   :  { %5392 = vmatpush3.bf16.msra.mxu0 %v5915_v7  ;;  %v5953_v7 = vld [vmem:[%s7464_s1 + $0x9c0] sm:$0xff]  }
 0x100   :  { %5421 = vmatprep.subr.bf16.mxu0 %v5919_v14  ;;  %v5957_v14 = vld [vmem:[%s7464_s1 + $0x9c8] sm:$0xff]  }
 0x101   :  { %5414 = vmatpush3.bf16.msra.mxu1 %v5918_v12  ;;  %v5956_v12 = vld [vmem:[%s7464_s1 + $0x908] sm:$0xff]  }
 0x102   :  { %4129 = vmatmul.mubr.bf16.vlgmr.msra.gmra.mrb[28].mxu0 %v1004_v13  ;;  %5443 = vmatprep.subr.bf16.mxu1 %v5921_v16  ;;  %v1071_v13 = vcombine.high %v1067_v8, %v1067_v8  ;;  %v5959_v16 = vld [vmem:[%s7464_s1 + $0x950] sm:$0xff]  }
 0x103   :  { %5422 = vmatpush3.bf16.msra.mxu0 %v5920_v15  ;;  %4208 = vmatprep.mubr.bf16.mxu0 %v1060_v0  ;;  %v5958_v15 = vld [vmem:[%s7464_s1 + $0x988] sm:$0xff]   ;;  %v5993_v0 = vld [vmem:[%s7464_s1 + $0xa10] sm:$0xff]  }
 0x104   :  { %4169 = vmatmul.mubr.bf16.vlgmr.msra.gmra.mrb[28].mxu1 %v1020_v18  ;;  %5423 = vmatprep.subr.bf16.mxu0 %v5923_v19  ;;  %v5961_v18 = vld [vmem:[%s7464_s1 + $0x9d0] sm:$0xff]  }
 0x105   :  { %5444 = vmatpush3.bf16.msra.mxu1 %v5922_v17  ;;  %4248 = vmatprep.mubr.bf16.mxu1 %v1070_v5  ;;  %v5960_v17 = vld [vmem:[%s7464_s1 + $0x910] sm:$0xff]   ;;  %v5998_v5 = vld [vmem:[%s7464_s1 + $0xad8] sm:$0xff]  }
 0x106   :  { %5445 = vmatprep.subr.bf16.mxu1 %v5925_v21  ;;  %v5962_v19 = vld [vmem:[%s7464_s1 + $0x990] sm:$0xff]   ;;  %v5964_v21 = vld [vmem:[%s7464_s1 + $0x918] sm:$0xff]  }
 0x107   :  { %5424 = vmatpush3.bf16.msra.mxu0 %v5924_v20  ;;  %v5963_v20 = vld [vmem:[%s7464_s1 + $0x958] sm:$0xff]  }
 0x108   :  { %5425 = vmatprep.subr.bf16.mxu0 %v5927_v23  ;;  %v5966_v23 = vld [vmem:[%s7464_s1 + $0x998] sm:$0xff]  }
 0x109   :  { %5446 = vmatpush3.bf16.msra.mxu1 %v5926_v22  ;;  %v5965_v22 = vld [vmem:[%s7464_s1 + $0x9d8] sm:$0xff]  }
 0x10a   :  { %5447 = vmatprep.subr.bf16.mxu1 %v5929_v25  ;;  %v5968_v25 = vld [vmem:[%s7464_s1 + $0x920] sm:$0xff]  }
 0x10b   :  { %5426 = vmatpush3.bf16.msra.mxu0 %v5928_v24  ;;  %v5967_v24 = vld [vmem:[%s7464_s1 + $0x960] sm:$0xff]  }
 0x10c   :  { %5427 = vmatprep.subr.bf16.mxu0 %v5931_v27  ;;  %v5970_v27 = vld [vmem:[%s7464_s1 + $0x9a0] sm:$0xff]  }
 0x10d   :  { %5448 = vmatpush3.bf16.msra.mxu1 %v5930_v26  ;;  %v5969_v26 = vld [vmem:[%s7464_s1 + $0x9e0] sm:$0xff]  }
 0x10e   :  { %5449 = vmatprep.subr.bf16.mxu1 %v5933_v29  ;;  %v5972_v29 = vld [vmem:[%s7464_s1 + $0x928] sm:$0xff]  }
 0x10f   :  { %5428 = vmatpush3.bf16.msra.mxu0 %v5932_v28  ;;  %v5971_v28 = vld [vmem:[%s7464_s1 + $0x968] sm:$0xff]  }
 0x110   :  { %5429 = vmatprep.subr.bf16.mxu0 %v5935_v31  ;;  %v5974_v31 = vld [vmem:[%s7464_s1 + $0x9a8] sm:$0xff]  }
 0x111   :  { %5450 = vmatpush3.bf16.msra.mxu1 %v5934_v30  ;;  %v5973_v30 = vld [vmem:[%s7464_s1 + $0x9e8] sm:$0xff]  }
 0x112   :  { %5451 = vmatprep.subr.bf16.mxu1 %v5937_v33 }
 0x113   :  { %5430 = vmatpush3.bf16.msra.mxu0 %v5936_v32  ;;  %v5975_v32 = vld [vmem:[%s7464_s1 + $0x970] sm:$0xff]  }
 0x114   :  { %5431 = vmatprep.subr.bf16.mxu0 %v5939_v35 }
 0x115   :  { %v5129_v40 = vpop.f32.mrb[4].mxu0  ;;  %5452 = vmatpush3.bf16.msra.mxu1 %v5938_v34  ;;  %v5976_v34 = vld [vmem:[%s7464_s1 + $0x930] sm:$0xff]  }
 0x116   :  { %v5130_v44 = vpop.f32.mrb[5].mxu0  ;;  %5453 = vmatprep.subr.bf16.mxu1 %v5941_v37 }
 0x117   :  { %v5131_v46 = vadd.f32 %v5130_v44, %v5129_v40  ;;  %v5132_v47 = vpop.f32.mrb[6].mxu0  ;;  %v5151_v48 = vpop.f32.mrb[4].mxu1  ;;  %5432 = vmatpush3.bf16.msra.mxu0 %v5940_v36  ;;  %v5977_v36 = vld [vmem:[%s7464_s1 + $0x9f0] sm:$0xff]  }
 0x118   :  { %v5133_v53 = vpop.f32.mrb[7].mxu0  ;;  %v5152_v54 = vpop.f32.mrb[5].mxu1  ;;  %5433 = vmatprep.subr.bf16.mxu0 %v5943_v39  ;;  %v5978_v40 = vld [vmem:[%s7464_s1 + $0x9b0] sm:$0xff]   ;;  %v5980_v47 = vld [vmem:[%s7464_s1 + $0x938] sm:$0xff]  }
 0x119   :  { %v3651_v55 = vadd.f32 %v5131_v46, %v6949_v11  ;;  %v5153_v56 = vadd.f32 %v5152_v54, %v5151_v48  ;;  %5454 = vmatpush3.bf16.msra.mxu1 %v5942_v38  ;;  %v5154_v59 = vpop.f32.mrb[6].mxu1  ;;  %v5955_v11 = vld [vmem:[%s7464_s1 + $0x948] sm:$0xff]   ;;  %v1053_v53 = vrot.slane %v7055_v62, %v6230_v41  ;;  %v5984_v54 = vld [vmem:[%s7464_s1 + $0xa40] sm:$0xff]  }
 0x11a   :  { %5455 = vmatprep.subr.bf16.mxu1 %v5945_v43  ;;  %v5155_v61 = vpop.f32.mrb[7].mxu1  ;;  %v5988_v59 = vld [vmem:[%s7464_s1 + $0xa48] sm:$0xff]  }
 0x11b   :  { %v7057_v63 = vadd.f32 %v5153_v56, %v3651_v55  ;;  %5434 = vmatpush3.bf16.msra.mxu0 %v5944_v42  ;;  %v5979_v42 = vld [vmem:[%s7464_s1 + $0x978] sm:$0xff]   ;;  %v5985_v55 = vld [vmem:[%s7464_s1 + $0xa00] sm:$0xff]   ;;  %v1069_v58 = vcombine.high %v1053_v53, %v1053_v53  ;;  %v5990_v61 = vld [vmem:[%s7464_s1 + $0xac8] sm:$0xff]  }
 0x11c   :  { %5435 = vmatprep.subr.bf16.mxu0 %v5947_v50  ;;  %v5986_v56 = vld [vmem:[%s7464_s1 + $0xac0] sm:$0xff]   ;;  %v5991_v62 = vld [vmem:[%s7464_s1 + $0xa88] sm:$0xff]  }
 0x11d   :  { %5456 = vmatpush3.bf16.msra.mxu1 %v5946_v49  ;;  %v5981_v49 = vld [vmem:[%s7464_s1 + $0x9f8] sm:$0xff]  }
 0x11e   :  { %5457 = vmatprep.subr.bf16.mxu1 %v5949_v60  ;;  %v5989_v60 = vld [vmem:[%s7464_s1 + $0xa08] sm:$0xff]  }
 0x11f   :  { %5436 = vmatpush3.bf16.msra.mxu0 %v5948_v57  ;;  %v5987_v57 = vld [vmem:[%s7464_s1 + $0xa80] sm:$0xff]  }
 0x120   :  { %5465 = vmatprep.subr.bf16.mxu0 %v5951_v3  ;;  %v5996_v3 = vld [vmem:[%s7464_s1 + $0xa58] sm:$0xff]  }
 0x121   :  { %5458 = vmatpush3.bf16.msra.mxu1 %v5950_v1  ;;  %v5994_v1 = vld [vmem:[%s7464_s1 + $0xad0] sm:$0xff]  }
 0x122   :  { %4209 = vmatmul.mubr.bf16.vlgmr.msra.gmra.mrb[32].mxu0 %v1046_v2  ;;  %5487 = vmatprep.subr.bf16.mxu1 %v5953_v7  ;;  %v5995_v2 = vld [vmem:[%s7464_s1 + $0xa90] sm:$0xff]   ;;  %v6000_v7 = vld [vmem:[%s7464_s1 + $0xa60] sm:$0xff]  }
 0x123   :  { %5466 = vmatpush3.bf16.msra.mxu0 %v5952_v6  ;;  %4288 = vmatprep.mubr.bf16.mxu0 %v1067_v8  ;;  %v5999_v6 = vld [vmem:[%s7464_s1 + $0xa98] sm:$0xff]   ;;  %v6001_v8 = vld [vmem:[%s7464_s1 + $0xa20] sm:$0xff]  }
 0x124   :  { %4249 = vmatmul.mubr.bf16.vlgmr.msra.gmra.mrb[32].mxu1 %v1068_v10  ;;  %5467 = vmatprep.subr.bf16.mxu0 %v5955_v11  ;;  %v6003_v10 = vld [vmem:[%s7464_s1 + $0xaa0] sm:$0xff]   ;;  %v6004_v11 = vld [vmem:[%s7464_s1 + $0xa68] sm:$0xff]  }
 0x125   :  { %5488 = vmatpush3.bf16.msra.mxu1 %v5954_v9  ;;  %4328 = vmatprep.mubr.bf16.mxu1 %v1071_v13  ;;  %v6002_v9 = vld [vmem:[%s7464_s1 + $0xae0] sm:$0xff]   ;;  %v6006_v13 = vld [vmem:[%s7464_s1 + $0xae8] sm:$0xff]  }
 0x126   :  { %5489 = vmatprep.subr.bf16.mxu1 %v5957_v14  ;;  %v6007_v14 = vld [vmem:[%s7464_s1 + $0xaa8] sm:$0xff]  }
 0x127   :  { %5468 = vmatpush3.bf16.msra.mxu0 %v5956_v12  ;;  %v6005_v12 = vld [vmem:[%s7464_s1 + $0xa28] sm:$0xff]  }
 0x128   :  { %5469 = vmatprep.subr.bf16.mxu0 %v5959_v16 }
 0x129   :  { %5490 = vmatpush3.bf16.msra.mxu1 %v5958_v15  ;;  %v6008_v15 = vld [vmem:[%s7464_s1 + $0xa70] sm:$0xff]  }
 0x12a   :  { %5491 = vmatprep.subr.bf16.mxu1 %v5961_v18 }
 0x12b   :  { %5470 = vmatpush3.bf16.msra.mxu0 %v5960_v17  ;;  %v6009_v17 = vld [vmem:[%s7464_s1 + $0xa30] sm:$0xff]  }
 0x12c   :  { %5471 = vmatprep.subr.bf16.mxu0 %v5963_v20 }
 0x12d   :  { %5492 = vmatpush3.bf16.msra.mxu1 %v5962_v19  ;;  %v6010_v19 = vld [vmem:[%s7464_s1 + $0xaf0] sm:$0xff]  }
 0x12e   :  { %5493 = vmatprep.subr.bf16.mxu1 %v5965_v22 }
 0x12f   :  { %5472 = vmatpush3.bf16.msra.mxu0 %v5964_v21 }
 0x130   :  { %5473 = vmatprep.subr.bf16.mxu0 %v5967_v24  ;;  %v27_v24 = vld [vmem:[%s7463_s0 + $0x28] sm:$0xff] }
 0x131   :  { %5494 = vmatpush3.bf16.msra.mxu1 %v5966_v23  ;;  %v6012_v23 = vld [vmem:[%s7464_s1 + $0xa78] sm:$0xff]  }
 0x132   :  { %5495 = vmatprep.subr.bf16.mxu1 %v5969_v26 }
 0x133   :  { %5474 = vmatpush3.bf16.msra.mxu0 %v5968_v25 }
 0x134   :  { %5475 = vmatprep.subr.bf16.mxu0 %v5971_v28  ;;  %v1072_v28 = vcombine.high %v27_v24, %v27_v24 }
 0x135   :  { %v5173_v33 = vpop.f32.mrb[8].mxu0  ;;  %5496 = vmatpush3.bf16.msra.mxu1 %v5970_v27  ;;  %v1079_v27 = vrot.slane %v27_v24, %v6230_v41 }
 0x136   :  { %v5174_v35 = vpop.f32.mrb[9].mxu0  ;;  %5497 = vmatprep.subr.bf16.mxu1 %v5973_v30 }
 0x137   :  { %v5175_v37 = vadd.f32 %v5174_v35, %v5173_v33  ;;  %v5176_v38 = vpop.f32.mrb[10].mxu0  ;;  %v5195_v39 = vpop.f32.mrb[8].mxu1  ;;  %5476 = vmatpush3.bf16.msra.mxu0 %v5972_v29  ;;  %v6014_v33 = vld [vmem:[%s7464_s1 + $0xaf8] sm:$0xff]  }
 0x138   :  { %v5177_v43 = vpop.f32.mrb[11].mxu0  ;;  %v5196_v44 = vpop.f32.mrb[9].mxu1  ;;  %5477 = vmatprep.subr.bf16.mxu0 %v5975_v32  ;;  %v6013_v38 = vld [vmem:[%s7464_s1 + $0xa38] sm:$0xff]  }
 0x139   :  { %v3731_v45 = vadd.f32 %v5175_v37, %v7057_v63  ;;  %v5197_v46 = vadd.f32 %v5196_v44, %v5195_v39  ;;  %5498 = vmatpush3.bf16.msra.mxu1 %v5974_v31  ;;  %v5198_v48 = vpop.f32.mrb[10].mxu1  ;;  %v5992_v63 = vld [vmem:[%s7464_s1 + $0xa50] sm:$0xff]   ;;  %v6015_v44 = vld [vmem:[%s7464_s1 + $0xab8] sm:$0xff]  }
 0x13a   :  { %5499 = vmatprep.subr.bf16.mxu1 %v5977_v36  ;;  %v5199_v50 = vpop.f32.mrb[11].mxu1  ;;  %v6011_v31 = vld [vmem:[%s7464_s1 + $0xab0] sm:$0xff]   ;;  %v7264_v36 = vrot.slane %v1072_v28, %v6230_v41  ;;  %v6017_v48 = vld [vmem:[%s7464_s1 + $0xb00] sm:$0xff]   ;;  %v6048_v28 = vld [vmem:[%s7464_s1 + $0xbb8] sm:$0xff]  }
 0x13b   :  { %v7161_v51 = vadd.f32 %v5197_v46, %v3731_v45  ;;  %5478 = vmatpush3.bf16.msra.mxu0 %v5976_v34  ;;  %v1087_v34 = vcombine.high %v1079_v27, %v1079_v27  ;;  %v6018_v46 = vld [vmem:[%s7464_s1 + $0xbc0] sm:$0xff]   ;;  %v6020_v50 = vld [vmem:[%s7464_s1 + $0xb48] sm:$0xff]  }
 0x13c   :  { %5479 = vmatprep.subr.bf16.mxu0 %v5979_v42  ;;  %v6016_v42 = vld [vmem:[%s7464_s1 + $0xb40] sm:$0xff]   ;;  %v1088_v43 = vcombine.high %v7264_v36, %v7264_v36 }
 0x13d   :  { %5500 = vmatpush3.bf16.msra.mxu1 %v5978_v40  ;;  %v1109_v39 = vrot.slane %v1087_v34, %v6230_v41  ;;  %v1095_v40 = vrot.slane %v1079_v27, %v6230_v41  ;;  %v1102_v27 = vrot.slane %v7264_v36, %v6230_v41 }
 0x13e   :  { %5501 = vmatprep.subr.bf16.mxu1 %v5981_v49 }
 0x13f   :  { %5480 = vmatpush3.bf16.msra.mxu0 %v5980_v47  ;;  %v1119_v45 = vcombine.high %v1109_v39, %v1109_v39  ;;  %v1116_v47 = vrot.slane %v1088_v43, %v6230_v41  ;;  %v1117_v49 = vcombine.high %v1095_v40, %v1095_v40 }
 0x140   :  { %5509 = vmatprep.subr.bf16.mxu0 %v5984_v54  ;;  %v6021_v54 = vld [vmem:[%s7464_s1 + $0xb08] sm:$0xff]  }
 0x141   :  { %5502 = vmatpush3.bf16.msra.mxu1 %v5983_v52  ;;  %v1120_v52 = vcombine.high %v1116_v47, %v1116_v47 }
 0x142   :  { %4289 = vmatmul.mubr.bf16.vlgmr.msra.gmra.mrb[36].mxu0 %v1053_v53  ;;  %5531 = vmatprep.subr.bf16.mxu1 %v5986_v56  ;;  %v6022_v53 = vld [vmem:[%s7464_s1 + $0xbc8] sm:$0xff]  }
 0x143   :  { %5510 = vmatpush3.bf16.msra.mxu0 %v5985_v55  ;;  %4368 = vmatprep.mubr.bf16.mxu0 %v1109_v39  ;;  %v6024_v55 = vld [vmem:[%s7464_s1 + $0xb50] sm:$0xff]   ;;  %v6023_v56 = vld [vmem:[%s7464_s1 + $0xb88] sm:$0xff]  }
 0x144   :  { %4329 = vmatmul.mubr.bf16.vlgmr.msra.gmra.mrb[36].mxu1 %v1069_v58  ;;  %5511 = vmatprep.subr.bf16.mxu0 %v5988_v59  ;;  %v6025_v58 = vld [vmem:[%s7464_s1 + $0xb10] sm:$0xff]   ;;  %v6028_v59 = vld [vmem:[%s7464_s1 + $0xb58] sm:$0xff]  }
 0x145   :  { %5532 = vmatpush3.bf16.msra.mxu1 %v5987_v57  ;;  %4408 = vmatprep.mubr.bf16.mxu1 %v1119_v45  ;;  %v6026_v57 = vld [vmem:[%s7464_s1 + $0xbd0] sm:$0xff]  }
 0x146   :  { %5533 = vmatprep.subr.bf16.mxu1 %v5990_v61  ;;  %v6030_v61 = vld [vmem:[%s7464_s1 + $0xbd8] sm:$0xff]  }
 0x147   :  { %5512 = vmatpush3.bf16.msra.mxu0 %v5989_v60  ;;  %v6027_v60 = vld [vmem:[%s7464_s1 + $0xb90] sm:$0xff]  }
 0x148   :  { %5513 = vmatprep.subr.bf16.mxu0 %v5992_v63  ;;  %v6032_v63 = vld [vmem:[%s7464_s1 + $0xb60] sm:$0xff]  }
 0x149   :  { %5534 = vmatpush3.bf16.msra.mxu1 %v5991_v62  ;;  %v6029_v62 = vld [vmem:[%s7464_s1 + $0xb18] sm:$0xff]  }
 0x14a   :  { %5535 = vmatprep.subr.bf16.mxu1 %v5994_v1  ;;  %v6034_v1 = vld [vmem:[%s7464_s1 + $0xbe0] sm:$0xff]  }
 0x14b   :  { %5514 = vmatpush3.bf16.msra.mxu0 %v5993_v0  ;;  %v6031_v0 = vld [vmem:[%s7464_s1 + $0xb98] sm:$0xff]  }
 0x14c   :  { %5515 = vmatprep.subr.bf16.mxu0 %v5996_v3  ;;  %v6036_v3 = vld [vmem:[%s7464_s1 + $0xb68] sm:$0xff]  }
 0x14d   :  { %5536 = vmatpush3.bf16.msra.mxu1 %v5995_v2  ;;  %v6033_v2 = vld [vmem:[%s7464_s1 + $0xb20] sm:$0xff]  }
 0x14e   :  { %5537 = vmatprep.subr.bf16.mxu1 %v5998_v5  ;;  %v6038_v5 = vld [vmem:[%s7464_s1 + $0xbe8] sm:$0xff]  }
 0x14f   :  { %5516 = vmatpush3.bf16.msra.mxu0 %v5997_v4  ;;  %v6035_v4 = vld [vmem:[%s7464_s1 + $0xba0] sm:$0xff]  }
 0x150   :  { %5517 = vmatprep.subr.bf16.mxu0 %v6000_v7  ;;  %v6040_v7 = vld [vmem:[%s7464_s1 + $0xb70] sm:$0xff]  }
 0x151   :  { %5538 = vmatpush3.bf16.msra.mxu1 %v5999_v6  ;;  %v6037_v6 = vld [vmem:[%s7464_s1 + $0xb28] sm:$0xff]  }
 0x152   :  { %5539 = vmatprep.subr.bf16.mxu1 %v6002_v9  ;;  %v6039_v9 = vld [vmem:[%s7464_s1 + $0xba8] sm:$0xff]  }
 0x153   :  { %5518 = vmatpush3.bf16.msra.mxu0 %v6001_v8 }
 0x154   :  { %5519 = vmatprep.subr.bf16.mxu0 %v6004_v11  ;;  %v6042_v11 = vld [vmem:[%s7464_s1 + $0xbf0] sm:$0xff]  }
 0x155   :  { %v5217_v16 = vpop.f32.mrb[12].mxu0  ;;  %5540 = vmatpush3.bf16.msra.mxu1 %v6003_v10 }
 0x156   :  { %v5218_v18 = vpop.f32.mrb[13].mxu0  ;;  %5541 = vmatprep.subr.bf16.mxu1 %v6006_v13 }
 0x157   :  { %v5219_v20 = vadd.f32 %v5218_v18, %v5217_v16  ;;  %v5220_v21 = vpop.f32.mrb[14].mxu0  ;;  %v5239_v22 = vpop.f32.mrb[12].mxu1  ;;  %5520 = vmatpush3.bf16.msra.mxu0 %v6005_v12  ;;  %v6044_v16 = vld [vmem:[%s7464_s1 + $0xb78] sm:$0xff]  }
 0x158   :  { %v5221_v25 = vpop.f32.mrb[15].mxu0  ;;  %v5240_v26 = vpop.f32.mrb[13].mxu1  ;;  %5521 = vmatprep.subr.bf16.mxu0 %v6008_v15  ;;  %v6041_v15 = vld [vmem:[%s7464_s1 + $0xb30] sm:$0xff]  }
 0x159   :  { %v3811_v29 = vadd.f32 %v5219_v20, %v7161_v51  ;;  %v5241_v30 = vadd.f32 %v5240_v26, %v5239_v22  ;;  %5542 = vmatpush3.bf16.msra.mxu1 %v6007_v14  ;;  %v5242_v32 = vpop.f32.mrb[14].mxu1  ;;  %v6019_v51 = vld [vmem:[%s7464_s1 + $0xb80] sm:$0xff]   ;;  %v6043_v21 = vld [vmem:[%s7464_s1 + $0xbb0] sm:$0xff]   ;;  %v6045_v26 = vld [vmem:[%s7464_s1 + $0xb38] sm:$0xff]  }
 0x15a   :  { %5543 = vmatprep.subr.bf16.mxu1 %v6010_v19  ;;  %v5243_v35 = vpop.f32.mrb[15].mxu1  ;;  %v6050_v32 = vld [vmem:[%s7464_s1 + $0xc08] sm:$0xff]  }
 0x15b   :  { %v7266_v37 = vadd.f32 %v5241_v30, %v3811_v29  ;;  %5522 = vmatpush3.bf16.msra.mxu0 %v6009_v17  ;;  %v6049_v29 = vld [vmem:[%s7464_s1 + $0xc00] sm:$0xff]   ;;  %v6092_v30 = vmov 0.0  }
 0x15c   :  { %5523 = vmatprep.subr.bf16.mxu0 %v6012_v23  ;;  %v6046_v23 = vld [vmem:[%s7464_s1 + $0xbf8] sm:$0xff]  }
 0x15d   :  { %5544 = vmatpush3.bf16.msra.mxu1 %v6011_v31  ;;  %v1118_v31 = vcombine.high %v1102_v27, %v1102_v27 }
 0x15e   :  { %5545 = vmatprep.subr.bf16.mxu1 %v6014_v33  ;;  %v6051_v33 = vld [vmem:[%s7464_s1 + $0xc10] sm:$0xff]  }
 0x15f   :  { %5524 = vmatpush3.bf16.msra.mxu0 %v6013_v38 }
 0x160   :  { %5553 = vmatprep.subr.bf16.mxu0 %v6016_v42 }
 0x161   :  { %5546 = vmatpush3.bf16.msra.mxu1 %v6015_v44 }
 0x162   :  { %4369 = vmatmul.mubr.bf16.vlgmr.msra.gmra.mrb[40].mxu0 %v1095_v40  ;;  %5575 = vmatprep.subr.bf16.mxu1 %v6018_v46 }
 0x163   :  { %5554 = vmatpush3.bf16.msra.mxu0 %v6017_v48  ;;  %4448 = vmatprep.mubr.bf16.mxu0 %v1116_v47 }
 0x164   :  { %4409 = vmatmul.mubr.bf16.vlgmr.msra.gmra.mrb[40].mxu1 %v1117_v49  ;;  %5555 = vmatprep.subr.bf16.mxu0 %v6020_v50 }
 0x165   :  { %5576 = vmatpush3.bf16.msra.mxu1 %v6019_v51  ;;  %4488 = vmatprep.mubr.bf16.mxu1 %v1120_v52 }
 0x166   :  { %5577 = vmatprep.subr.bf16.mxu1 %v6022_v53 }
 0x167   :  { %5556 = vmatpush3.bf16.msra.mxu0 %v6021_v54 }
 0x168   :  { %5557 = vmatprep.subr.bf16.mxu0 %v6024_v55 }
 0x169   :  { %5578 = vmatpush3.bf16.msra.mxu1 %v6023_v56 }
 0x16a   :  { %5579 = vmatprep.subr.bf16.mxu1 %v6026_v57 }
 0x16b   :  { %5558 = vmatpush3.bf16.msra.mxu0 %v6025_v58 }
 0x16c   :  { %5559 = vmatprep.subr.bf16.mxu0 %v6028_v59 }
 0x16d   :  { %5580 = vmatpush3.bf16.msra.mxu1 %v6027_v60 }
 0x16e   :  { %5581 = vmatprep.subr.bf16.mxu1 %v6030_v61 }
 0x16f   :  { %5560 = vmatpush3.bf16.msra.mxu0 %v6029_v62 }
 0x170   :  { %5561 = vmatprep.subr.bf16.mxu0 %v6032_v63 }
 0x171   :  { %5582 = vmatpush3.bf16.msra.mxu1 %v6031_v0 }
 0x172   :  { %5583 = vmatprep.subr.bf16.mxu1 %v6034_v1 }
 0x173   :  { %5562 = vmatpush3.bf16.msra.mxu0 %v6033_v2 }
 0x174   :  { %5563 = vmatprep.subr.bf16.mxu0 %v6036_v3 }
 0x175   :  { %v5261_v8 = vpop.f32.mrb[16].mxu0  ;;  %5584 = vmatpush3.bf16.msra.mxu1 %v6035_v4 }
 0x176   :  { %v5262_v10 = vpop.f32.mrb[17].mxu0  ;;  %5585 = vmatprep.subr.bf16.mxu1 %v6038_v5 }
 0x177   :  { %v5263_v12 = vadd.f32 %v5262_v10, %v5261_v8  ;;  %v5264_v13 = vpop.f32.mrb[18].mxu0  ;;  %v5283_v14 = vpop.f32.mrb[16].mxu1  ;;  %5564 = vmatpush3.bf16.msra.mxu0 %v6037_v6 }
 0x178   :  { %v5265_v17 = vpop.f32.mrb[19].mxu0  ;;  %v5284_v18 = vpop.f32.mrb[17].mxu1  ;;  %5565 = vmatprep.subr.bf16.mxu0 %v6040_v7 }
 0x179   :  { %v3891_v19 = vadd.f32 %v5263_v12, %v7266_v37  ;;  %v5285_v20 = vadd.f32 %v5284_v18, %v5283_v14  ;;  %5586 = vmatpush3.bf16.msra.mxu1 %v6039_v9  ;;  %v5286_v22 = vpop.f32.mrb[18].mxu1 }
 0x17a   :  { %5587 = vmatprep.subr.bf16.mxu1 %v6042_v11  ;;  %v5287_v24 = vpop.f32.mrb[19].mxu1 }
 0x17b   :  { %v3931_v25 = vadd.f32 %v5285_v20, %v3891_v19  ;;  %5566 = vmatpush3.bf16.msra.mxu0 %v6041_v15 }
 0x17c   :  { %5567 = vmatprep.subr.bf16.mxu0 %v6044_v16 }
 0x17d   :  { %5588 = vmatpush3.bf16.msra.mxu1 %v6043_v21 }
 0x17e   :  { %5589 = vmatprep.subr.bf16.mxu1 %v6046_v23 }
 0x17f   :  { %5568 = vmatpush3.bf16.msra.mxu0 %v6045_v26 }
 0x180   :  { %5615 = vmatprep.subr.bf16.mxu0 %v6092_v30 }
 0x181   :  { %5590 = vmatpush3.bf16.msra.mxu1 %v6048_v28 }
 0x182   :  { %4449 = vmatmul.mubr.bf16.vlgmr.msra.gmra.mrb[44].mxu0 %v1102_v27  ;;  %5635 = vmatprep.subr.bf16.mxu1 %v6092_v30 }
 0x183   :  { %5616 = vmatpush3.bf16.msra.mxu0 %v6049_v29  ;;  %5631 = vmatprep.mubr.msk.bf16.mxu0 %vm6093_vm0, %v6092_v30 }
 0x184   :  { %4489 = vmatmul.mubr.bf16.vlgmr.msra.gmra.mrb[44].mxu1 %v1118_v31  ;;  %5617 = vmatprep.subr.bf16.mxu0 %v6092_v30 }
 0x185   :  { %5651 = vmatprep.mubr.msk.bf16.mxu1 %vm6093_vm0, %v6092_v30 }
 0x187   :  { %5618 = vmatpush3.bf16.msra.mxu0 %v6050_v32 }
 0x188   :  { %10 = vsyncpa [#allocation3], 0  ;;  %5619 = vmatprep.subr.bf16.mxu0 %v6092_v30  ;;  %v6052_v34 = vld [vmem:[%s7464_s1 + $0xc18] sm:$0xff]   ;;  %v6053_v35 = vld [vmem:[%s7464_s1 + $0xc20] sm:$0xff]   ;;  %s6094_s21 = smov [#allocation2]   ;;  %vm4650_vm1 = vcmask 25600  }
 0x189   :  { %v6054_v36 = vld [vmem:[%s7464_s1 + $0xc28] sm:$0xff]   ;;  %v6055_v43 = vld [vmem:[%s7464_s1 + $0xc30] sm:$0xff]   ;;  %v6056_v51 = vld [vmem:[%s7464_s1 + $0xc38] sm:$0xff]   ;;  %s4658_s22 = sshll.u32 %s6094_s21, 4  ;;  %s4659_s22 = int_to_ptr.vmem [resolvable:$true] %s4658_s22 }
 0x18a   :  { %v4667_v52 = vld.sshfl [vmem:[%s7463_s0 + $0x30] sm:$0x1 pattern:$0x75316420]  ;;  %v6057_v11 = vld [vmem:[%s7466_s3] sm:$0xff]   ;;  %v6058_v14 = vld [vmem:[%s7466_s3 + $0x8] sm:$0xff]   ;;  %p6072_p1 = scmp.lt.s32.totalorder %s4659_s22, %s4659_s22 }
 0x18b   :  { %5620 = vmatpush3.bf16.msra.mxu0 %v6051_v33  ;;  %v1134_v53 = vrot.slane %v4667_v52, %v6230_v41  ;;  %5636 = vmatpush3.bf16.msra.mxu1 %v6057_v11  ;;  %v6059_v15 = vld [vmem:[%s7466_s3 + $0x10] sm:$0xff]   ;;  %v6060_v16 = vld [vmem:[%s7466_s3 + $0x18] sm:$0xff]   ;;  %v6061_v17 = vld [vmem:[%s7466_s3 + $0x20] sm:$0xff]   ;;  %s6067_s23 = scalar_lea.vmem %s4659_s22, 32 }
 0x18c   :  { %5621 = vmatprep.subr.bf16.mxu0 %v6092_v30  ;;  %5637 = vmatprep.subr.bf16.mxu1 %v6092_v30  ;;  %v6062_v18 = vld [vmem:[%s7466_s3 + $0x28] sm:$0xff]   ;;  %v6063_v19 = vld [vmem:[%s7466_s3 + $0x30] sm:$0xff]   ;;  %p6068_p0 = scmp.ne.s32.totalorder %s4659_s22, %s6067_s23  ;;  %p6073_p2 = scmp.lt.s32.totalorder %s6067_s23, %s6067_s23 }
 0x18e   :  { %p6074_p3 = por %p6073_p2, %p6072_p1 }
 0x18f   :  { %5622 = vmatpush3.bf16.msra.mxu0 %v6052_v34  ;;  %5638 = vmatpush3.bf16.msra.mxu1 %v6058_v14 }
 0x190   :  { %5623 = vmatprep.subr.bf16.mxu0 %v6092_v30  ;;  %5639 = vmatprep.subr.bf16.mxu1 %v6092_v30  ;;  %p6075_p4 = pnand %p6074_p3, %p6068_p0 }
 0x193   :  { %5624 = vmatpush3.bf16.msra.mxu0 %v6053_v35  ;;  %5640 = vmatpush3.bf16.msra.mxu1 %v6059_v15 }
 0x194   :  { %5625 = vmatprep.subr.bf16.mxu0 %v6092_v30  ;;  %5641 = vmatprep.subr.bf16.mxu1 %v6092_v30 }
 0x195   :  { %v5305_v37 = vpop.f32.mrb[20].mxu0 }
 0x196   :  { %v5306_v38 = vpop.f32.mrb[21].mxu0 }
 0x197   :  { %v5307_v39 = vadd.f32 %v5306_v38, %v5305_v37  ;;  %v5308_v40 = vpop.f32.mrb[22].mxu0  ;;  %v5327_v42 = vpop.f32.mrb[20].mxu1  ;;  %5626 = vmatpush3.bf16.msra.mxu0 %v6054_v36  ;;  %5642 = vmatpush3.bf16.msra.mxu1 %v6060_v16 }
 0x198   :  { %v5309_v44 = vpop.f32.mrb[23].mxu0  ;;  %v5328_v45 = vpop.f32.mrb[21].mxu1  ;;  %5627 = vmatprep.subr.bf16.mxu0 %v6092_v30  ;;  %5643 = vmatprep.subr.bf16.mxu1 %v6092_v30 }
 0x199   :  { %v3971_v46 = vadd.f32 %v5307_v39, %v3931_v25  ;;  %v5329_v47 = vadd.f32 %v5328_v45, %v5327_v42  ;;  %v5330_v48 = vpop.f32.mrb[22].mxu1  ;;  %v6064_v25 = vld [vmem:[%s7466_s3 + $0x38] sm:$0xff]  }
 0x19a   :  { %v5331_v49 = vpop.f32.mrb[23].mxu1 }
 0x19b   :  { %v4011_v50 = vadd.f32 %v5329_v47, %v3971_v46  ;;  %5628 = vmatpush3.bf16.msra.mxu0 %v6055_v43  ;;  %5644 = vmatpush3.bf16.msra.mxu1 %v6061_v17 }
 0x19c   :  { %5629 = vmatprep.subr.bf16.mxu0 %v6092_v30  ;;  %5645 = vmatprep.subr.bf16.mxu1 %v6092_v30 }
 0x19f   :  { %5630 = vmatpush3.bf16.msra.mxu0 %v6056_v51  ;;  %5646 = vmatpush3.bf16.msra.mxu1 %v6062_v18 }
 0x1a0   :  { %5647 = vmatprep.subr.bf16.mxu1 %v6092_v30 }
 0x1a2   :  { %5632 = vmatmul.mubr.bf16.vlgmr.msra.gmra.mrb[48].mxu0 %v1134_v53 }
 0x1a3   :  { %5648 = vmatpush3.bf16.msra.mxu1 %v6063_v19 }
 0x1a4   :  { %5649 = vmatprep.subr.bf16.mxu1 %v6092_v30 }
 0x1a7   :  { %5650 = vmatpush3.bf16.msra.mxu1 %v6064_v25 }
 0x1b5   :  { %v5349_v54 = vpop.f32.mrb[24].mxu0 }
 0x1b6   :  { %v5350_v55 = vpop.f32.mrb[25].mxu0 }
 0x1b7   :  { %v5351_v56 = vadd.f32 %v5350_v55, %v5349_v54  ;;  %v5352_v57 = vpop.f32.mrb[26].mxu0  ;;  %v5371_v58 = vpop.f32.mrb[24].mxu1 }
 0x1b8   :  { %v5353_v59 = vpop.f32.mrb[27].mxu0  ;;  %v5372_v60 = vpop.f32.mrb[25].mxu1 }
 0x1b9   :  { %v4051_v61 = vadd.f32 %v5351_v56, %v4011_v50  ;;  %v5373_v62 = vadd.f32 %v5372_v60, %v5371_v58  ;;  %v5374_v63 = vpop.f32.mrb[26].mxu1 }
 0x1ba   :  { %v5375_v0 = vpop.f32.mrb[27].mxu1 }
 0x1bb   :  { %v4091_v1 = vadd.f32 %v5373_v62, %v4051_v61 }
 0x1d5   :  { %v5393_v2 = vpop.f32.mrb[28].mxu0 }
 0x1d6   :  { %v5394_v3 = vpop.f32.mrb[29].mxu0 }
 0x1d7   :  { %v5395_v4 = vadd.f32 %v5394_v3, %v5393_v2  ;;  %v5396_v5 = vpop.f32.mrb[30].mxu0  ;;  %v5415_v6 = vpop.f32.mrb[28].mxu1 }
 0x1d8   :  { %v5397_v41 = vpop.f32.mrb[31].mxu0  ;;  %v5416_v7 = vpop.f32.mrb[29].mxu1 }
 0x1d9   :  { %v4131_v8 = vadd.f32 %v5395_v4, %v4091_v1  ;;  %v5417_v9 = vadd.f32 %v5416_v7, %v5415_v6  ;;  %v5418_v10 = vpop.f32.mrb[30].mxu1 }
 0x1da   :  { %v5419_v12 = vpop.f32.mrb[31].mxu1 }
 0x1db   :  { %v4171_v13 = vadd.f32 %v5417_v9, %v4131_v8  ;;  %v5060_v12 = vld [vmem:[%s7467_s4] ss:$0 sm:$0xff] }
 0x1f5   :  { %v5437_v20 = vpop.f32.mrb[32].mxu0 }
 0x1f6   :  { %v5438_v21 = vpop.f32.mrb[33].mxu0 }
 0x1f7   :  { %v5439_v22 = vadd.f32 %v5438_v21, %v5437_v20  ;;  %v5440_v23 = vpop.f32.mrb[34].mxu0  ;;  %v5459_v24 = vpop.f32.mrb[32].mxu1 }
 0x1f8   :  { %v5441_v26 = vpop.f32.mrb[35].mxu0  ;;  %v5460_v27 = vpop.f32.mrb[33].mxu1 }
 0x1f9   :  { %v4211_v28 = vadd.f32 %v5439_v22, %v4171_v13  ;;  %v5461_v29 = vadd.f32 %v5460_v27, %v5459_v24  ;;  %v5462_v31 = vpop.f32.mrb[34].mxu1 }
 0x1fa   :  { %v5463_v32 = vpop.f32.mrb[35].mxu1 }
 0x1fb   :  { %v4251_v33 = vadd.f32 %v5461_v29, %v4211_v28 }
 0x215   :  { %v5481_v34 = vpop.f32.mrb[36].mxu0 }
 0x216   :  { %v5482_v35 = vpop.f32.mrb[37].mxu0 }
 0x217   :  { %v5483_v36 = vadd.f32 %v5482_v35, %v5481_v34  ;;  %v5484_v37 = vpop.f32.mrb[38].mxu0  ;;  %v5503_v30 = vpop.f32.mrb[36].mxu1 }
 0x218   :  { %v5485_v38 = vpop.f32.mrb[39].mxu0  ;;  %v5504_v39 = vpop.f32.mrb[37].mxu1 }
 0x219   :  { %v4291_v40 = vadd.f32 %v5483_v36, %v4251_v33  ;;  %v5505_v42 = vadd.f32 %v5504_v39, %v5503_v30  ;;  %v5506_v43 = vpop.f32.mrb[38].mxu1 }
 0x21a   :  { %v5507_v44 = vpop.f32.mrb[39].mxu1 }
 0x21b   :  { %v4331_v45 = vadd.f32 %v5505_v42, %v4291_v40 }
 0x235   :  { %v5525_v46 = vpop.f32.mrb[40].mxu0 }
 0x236   :  { %v5526_v47 = vpop.f32.mrb[41].mxu0 }
 0x237   :  { %v5527_v48 = vadd.f32 %v5526_v47, %v5525_v46  ;;  %v5528_v49 = vpop.f32.mrb[42].mxu0  ;;  %v5547_v50 = vpop.f32.mrb[40].mxu1 }
 0x238   :  { %v5529_v51 = vpop.f32.mrb[43].mxu0  ;;  %v5548_v52 = vpop.f32.mrb[41].mxu1 }
 0x239   :  { %v4371_v53 = vadd.f32 %v5527_v48, %v4331_v45  ;;  %v5549_v54 = vadd.f32 %v5548_v52, %v5547_v50  ;;  %v5550_v55 = vpop.f32.mrb[42].mxu1 }
 0x23a   :  { %v5551_v56 = vpop.f32.mrb[43].mxu1 }
 0x23b   :  { %v4411_v57 = vadd.f32 %v5549_v54, %v4371_v53 }
 0x255   :  { %v5569_v58 = vpop.f32.mrb[44].mxu0 }
 0x256   :  { %v5570_v59 = vpop.f32.mrb[45].mxu0 }
 0x257   :  { %v5571_v60 = vadd.f32 %v5570_v59, %v5569_v58  ;;  %v5572_v61 = vpop.f32.mrb[46].mxu0  ;;  %v5591_v62 = vpop.f32.mrb[44].mxu1 }
 0x258   :  { %v5573_v63 = vpop.f32.mrb[47].mxu0  ;;  %v5592_v0 = vpop.f32.mrb[45].mxu1 }
 0x259   :  { %v4451_v1 = vadd.f32 %v5571_v60, %v4411_v57  ;;  %v5593_v2 = vadd.f32 %v5592_v0, %v5591_v62  ;;  %v5594_v3 = vpop.f32.mrb[46].mxu1 }
 0x25a   :  { %v5595_v4 = vpop.f32.mrb[47].mxu1 }
 0x25b   :  { %v4491_v5 = vadd.f32 %v5593_v2, %v4451_v1 }
 0x275   :  { %v4530_v6 = vpop.f32.mrb[48].mxu0 }
 0x276   :  { %v4531_v41 = vadd.f32 %v4530_v6, %v4491_v5  ;;  %v5633_v7 = vpop.f32.mrb[49].mxu0 }
 0x277   :  { %v4533_v8 = vpop.f32.mrb[50].mxu0 }
 0x278   :  { %v4536_v9 = vmax.f32 %v4531_v41, 0.0  ;;  %v5634_v10 = vpop.f32.mrb[51].mxu0 }
 0x27a   :  { %v4537_v11 = vpack.c.bf16 %v4536_v9, %v4536_v9 }
 0x27c   :  { %5652 = vmatmul.mubr.bf16.vlgmr.msra.gmra.mrb[48].mxu1 %v4537_v11 }
 0x34f   :  { %v4643_v13 = vpop.f32.mrb[48].mxu1 }
 0x350   :  { %v4644_v14 = vadd.f32 %v5060_v12, %v4643_v13  ;;  %v5653_v15 = vpop.f32.mrb[49].mxu1 }
 0x351   :  { %v4646_v16 = vpop.f32.mrb[50].mxu1 }
 0x352   :  { %6065 = vtanh.f32 %v4644_v14  ;;  %v5654_v17 = vpop.f32.mrb[51].mxu1 }
 0x35c   :  { %v6066_v18 = vpop.eup %6065 }
 0x35d   :  { %4651 = vst.msk [vmem:[#allocation2] sm:$0x3] %vm4650_vm1, %v6066_v18 }
 0x35e   :  { %6078 = shalt.err (!%p6075_p4)
}
 0x35f   :  { %s6079_s25 = scalar_lea.hbm %s7468_s5, 32 }
 0x360   :  { %p6080_p5 = scmp.ne.s32.totalorder %s7468_s5, %s6079_s25  ;;  %p6083_p6 = scmp.lt.u32.totalorder %s6079_s25, %s7468_s5 }
 0x362   :  { %p6085_p7 = pnand %p6083_p6, %p6080_p5 }
 0x364   :  { %6088 = shalt.err (!%p6085_p7)
}
 0x365   :  { %4661 = dma.vmem_to_hbm [thread:$0]  %s4659_s22, 32, %s7468_s5, [#allocation3]  }
 0x366   :  { %6089 = dma.done.wait [#allocation3], 32  }
 0x367   :  { %6090 = vsyncadd [#allocation3], 4294967264 }
 0x368   :  { %4665 = vsyncpa [#allocation3], 1 }

</bundles_post_ra>
